<compile_context>
chip_gen: v7x
topology: tpu7x:2x2x1
jax: 0.10.0
libtpu: 0.0.40
codegen_flags: <defaults>
</compile_context>

<pallas_src>
import functools

import jax
import jax.numpy as jnp
from jax import lax
from jax.experimental import pallas as pl
from jax.experimental.pallas import tpu as pltpu

HIDDEN = 64          # LSTM hidden size (H)
HP = 128             # padded per-gate lane block (gate lives in lanes [0, H))
FEAT = 32
OUT = 2


def _lstm_keys_kernel(x_ref,                        # (T*Bp, I)
                      w1x_ref, whh1_ref, b1_ref,    # (I,4*HP), (HP,4*HP), (1,4*HP)
                      wih2_ref, whh2_ref, b2_ref,   # (HP,4*HP), (HP,4*HP), (1,4*HP)
                      wd_ref, bd_ref,               # (HP,32), (1,32)
                      wk_ref, bk_ref,               # (32,2), (1,2)
                      out_ref,                      # (T*Bp, 2)
                      h2_scratch,                   # VMEM (T*Bp, HP)
                      *, seq_len, batch_pad):
    T, Bp = seq_len, batch_pad
    G4 = 4 * HP

    # ---- hoisted: layer-1 input projection + fused bias for ALL timesteps
    # (one MXU pass; i/f/o columns already pre-scaled by 0.5 in the wrapper).
    gx1 = (jnp.dot(x_ref[...], w1x_ref[...], preferred_element_type=jnp.float32)
           + b1_ref[...])                                        # (T*Bp, 4*HP)

    # ---- hoisted weight / bias reads + broadcasts (nothing re-read per step)
    whh1 = whh1_ref[...]
    wih2 = wih2_ref[...]
    whh2 = whh2_ref[...]
    b2b = jnp.broadcast_to(b2_ref[...], (Bp, G4))

    # ---- hoisted gate-slot mask: cell gate 'g' occupies lane block 2
    lane = lax.broadcasted_iota(jnp.int32, (Bp, G4), 1)
    g_slot = (lane >= 2 * HP) & (lane < 3 * HP)

    def combine(gates, c_prev):
        # Single EUP pass over the gate vector: sigmoid lanes were pre-scaled
        # by 0.5 in the wrapper, so sigmoid(z) = 0.5*tanh(z/2) + 0.5 is one
        # full-width tanh + one VPU fma + one select here.
        y = jnp.tanh(gates)
        act = jnp.where(g_slot, y, y * 0.5 + 0.5)
        # 128-lane-aligned gate blocks -> no lane rotates.
        i_g = act[:, 0 * HP:1 * HP]
        f_g = act[:, 1 * HP:2 * HP]
        g_g = act[:, 2 * HP:3 * HP]
        o_g = act[:, 3 * HP:4 * HP]
        c_new = f_g * c_prev + i_g * g_g          # padded lanes stay exactly 0
        h_new = o_g * jnp.tanh(c_new)             # padded lanes stay exactly 0
        return h_new, c_new

    zeros = jnp.zeros((Bp, HP), jnp.float32)       # PyTorch default h0 = c0 = 0
    h1, c1, h2, c2 = zeros, zeros, zeros, zeros
    # Layer-2 recurrent partial (+ fused bias): only depends on h2_{t-1}, so it
    # is produced right after h2_{t-1} and overlaps with layer-1's next step.
    hh2b = b2b                                     # dot(h2_0 = 0, Whh2) + b2

    # Statically unrolled time loop (T small & static): only h@Whh, h1@Wih2 and
    # the gate elementwise math remain on the serial critical path.
    for t in range(T):
        gates1 = gx1[t * Bp:(t + 1) * Bp, :] + jnp.dot(
            h1, whh1, preferred_element_type=jnp.float32)
        h1, c1 = combine(gates1, c1)

        gates2 = jnp.dot(h1, wih2, preferred_element_type=jnp.float32) + hh2b
        h2, c2 = combine(gates2, c2)

        # Off the critical path: stash h2 for the head, bound vreg live ranges.
        h2_scratch[t * Bp:(t + 1) * Bp, :] = h2

        if t + 1 < T:
            hh2b = jnp.dot(h2, whh2, preferred_element_type=jnp.float32) + b2b

    # ---- hoisted head: one M = T*Bp matmul each, single output store.
    h2_all = h2_scratch[...]                                     # (T*Bp, HP)
    feat = jnp.maximum(
        jnp.dot(h2_all, wd_ref[...], preferred_element_type=jnp.float32)
        + bd_ref[...], 0.0)                                      # ReLU(dense1)
    keys = (jnp.dot(feat, wk_ref[...], preferred_element_type=jnp.float32)
            + bk_ref[...])                                       # (T*Bp, 2)
    # TODO(synk): pad to a lane-dense output width if the head ever runs over
    # thousands of rows (negligible at T*Bp = 64).
    out_ref[...] = keys.astype(out_ref.dtype)


def _gate_cols(w_t):
    """(rows, 4H) PyTorch-gate-ordered [i,f,g,o] columns -> (rows, 4*HP).

    Each gate goes to the lower H lanes of its own 128-lane block (zero-padded
    above); i/f/o columns are pre-scaled by 0.5 so the kernel can use
    sigmoid(z) = 0.5*tanh(z/2) + 0.5 with a single tanh pass.
    """
    H = HIDDEN
    blocks = []
    for g in range(4):
        blk = w_t[:, g * H:(g + 1) * H]
        if g != 2:                      # i, f, o (sigmoid gates)
            blk = 0.5 * blk
        blocks.append(jnp.pad(blk, ((0, 0), (0, HP - H))))
    return jnp.concatenate(blocks, axis=1)


def _pad_rows(w, rows_to):
    return jnp.pad(w, ((0, rows_to - w.shape[0]), (0, 0)))


@jax.jit
def key_model_forward(x, params):
    """x: (B, T, input_size) float32 (batch_first, like PyTorch)."""
    B, T, I = x.shape
    H = HIDDEN
    Bp = ((B + 7) // 8) * 8 if B > 8 else 8      # pad batch to a sublane block

    # time-major rows, batch zero-padded to Bp: row index = t*Bp + b
    x_tm = jnp.transpose(x, (1, 0, 2))                       # (T, B, I)
    x_tm = jnp.pad(x_tm, ((0, 0), (0, Bp - B), (0, 0)))      # (T, Bp, I)
    x_tm = x_tm.reshape(T * Bp, I)

    # Weight prep: transpose, fuse bias pairs, re-layout gate columns into
    # 128-lane-aligned blocks (with the 0.5 sigmoid pre-scale), pad contraction
    # rows of recurrent / layer-2 / head weights from H=64 to HP=128.
    ins = (
        x_tm,
        _gate_cols(params["w_ih_l0"].T),                                 # (I, 4*HP)
        _pad_rows(_gate_cols(params["w_hh_l0"].T), HP),                  # (HP, 4*HP)
        _gate_cols((params["b_ih_l0"] + params["b_hh_l0"]).reshape(1, 4 * H)),
        _pad_rows(_gate_cols(params["w_ih_l1"].T), HP),                  # (HP, 4*HP)
        _pad_rows(_gate_cols(params["w_hh_l1"].T), HP),                  # (HP, 4*HP)
        _gate_cols((params["b_ih_l1"] + params["b_hh_l1"]).reshape(1, 4 * H)),
        _pad_rows(params["w_dense1"].T, HP),                             # (HP, 32)
        params["b_dense1"].reshape(1, FEAT),
        params["w_keys"].T,                                              # (32, 2)
        params["b_keys"].reshape(1, OUT),
    )

    vmem = pl.BlockSpec(memory_space=pltpu.MemorySpace.VMEM)
    out2d = pl.pallas_call(
        functools.partial(_lstm_keys_kernel, seq_len=T, batch_pad=Bp),
        out_shape=jax.ShapeDtypeStruct((T * Bp, OUT), jnp.float32),
        in_specs=[vmem] * len(ins),
        out_specs=vmem,
        scratch_shapes=[pltpu.VMEM((T * Bp, HP), jnp.float32)],
    )(*ins)

    # Drop padded batch rows, back to PyTorch batch_first layout (B, T, 2).
    out = out2d.reshape(T, Bp, OUT)[:, :B, :]
    return jnp.transpose(out, (1, 0, 2))


def _reference_forward(x, params):
    """Pure-JAX reference (lax.scan) for verification."""
    H = HIDDEN
    B = x.shape[0]

    def cell(x_t, h, c, w_ih, w_hh, b_ih, b_hh):
        g = x_t @ w_ih.T + h @ w_hh.T + b_ih + b_hh
        i = jax.nn.sigmoid(g[:, 0 * H:1 * H])
        f = jax.nn.sigmoid(g[:, 1 * H:2 * H])
        gg = jnp.tanh(g[:, 2 * H:3 * H])
        o = jax.nn.sigmoid(g[:, 3 * H:4 * H])
        c = f * c + i * gg
        h = o * jnp.tanh(c)
        return h, c

    def step(carry, x_t):
        h1, c1, h2, c2 = carry
        h1, c1 = cell(x_t, h1, c1, params["w_ih_l0"], params["w_hh_l0"],
                      params["b_ih_l0"], params["b_hh_l0"])
        h2, c2 = cell(h1, h2, c2, params["w_ih_l1"], params["w_hh_l1"],
                      params["b_ih_l1"], params["b_hh_l1"])
        feat = jnp.maximum(h2 @ params["w_dense1"].T + params["b_dense1"], 0.0)
        keys = feat @ params["w_keys"].T + params["b_keys"]
        return (h1, c1, h2, c2), keys

    init = tuple(jnp.zeros((B, H), jnp.float32) for _ in range(4))
    _, ys = lax.scan(step, init, jnp.transpose(x, (1, 0, 2)))
    return jnp.transpose(ys, (1, 0, 2))


def init_params(key, input_size):
    H = HIDDEN
    ks = jax.random.split(key, 12)
    s = 0.1
    return {
        "w_ih_l0": s * jax.random.normal(ks[0], (4 * H, input_size), jnp.float32),
        "w_hh_l0": s * jax.random.normal(ks[1], (4 * H, H), jnp.float32),
        "b_ih_l0": s * jax.random.normal(ks[2], (4 * H,), jnp.float32),
        "b_hh_l0": s * jax.random.normal(ks[3], (4 * H,), jnp.float32),
        "w_ih_l1": s * jax.random.normal(ks[4], (4 * H, H), jnp.float32),
        "w_hh_l1": s * jax.random.normal(ks[5], (4 * H, H), jnp.float32),
        "b_ih_l1": s * jax.random.normal(ks[6], (4 * H,), jnp.float32),
        "b_hh_l1": s * jax.random.normal(ks[7], (4 * H,), jnp.float32),
        "w_dense1": s * jax.random.normal(ks[8], (FEAT, H), jnp.float32),
        "b_dense1": s * jax.random.normal(ks[9], (FEAT,), jnp.float32),
        "w_keys": s * jax.random.normal(ks[10], (OUT, FEAT), jnp.float32),
        "b_keys": s * jax.random.normal(ks[11], (OUT,), jnp.float32),
    }


if __name__ == "__main__":
    key = jax.random.PRNGKey(0)
    k_x, k_p = jax.random.split(key)

    B, T, INPUT_SIZE = 2, 8, 32
    x = jax.random.normal(k_x, (B, T, INPUT_SIZE), jnp.float32)
    params = init_params(k_p, INPUT_SIZE)

    out = key_model_forward(x, params)
    out = jax.block_until_ready(out)
    assert out.shape == (B, T, OUT), out.shape

    ref = _reference_forward(x, params)
    assert jnp.allclose(out, ref, atol=5e-3, rtol=5e-3), (
        float(jnp.max(jnp.abs(out - ref))))

    print("KERNEL_OK")
</pallas_src>

<mosaic_0001>
module attributes {stable_mosaic.version = 11 : i64} {
  func.func @_lstm_keys_kernel(%arg0: memref<64x32xf32, #tpu.memory_space<vmem>>, %arg1: memref<32x512xf32, #tpu.memory_space<vmem>>, %arg2: memref<128x512xf32, #tpu.memory_space<vmem>>, %arg3: memref<1x512xf32, #tpu.memory_space<vmem>>, %arg4: memref<128x512xf32, #tpu.memory_space<vmem>>, %arg5: memref<128x512xf32, #tpu.memory_space<vmem>>, %arg6: memref<1x512xf32, #tpu.memory_space<vmem>>, %arg7: memref<128x32xf32, #tpu.memory_space<vmem>>, %arg8: memref<1x32xf32, #tpu.memory_space<vmem>>, %arg9: memref<32x2xf32, #tpu.memory_space<vmem>>, %arg10: memref<1x2xf32, #tpu.memory_space<vmem>>, %arg11: memref<64x2xf32, #tpu.memory_space<vmem>>, %arg12: memref<64x128xf32, #tpu.memory_space<vmem>>) attributes {dimension_semantics = [], scalar_prefetch = 0 : i64, scratch_operands = 1 : i64, tpu.core_type = #tpu.core_type<tc>} {
    %c0 = arith.constant 0 : index
    %c0_0 = arith.constant 0 : index
    %0 = vector.load %arg0[%c0, %c0_0] : memref<64x32xf32, #tpu.memory_space<vmem>>, vector<64x32xf32>
    %c0_1 = arith.constant 0 : index
    %c0_2 = arith.constant 0 : index
    %1 = vector.load %arg1[%c0_1, %c0_2] : memref<32x512xf32, #tpu.memory_space<vmem>>, vector<32x512xf32>
    %cst = arith.constant dense<0.000000e+00> : vector<64x512xf32>
    %2 = tpu.matmul %0, %1, %cst {dimension_numbers = #tpu.dot_dimension_numbers<[1], [0], [0], [1], [0, 0, 1, 1], [], []>} : vector<64x32xf32>, vector<32x512xf32>, vector<64x512xf32> -> vector<64x512xf32>
    %c0_3 = arith.constant 0 : index
    %c0_4 = arith.constant 0 : index
    %3 = vector.load %arg3[%c0_3, %c0_4] : memref<1x512xf32, #tpu.memory_space<vmem>>, vector<1x512xf32>
    %4 = vector.broadcast %3 : vector<1x512xf32> to vector<64x512xf32>
    %5 = arith.addf %2, %4 : vector<64x512xf32>
    %c0_5 = arith.constant 0 : index
    %c0_6 = arith.constant 0 : index
    %6 = vector.load %arg2[%c0_5, %c0_6] : memref<128x512xf32, #tpu.memory_space<vmem>>, vector<128x512xf32>
    %c0_7 = arith.constant 0 : index
    %c0_8 = arith.constant 0 : index
    %7 = vector.load %arg4[%c0_7, %c0_8] : memref<128x512xf32, #tpu.memory_space<vmem>>, vector<128x512xf32>
    %c0_9 = arith.constant 0 : index
    %c0_10 = arith.constant 0 : index
    %8 = vector.load %arg5[%c0_9, %c0_10] : memref<128x512xf32, #tpu.memory_space<vmem>>, vector<128x512xf32>
    %c0_11 = arith.constant 0 : index
    %c0_12 = arith.constant 0 : index
    %9 = vector.load %arg6[%c0_11, %c0_12] : memref<1x512xf32, #tpu.memory_space<vmem>>, vector<1x512xf32>
    %10 = vector.shape_cast %9 : vector<1x512xf32> to vector<1x512xf32>
    %11 = vector.broadcast %10 : vector<1x512xf32> to vector<8x512xf32>
    %12 = tpu.iota {dimensions = array<i32: 1>} : vector<8x512xi32>
    %c256_i32 = arith.constant 256 : i32
    %13 = vector.broadcast %c256_i32 : i32 to vector<8x512xi32>
    %14 = arith.cmpi sge, %12, %13 : vector<8x512xi32>
    %c384_i32 = arith.constant 384 : i32
    %15 = vector.broadcast %c384_i32 : i32 to vector<8x512xi32>
    %16 = arith.cmpi slt, %12, %15 : vector<8x512xi32>
    %17 = arith.andi %14, %16 : vector<8x512xi1>
    %cst_13 = arith.constant 0.000000e+00 : f32
    %18 = vector.broadcast %cst_13 : f32 to vector<8x128xf32>
    %19 = vector.extract_strided_slice %5 {offsets = [0, 0], sizes = [8, 512], strides = [1, 1]} : vector<64x512xf32> to vector<8x512xf32>
    %cst_14 = arith.constant dense<0.000000e+00> : vector<8x512xf32>
    %20 = tpu.matmul %18, %6, %cst_14 {dimension_numbers = #tpu.dot_dimension_numbers<[1], [0], [0], [1], [0, 0, 1, 1], [], []>} : vector<8x128xf32>, vector<128x512xf32>, vector<8x512xf32> -> vector<8x512xf32>
    %21 = arith.addf %19, %20 : vector<8x512xf32>
    %22 = math.tanh %21 : vector<8x512xf32>
    %cst_15 = arith.constant 5.000000e-01 : f32
    %23 = vector.broadcast %cst_15 : f32 to vector<8x512xf32>
    %24 = arith.mulf %22, %23 : vector<8x512xf32>
    %cst_16 = arith.constant 5.000000e-01 : f32
    %25 = vector.broadcast %cst_16 : f32 to vector<8x512xf32>
    %26 = arith.addf %24, %25 : vector<8x512xf32>
    %27 = arith.select %17, %22, %26 : vector<8x512xi1>, vector<8x512xf32>
    %28 = vector.extract_strided_slice %27 {offsets = [0, 0], sizes = [8, 128], strides = [1, 1]} : vector<8x512xf32> to vector<8x128xf32>
    %29 = vector.extract_strided_slice %27 {offsets = [0, 128], sizes = [8, 128], strides = [1, 1]} : vector<8x512xf32> to vector<8x128xf32>
    %30 = vector.extract_strided_slice %27 {offsets = [0, 256], sizes = [8, 128], strides = [1, 1]} : vector<8x512xf32> to vector<8x128xf32>
    %31 = vector.extract_strided_slice %27 {offsets = [0, 384], sizes = [8, 128], strides = [1, 1]} : vector<8x512xf32> to vector<8x128xf32>
    %32 = arith.mulf %29, %18 : vector<8x128xf32>
    %33 = arith.mulf %28, %30 : vector<8x128xf32>
    %34 = arith.addf %32, %33 : vector<8x128xf32>
    %35 = math.tanh %34 : vector<8x128xf32>
    %36 = arith.mulf %31, %35 : vector<8x128xf32>
    %cst_17 = arith.constant dense<0.000000e+00> : vector<8x512xf32>
    %37 = tpu.matmul %36, %7, %cst_17 {dimension_numbers = #tpu.dot_dimension_numbers<[1], [0], [0], [1], [0, 0, 1, 1], [], []>} : vector<8x128xf32>, vector<128x512xf32>, vector<8x512xf32> -> vector<8x512xf32>
    %38 = arith.addf %37, %11 : vector<8x512xf32>
    %39 = math.tanh %38 : vector<8x512xf32>
    %cst_18 = arith.constant 5.000000e-01 : f32
    %40 = vector.broadcast %cst_18 : f32 to vector<8x512xf32>
    %41 = arith.mulf %39, %40 : vector<8x512xf32>
    %cst_19 = arith.constant 5.000000e-01 : f32
    %42 = vector.broadcast %cst_19 : f32 to vector<8x512xf32>
    %43 = arith.addf %41, %42 : vector<8x512xf32>
    %44 = arith.select %17, %39, %43 : vector<8x512xi1>, vector<8x512xf32>
    %45 = vector.extract_strided_slice %44 {offsets = [0, 0], sizes = [8, 128], strides = [1, 1]} : vector<8x512xf32> to vector<8x128xf32>
    %46 = vector.extract_strided_slice %44 {offsets = [0, 128], sizes = [8, 128], strides = [1, 1]} : vector<8x512xf32> to vector<8x128xf32>
    %47 = vector.extract_strided_slice %44 {offsets = [0, 256], sizes = [8, 128], strides = [1, 1]} : vector<8x512xf32> to vector<8x128xf32>
    %48 = vector.extract_strided_slice %44 {offsets = [0, 384], sizes = [8, 128], strides = [1, 1]} : vector<8x512xf32> to vector<8x128xf32>
    %49 = arith.mulf %46, %18 : vector<8x128xf32>
    %50 = arith.mulf %45, %47 : vector<8x128xf32>
    %51 = arith.addf %49, %50 : vector<8x128xf32>
    %52 = math.tanh %51 : vector<8x128xf32>
    %53 = arith.mulf %48, %52 : vector<8x128xf32>
    %c0_20 = arith.constant 0 : index
    %c0_21 = arith.constant 0 : index
    %54 = vector.load %arg12[%c0_20, %c0_21] : memref<64x128xf32, #tpu.memory_space<vmem>>, vector<8x128xf32>
    tpu.vector_store %arg12[%c0_20, %c0_21], %53 {strides = array<i32>} : memref<64x128xf32, #tpu.memory_space<vmem>>, vector<8x128xf32>,
    %cst_22 = arith.constant dense<0.000000e+00> : vector<8x512xf32>
    %55 = tpu.matmul %53, %8, %cst_22 {dimension_numbers = #tpu.dot_dimension_numbers<[1], [0], [0], [1], [0, 0, 1, 1], [], []>} : vector<8x128xf32>, vector<128x512xf32>, vector<8x512xf32> -> vector<8x512xf32>
    %56 = arith.addf %55, %11 : vector<8x512xf32>
    %57 = vector.extract_strided_slice %5 {offsets = [8, 0], sizes = [8, 512], strides = [1, 1]} : vector<64x512xf32> to vector<8x512xf32>
    %cst_23 = arith.constant dense<0.000000e+00> : vector<8x512xf32>
    %58 = tpu.matmul %36, %6, %cst_23 {dimension_numbers = #tpu.dot_dimension_numbers<[1], [0], [0], [1], [0, 0, 1, 1], [], []>} : vector<8x128xf32>, vector<128x512xf32>, vector<8x512xf32> -> vector<8x512xf32>
    %59 = arith.addf %57, %58 : vector<8x512xf32>
    %60 = math.tanh %59 : vector<8x512xf32>
    %cst_24 = arith.constant 5.000000e-01 : f32
    %61 = vector.broadcast %cst_24 : f32 to vector<8x512xf32>
    %62 = arith.mulf %60, %61 : vector<8x512xf32>
    %cst_25 = arith.constant 5.000000e-01 : f32
    %63 = vector.broadcast %cst_25 : f32 to vector<8x512xf32>
    %64 = arith.addf %62, %63 : vector<8x512xf32>
    %65 = arith.select %17, %60, %64 : vector<8x512xi1>, vector<8x512xf32>
    %66 = vector.extract_strided_slice %65 {offsets = [0, 0], sizes = [8, 128], strides = [1, 1]} : vector<8x512xf32> to vector<8x128xf32>
    %67 = vector.extract_strided_slice %65 {offsets = [0, 128], sizes = [8, 128], strides = [1, 1]} : vector<8x512xf32> to vector<8x128xf32>
    %68 = vector.extract_strided_slice %65 {offsets = [0, 256], sizes = [8, 128], strides = [1, 1]} : vector<8x512xf32> to vector<8x128xf32>
    %69 = vector.extract_strided_slice %65 {offsets = [0, 384], sizes = [8, 128], strides = [1, 1]} : vector<8x512xf32> to vector<8x128xf32>
    %70 = arith.mulf %67, %34 : vector<8x128xf32>
    %71 = arith.mulf %66, %68 : vector<8x128xf32>
    %72 = arith.addf %70, %71 : vector<8x128xf32>
    %73 = math.tanh %72 : vector<8x128xf32>
    %74 = arith.mulf %69, %73 : vector<8x128xf32>
    %cst_26 = arith.constant dense<0.000000e+00> : vector<8x512xf32>
    %75 = tpu.matmul %74, %7, %cst_26 {dimension_numbers = #tpu.dot_dimension_numbers<[1], [0], [0], [1], [0, 0, 1, 1], [], []>} : vector<8x128xf32>, vector<128x512xf32>, vector<8x512xf32> -> vector<8x512xf32>
    %76 = arith.addf %75, %56 : vector<8x512xf32>
    %77 = math.tanh %76 : vector<8x512xf32>
    %cst_27 = arith.constant 5.000000e-01 : f32
    %78 = vector.broadcast %cst_27 : f32 to vector<8x512xf32>
    %79 = arith.mulf %77, %78 : vector<8x512xf32>
    %cst_28 = arith.constant 5.000000e-01 : f32
    %80 = vector.broadcast %cst_28 : f32 to vector<8x512xf32>
    %81 = arith.addf %79, %80 : vector<8x512xf32>
    %82 = arith.select %17, %77, %81 : vector<8x512xi1>, vector<8x512xf32>
    %83 = vector.extract_strided_slice %82 {offsets = [0, 0], sizes = [8, 128], strides = [1, 1]} : vector<8x512xf32> to vector<8x128xf32>
    %84 = vector.extract_strided_slice %82 {offsets = [0, 128], sizes = [8, 128], strides = [1, 1]} : vector<8x512xf32> to vector<8x128xf32>
    %85 = vector.extract_strided_slice %82 {offsets = [0, 256], sizes = [8, 128], strides = [1, 1]} : vector<8x512xf32> to vector<8x128xf32>
    %86 = vector.extract_strided_slice %82 {offsets = [0, 384], sizes = [8, 128], strides = [1, 1]} : vector<8x512xf32> to vector<8x128xf32>
    %87 = arith.mulf %84, %51 : vector<8x128xf32>
    %88 = arith.mulf %83, %85 : vector<8x128xf32>
    %89 = arith.addf %87, %88 : vector<8x128xf32>
    %90 = math.tanh %89 : vector<8x128xf32>
    %91 = arith.mulf %86, %90 : vector<8x128xf32>
    %c8 = arith.constant 8 : index
    %c0_29 = arith.constant 0 : index
    %92 = vector.load %arg12[%c8, %c0_29] : memref<64x128xf32, #tpu.memory_space<vmem>>, vector<8x128xf32>
    tpu.vector_store %arg12[%c8, %c0_29], %91 {strides = array<i32>} : memref<64x128xf32, #tpu.memory_space<vmem>>, vector<8x128xf32>,
    %cst_30 = arith.constant dense<0.000000e+00> : vector<8x512xf32>
    %93 = tpu.matmul %91, %8, %cst_30 {dimension_numbers = #tpu.dot_dimension_numbers<[1], [0], [0], [1], [0, 0, 1, 1], [], []>} : vector<8x128xf32>, vector<128x512xf32>, vector<8x512xf32> -> vector<8x512xf32>
    %94 = arith.addf %93, %11 : vector<8x512xf32>
    %95 = vector.extract_strided_slice %5 {offsets = [16, 0], sizes = [8, 512], strides = [1, 1]} : vector<64x512xf32> to vector<8x512xf32>
    %cst_31 = arith.constant dense<0.000000e+00> : vector<8x512xf32>
    %96 = tpu.matmul %74, %6, %cst_31 {dimension_numbers = #tpu.dot_dimension_numbers<[1], [0], [0], [1], [0, 0, 1, 1], [], []>} : vector<8x128xf32>, vector<128x512xf32>, vector<8x512xf32> -> vector<8x512xf32>
    %97 = arith.addf %95, %96 : vector<8x512xf32>
    %98 = math.tanh %97 : vector<8x512xf32>
    %cst_32 = arith.constant 5.000000e-01 : f32
    %99 = vector.broadcast %cst_32 : f32 to vector<8x512xf32>
    %100 = arith.mulf %98, %99 : vector<8x512xf32>
    %cst_33 = arith.constant 5.000000e-01 : f32
    %101 = vector.broadcast %cst_33 : f32 to vector<8x512xf32>
    %102 = arith.addf %100, %101 : vector<8x512xf32>
    %103 = arith.select %17, %98, %102 : vector<8x512xi1>, vector<8x512xf32>
    %104 = vector.extract_strided_slice %103 {offsets = [0, 0], sizes = [8, 128], strides = [1, 1]} : vector<8x512xf32> to vector<8x128xf32>
    %105 = vector.extract_strided_slice %103 {offsets = [0, 128], sizes = [8, 128], strides = [1, 1]} : vector<8x512xf32> to vector<8x128xf32>
    %106 = vector.extract_strided_slice %103 {offsets = [0, 256], sizes = [8, 128], strides = [1, 1]} : vector<8x512xf32> to vector<8x128xf32>
    %107 = vector.extract_strided_slice %103 {offsets = [0, 384], sizes = [8, 128], strides = [1, 1]} : vector<8x512xf32> to vector<8x128xf32>
    %108 = arith.mulf %105, %72 : vector<8x128xf32>
    %109 = arith.mulf %104, %106 : vector<8x128xf32>
    %110 = arith.addf %108, %109 : vector<8x128xf32>
    %111 = math.tanh %110 : vector<8x128xf32>
    %112 = arith.mulf %107, %111 : vector<8x128xf32>
    %cst_34 = arith.constant dense<0.000000e+00> : vector<8x512xf32>
    %113 = tpu.matmul %112, %7, %cst_34 {dimension_numbers = #tpu.dot_dimension_numbers<[1], [0], [0], [1], [0, 0, 1, 1], [], []>} : vector<8x128xf32>, vector<128x512xf32>, vector<8x512xf32> -> vector<8x512xf32>
    %114 = arith.addf %113, %94 : vector<8x512xf32>
    %115 = math.tanh %114 : vector<8x512xf32>
    %cst_35 = arith.constant 5.000000e-01 : f32
    %116 = vector.broadcast %cst_35 : f32 to vector<8x512xf32>
    %117 = arith.mulf %115, %116 : vector<8x512xf32>
    %cst_36 = arith.constant 5.000000e-01 : f32
    %118 = vector.broadcast %cst_36 : f32 to vector<8x512xf32>
    %119 = arith.addf %117, %118 : vector<8x512xf32>
    %120 = arith.select %17, %115, %119 : vector<8x512xi1>, vector<8x512xf32>
    %121 = vector.extract_strided_slice %120 {offsets = [0, 0], sizes = [8, 128], strides = [1, 1]} : vector<8x512xf32> to vector<8x128xf32>
    %122 = vector.extract_strided_slice %120 {offsets = [0, 128], sizes = [8, 128], strides = [1, 1]} : vector<8x512xf32> to vector<8x128xf32>
    %123 = vector.extract_strided_slice %120 {offsets = [0, 256], sizes = [8, 128], strides = [1, 1]} : vector<8x512xf32> to vector<8x128xf32>
    %124 = vector.extract_strided_slice %120 {offsets = [0, 384], sizes = [8, 128], strides = [1, 1]} : vector<8x512xf32> to vector<8x128xf32>
    %125 = arith.mulf %122, %89 : vector<8x128xf32>
    %126 = arith.mulf %121, %123 : vector<8x128xf32>
    %127 = arith.addf %125, %126 : vector<8x128xf32>
    %128 = math.tanh %127 : vector<8x128xf32>
    %129 = arith.mulf %124, %128 : vector<8x128xf32>
    %c16 = arith.constant 16 : index
    %c0_37 = arith.constant 0 : index
    %130 = vector.load %arg12[%c16, %c0_37] : memref<64x128xf32, #tpu.memory_space<vmem>>, vector<8x128xf32>
    tpu.vector_store %arg12[%c16, %c0_37], %129 {strides = array<i32>} : memref<64x128xf32, #tpu.memory_space<vmem>>, vector<8x128xf32>,
    %cst_38 = arith.constant dense<0.000000e+00> : vector<8x512xf32>
    %131 = tpu.matmul %129, %8, %cst_38 {dimension_numbers = #tpu.dot_dimension_numbers<[1], [0], [0], [1], [0, 0, 1, 1], [], []>} : vector<8x128xf32>, vector<128x512xf32>, vector<8x512xf32> -> vector<8x512xf32>
    %132 = arith.addf %131, %11 : vector<8x512xf32>
    %133 = vector.extract_strided_slice %5 {offsets = [24, 0], sizes = [8, 512], strides = [1, 1]} : vector<64x512xf32> to vector<8x512xf32>
    %cst_39 = arith.constant dense<0.000000e+00> : vector<8x512xf32>
    %134 = tpu.matmul %112, %6, %cst_39 {dimension_numbers = #tpu.dot_dimension_numbers<[1], [0], [0], [1], [0, 0, 1, 1], [], []>} : vector<8x128xf32>, vector<128x512xf32>, vector<8x512xf32> -> vector<8x512xf32>
    %135 = arith.addf %133, %134 : vector<8x512xf32>
    %136 = math.tanh %135 : vector<8x512xf32>
    %cst_40 = arith.constant 5.000000e-01 : f32
    %137 = vector.broadcast %cst_40 : f32 to vector<8x512xf32>
    %138 = arith.mulf %136, %137 : vector<8x512xf32>
    %cst_41 = arith.constant 5.000000e-01 : f32
    %139 = vector.broadcast %cst_41 : f32 to vector<8x512xf32>
    %140 = arith.addf %138, %139 : vector<8x512xf32>
    %141 = arith.select %17, %136, %140 : vector<8x512xi1>, vector<8x512xf32>
    %142 = vector.extract_strided_slice %141 {offsets = [0, 0], sizes = [8, 128], strides = [1, 1]} : vector<8x512xf32> to vector<8x128xf32>
    %143 = vector.extract_strided_slice %141 {offsets = [0, 128], sizes = [8, 128], strides = [1, 1]} : vector<8x512xf32> to vector<8x128xf32>
    %144 = vector.extract_strided_slice %141 {offsets = [0, 256], sizes = [8, 128], strides = [1, 1]} : vector<8x512xf32> to vector<8x128xf32>
    %145 = vector.extract_strided_slice %141 {offsets = [0, 384], sizes = [8, 128], strides = [1, 1]} : vector<8x512xf32> to vector<8x128xf32>
    %146 = arith.mulf %143, %110 : vector<8x128xf32>
    %147 = arith.mulf %142, %144 : vector<8x128xf32>
    %148 = arith.addf %146, %147 : vector<8x128xf32>
    %149 = math.tanh %148 : vector<8x128xf32>
    %150 = arith.mulf %145, %149 : vector<8x128xf32>
    %cst_42 = arith.constant dense<0.000000e+00> : vector<8x512xf32>
    %151 = tpu.matmul %150, %7, %cst_42 {dimension_numbers = #tpu.dot_dimension_numbers<[1], [0], [0], [1], [0, 0, 1, 1], [], []>} : vector<8x128xf32>, vector<128x512xf32>, vector<8x512xf32> -> vector<8x512xf32>
    %152 = arith.addf %151, %132 : vector<8x512xf32>
    %153 = math.tanh %152 : vector<8x512xf32>
    %cst_43 = arith.constant 5.000000e-01 : f32
    %154 = vector.broadcast %cst_43 : f32 to vector<8x512xf32>
    %155 = arith.mulf %153, %154 : vector<8x512xf32>
    %cst_44 = arith.constant 5.000000e-01 : f32
    %156 = vector.broadcast %cst_44 : f32 to vector<8x512xf32>
    %157 = arith.addf %155, %156 : vector<8x512xf32>
    %158 = arith.select %17, %153, %157 : vector<8x512xi1>, vector<8x512xf32>
    %159 = vector.extract_strided_slice %158 {offsets = [0, 0], sizes = [8, 128], strides = [1, 1]} : vector<8x512xf32> to vector<8x128xf32>
    %160 = vector.extract_strided_slice %158 {offsets = [0, 128], sizes = [8, 128], strides = [1, 1]} : vector<8x512xf32> to vector<8x128xf32>
    %161 = vector.extract_strided_slice %158 {offsets = [0, 256], sizes = [8, 128], strides = [1, 1]} : vector<8x512xf32> to vector<8x128xf32>
    %162 = vector.extract_strided_slice %158 {offsets = [0, 384], sizes = [8, 128], strides = [1, 1]} : vector<8x512xf32> to vector<8x128xf32>
    %163 = arith.mulf %160, %127 : vector<8x128xf32>
    %164 = arith.mulf %159, %161 : vector<8x128xf32>
    %165 = arith.addf %163, %164 : vector<8x128xf32>
    %166 = math.tanh %165 : vector<8x128xf32>
    %167 = arith.mulf %162, %166 : vector<8x128xf32>
    %c24 = arith.constant 24 : index
    %c0_45 = arith.constant 0 : index
    %168 = vector.load %arg12[%c24, %c0_45] : memref<64x128xf32, #tpu.memory_space<vmem>>, vector<8x128xf32>
    tpu.vector_store %arg12[%c24, %c0_45], %167 {strides = array<i32>} : memref<64x128xf32, #tpu.memory_space<vmem>>, vector<8x128xf32>,
    %cst_46 = arith.constant dense<0.000000e+00> : vector<8x512xf32>
    %169 = tpu.matmul %167, %8, %cst_46 {dimension_numbers = #tpu.dot_dimension_numbers<[1], [0], [0], [1], [0, 0, 1, 1], [], []>} : vector<8x128xf32>, vector<128x512xf32>, vector<8x512xf32> -> vector<8x512xf32>
    %170 = arith.addf %169, %11 : vector<8x512xf32>
    %171 = vector.extract_strided_slice %5 {offsets = [32, 0], sizes = [8, 512], strides = [1, 1]} : vector<64x512xf32> to vector<8x512xf32>
    %cst_47 = arith.constant dense<0.000000e+00> : vector<8x512xf32>
    %172 = tpu.matmul %150, %6, %cst_47 {dimension_numbers = #tpu.dot_dimension_numbers<[1], [0], [0], [1], [0, 0, 1, 1], [], []>} : vector<8x128xf32>, vector<128x512xf32>, vector<8x512xf32> -> vector<8x512xf32>
    %173 = arith.addf %171, %172 : vector<8x512xf32>
    %174 = math.tanh %173 : vector<8x512xf32>
    %cst_48 = arith.constant 5.000000e-01 : f32
    %175 = vector.broadcast %cst_48 : f32 to vector<8x512xf32>
    %176 = arith.mulf %174, %175 : vector<8x512xf32>
    %cst_49 = arith.constant 5.000000e-01 : f32
    %177 = vector.broadcast %cst_49 : f32 to vector<8x512xf32>
    %178 = arith.addf %176, %177 : vector<8x512xf32>
    %179 = arith.select %17, %174, %178 : vector<8x512xi1>, vector<8x512xf32>
    %180 = vector.extract_strided_slice %179 {offsets = [0, 0], sizes = [8, 128], strides = [1, 1]} : vector<8x512xf32> to vector<8x128xf32>
    %181 = vector.extract_strided_slice %179 {offsets = [0, 128], sizes = [8, 128], strides = [1, 1]} : vector<8x512xf32> to vector<8x128xf32>
    %182 = vector.extract_strided_slice %179 {offsets = [0, 256], sizes = [8, 128], strides = [1, 1]} : vector<8x512xf32> to vector<8x128xf32>
    %183 = vector.extract_strided_slice %179 {offsets = [0, 384], sizes = [8, 128], strides = [1, 1]} : vector<8x512xf32> to vector<8x128xf32>
    %184 = arith.mulf %181, %148 : vector<8x128xf32>
    %185 = arith.mulf %180, %182 : vector<8x128xf32>
    %186 = arith.addf %184, %185 : vector<8x128xf32>
    %187 = math.tanh %186 : vector<8x128xf32>
    %188 = arith.mulf %183, %187 : vector<8x128xf32>
    %cst_50 = arith.constant dense<0.000000e+00> : vector<8x512xf32>
    %189 = tpu.matmul %188, %7, %cst_50 {dimension_numbers = #tpu.dot_dimension_numbers<[1], [0], [0], [1], [0, 0, 1, 1], [], []>} : vector<8x128xf32>, vector<128x512xf32>, vector<8x512xf32> -> vector<8x512xf32>
    %190 = arith.addf %189, %170 : vector<8x512xf32>
    %191 = math.tanh %190 : vector<8x512xf32>
    %cst_51 = arith.constant 5.000000e-01 : f32
    %192 = vector.broadcast %cst_51 : f32 to vector<8x512xf32>
    %193 = arith.mulf %191, %192 : vector<8x512xf32>
    %cst_52 = arith.constant 5.000000e-01 : f32
    %194 = vector.broadcast %cst_52 : f32 to vector<8x512xf32>
    %195 = arith.addf %193, %194 : vector<8x512xf32>
    %196 = arith.select %17, %191, %195 : vector<8x512xi1>, vector<8x512xf32>
    %197 = vector.extract_strided_slice %196 {offsets = [0, 0], sizes = [8, 128], strides = [1, 1]} : vector<8x512xf32> to vector<8x128xf32>
    %198 = vector.extract_strided_slice %196 {offsets = [0, 128], sizes = [8, 128], strides = [1, 1]} : vector<8x512xf32> to vector<8x128xf32>
    %199 = vector.extract_strided_slice %196 {offsets = [0, 256], sizes = [8, 128], strides = [1, 1]} : vector<8x512xf32> to vector<8x128xf32>
    %200 = vector.extract_strided_slice %196 {offsets = [0, 384], sizes = [8, 128], strides = [1, 1]} : vector<8x512xf32> to vector<8x128xf32>
    %201 = arith.mulf %198, %165 : vector<8x128xf32>
    %202 = arith.mulf %197, %199 : vector<8x128xf32>
    %203 = arith.addf %201, %202 : vector<8x128xf32>
    %204 = math.tanh %203 : vector<8x128xf32>
    %205 = arith.mulf %200, %204 : vector<8x128xf32>
    %c32 = arith.constant 32 : index
    %c0_53 = arith.constant 0 : index
    %206 = vector.load %arg12[%c32, %c0_53] : memref<64x128xf32, #tpu.memory_space<vmem>>, vector<8x128xf32>
    tpu.vector_store %arg12[%c32, %c0_53], %205 {strides = array<i32>} : memref<64x128xf32, #tpu.memory_space<vmem>>, vector<8x128xf32>,
    %cst_54 = arith.constant dense<0.000000e+00> : vector<8x512xf32>
    %207 = tpu.matmul %205, %8, %cst_54 {dimension_numbers = #tpu.dot_dimension_numbers<[1], [0], [0], [1], [0, 0, 1, 1], [], []>} : vector<8x128xf32>, vector<128x512xf32>, vector<8x512xf32> -> vector<8x512xf32>
    %208 = arith.addf %207, %11 : vector<8x512xf32>
    %209 = vector.extract_strided_slice %5 {offsets = [40, 0], sizes = [8, 512], strides = [1, 1]} : vector<64x512xf32> to vector<8x512xf32>
    %cst_55 = arith.constant dense<0.000000e+00> : vector<8x512xf32>
    %210 = tpu.matmul %188, %6, %cst_55 {dimension_numbers = #tpu.dot_dimension_numbers<[1], [0], [0], [1], [0, 0, 1, 1], [], []>} : vector<8x128xf32>, vector<128x512xf32>, vector<8x512xf32> -> vector<8x512xf32>
    %211 = arith.addf %209, %210 : vector<8x512xf32>
    %212 = math.tanh %211 : vector<8x512xf32>
    %cst_56 = arith.constant 5.000000e-01 : f32
    %213 = vector.broadcast %cst_56 : f32 to vector<8x512xf32>
    %214 = arith.mulf %212, %213 : vector<8x512xf32>
    %cst_57 = arith.constant 5.000000e-01 : f32
    %215 = vector.broadcast %cst_57 : f32 to vector<8x512xf32>
    %216 = arith.addf %214, %215 : vector<8x512xf32>
    %217 = arith.select %17, %212, %216 : vector<8x512xi1>, vector<8x512xf32>
    %218 = vector.extract_strided_slice %217 {offsets = [0, 0], sizes = [8, 128], strides = [1, 1]} : vector<8x512xf32> to vector<8x128xf32>
    %219 = vector.extract_strided_slice %217 {offsets = [0, 128], sizes = [8, 128], strides = [1, 1]} : vector<8x512xf32> to vector<8x128xf32>
    %220 = vector.extract_strided_slice %217 {offsets = [0, 256], sizes = [8, 128], strides = [1, 1]} : vector<8x512xf32> to vector<8x128xf32>
    %221 = vector.extract_strided_slice %217 {offsets = [0, 384], sizes = [8, 128], strides = [1, 1]} : vector<8x512xf32> to vector<8x128xf32>
    %222 = arith.mulf %219, %186 : vector<8x128xf32>
    %223 = arith.mulf %218, %220 : vector<8x128xf32>
    %224 = arith.addf %222, %223 : vector<8x128xf32>
    %225 = math.tanh %224 : vector<8x128xf32>
    %226 = arith.mulf %221, %225 : vector<8x128xf32>
    %cst_58 = arith.constant dense<0.000000e+00> : vector<8x512xf32>
    %227 = tpu.matmul %226, %7, %cst_58 {dimension_numbers = #tpu.dot_dimension_numbers<[1], [0], [0], [1], [0, 0, 1, 1], [], []>} : vector<8x128xf32>, vector<128x512xf32>, vector<8x512xf32> -> vector<8x512xf32>
    %228 = arith.addf %227, %208 : vector<8x512xf32>
    %229 = math.tanh %228 : vector<8x512xf32>
    %cst_59 = arith.constant 5.000000e-01 : f32
    %230 = vector.broadcast %cst_59 : f32 to vector<8x512xf32>
    %231 = arith.mulf %229, %230 : vector<8x512xf32>
    %cst_60 = arith.constant 5.000000e-01 : f32
    %232 = vector.broadcast %cst_60 : f32 to vector<8x512xf32>
    %233 = arith.addf %231, %232 : vector<8x512xf32>
    %234 = arith.select %17, %229, %233 : vector<8x512xi1>, vector<8x512xf32>
    %235 = vector.extract_strided_slice %234 {offsets = [0, 0], sizes = [8, 128], strides = [1, 1]} : vector<8x512xf32> to vector<8x128xf32>
    %236 = vector.extract_strided_slice %234 {offsets = [0, 128], sizes = [8, 128], strides = [1, 1]} : vector<8x512xf32> to vector<8x128xf32>
    %237 = vector.extract_strided_slice %234 {offsets = [0, 256], sizes = [8, 128], strides = [1, 1]} : vector<8x512xf32> to vector<8x128xf32>
    %238 = vector.extract_strided_slice %234 {offsets = [0, 384], sizes = [8, 128], strides = [1, 1]} : vector<8x512xf32> to vector<8x128xf32>
    %239 = arith.mulf %236, %203 : vector<8x128xf32>
    %240 = arith.mulf %235, %237 : vector<8x128xf32>
    %241 = arith.addf %239, %240 : vector<8x128xf32>
    %242 = math.tanh %241 : vector<8x128xf32>
    %243 = arith.mulf %238, %242 : vector<8x128xf32>
    %c40 = arith.constant 40 : index
    %c0_61 = arith.constant 0 : index
    %244 = vector.load %arg12[%c40, %c0_61] : memref<64x128xf32, #tpu.memory_space<vmem>>, vector<8x128xf32>
    tpu.vector_store %arg12[%c40, %c0_61], %243 {strides = array<i32>} : memref<64x128xf32, #tpu.memory_space<vmem>>, vector<8x128xf32>,
    %cst_62 = arith.constant dense<0.000000e+00> : vector<8x512xf32>
    %245 = tpu.matmul %243, %8, %cst_62 {dimension_numbers = #tpu.dot_dimension_numbers<[1], [0], [0], [1], [0, 0, 1, 1], [], []>} : vector<8x128xf32>, vector<128x512xf32>, vector<8x512xf32> -> vector<8x512xf32>
    %246 = arith.addf %245, %11 : vector<8x512xf32>
    %247 = vector.extract_strided_slice %5 {offsets = [48, 0], sizes = [8, 512], strides = [1, 1]} : vector<64x512xf32> to vector<8x512xf32>
    %cst_63 = arith.constant dense<0.000000e+00> : vector<8x512xf32>
    %248 = tpu.matmul %226, %6, %cst_63 {dimension_numbers = #tpu.dot_dimension_numbers<[1], [0], [0], [1], [0, 0, 1, 1], [], []>} : vector<8x128xf32>, vector<128x512xf32>, vector<8x512xf32> -> vector<8x512xf32>
    %249 = arith.addf %247, %248 : vector<8x512xf32>
    %250 = math.tanh %249 : vector<8x512xf32>
    %cst_64 = arith.constant 5.000000e-01 : f32
    %251 = vector.broadcast %cst_64 : f32 to vector<8x512xf32>
    %252 = arith.mulf %250, %251 : vector<8x512xf32>
    %cst_65 = arith.constant 5.000000e-01 : f32
    %253 = vector.broadcast %cst_65 : f32 to vector<8x512xf32>
    %254 = arith.addf %252, %253 : vector<8x512xf32>
    %255 = arith.select %17, %250, %254 : vector<8x512xi1>, vector<8x512xf32>
    %256 = vector.extract_strided_slice %255 {offsets = [0, 0], sizes = [8, 128], strides = [1, 1]} : vector<8x512xf32> to vector<8x128xf32>
    %257 = vector.extract_strided_slice %255 {offsets = [0, 128], sizes = [8, 128], strides = [1, 1]} : vector<8x512xf32> to vector<8x128xf32>
    %258 = vector.extract_strided_slice %255 {offsets = [0, 256], sizes = [8, 128], strides = [1, 1]} : vector<8x512xf32> to vector<8x128xf32>
    %259 = vector.extract_strided_slice %255 {offsets = [0, 384], sizes = [8, 128], strides = [1, 1]} : vector<8x512xf32> to vector<8x128xf32>
    %260 = arith.mulf %257, %224 : vector<8x128xf32>
    %261 = arith.mulf %256, %258 : vector<8x128xf32>
    %262 = arith.addf %260, %261 : vector<8x128xf32>
    %263 = math.tanh %262 : vector<8x128xf32>
    %264 = arith.mulf %259, %263 : vector<8x128xf32>
    %cst_66 = arith.constant dense<0.000000e+00> : vector<8x512xf32>
    %265 = tpu.matmul %264, %7, %cst_66 {dimension_numbers = #tpu.dot_dimension_numbers<[1], [0], [0], [1], [0, 0, 1, 1], [], []>} : vector<8x128xf32>, vector<128x512xf32>, vector<8x512xf32> -> vector<8x512xf32>
    %266 = arith.addf %265, %246 : vector<8x512xf32>
    %267 = math.tanh %266 : vector<8x512xf32>
    %cst_67 = arith.constant 5.000000e-01 : f32
    %268 = vector.broadcast %cst_67 : f32 to vector<8x512xf32>
    %269 = arith.mulf %267, %268 : vector<8x512xf32>
    %cst_68 = arith.constant 5.000000e-01 : f32
    %270 = vector.broadcast %cst_68 : f32 to vector<8x512xf32>
    %271 = arith.addf %269, %270 : vector<8x512xf32>
    %272 = arith.select %17, %267, %271 : vector<8x512xi1>, vector<8x512xf32>
    %273 = vector.extract_strided_slice %272 {offsets = [0, 0], sizes = [8, 128], strides = [1, 1]} : vector<8x512xf32> to vector<8x128xf32>
    %274 = vector.extract_strided_slice %272 {offsets = [0, 128], sizes = [8, 128], strides = [1, 1]} : vector<8x512xf32> to vector<8x128xf32>
    %275 = vector.extract_strided_slice %272 {offsets = [0, 256], sizes = [8, 128], strides = [1, 1]} : vector<8x512xf32> to vector<8x128xf32>
    %276 = vector.extract_strided_slice %272 {offsets = [0, 384], sizes = [8, 128], strides = [1, 1]} : vector<8x512xf32> to vector<8x128xf32>
    %277 = arith.mulf %274, %241 : vector<8x128xf32>
    %278 = arith.mulf %273, %275 : vector<8x128xf32>
    %279 = arith.addf %277, %278 : vector<8x128xf32>
    %280 = math.tanh %279 : vector<8x128xf32>
    %281 = arith.mulf %276, %280 : vector<8x128xf32>
    %c48 = arith.constant 48 : index
    %c0_69 = arith.constant 0 : index
    %282 = vector.load %arg12[%c48, %c0_69] : memref<64x128xf32, #tpu.memory_space<vmem>>, vector<8x128xf32>
    tpu.vector_store %arg12[%c48, %c0_69], %281 {strides = array<i32>} : memref<64x128xf32, #tpu.memory_space<vmem>>, vector<8x128xf32>,
    %cst_70 = arith.constant dense<0.000000e+00> : vector<8x512xf32>
    %283 = tpu.matmul %281, %8, %cst_70 {dimension_numbers = #tpu.dot_dimension_numbers<[1], [0], [0], [1], [0, 0, 1, 1], [], []>} : vector<8x128xf32>, vector<128x512xf32>, vector<8x512xf32> -> vector<8x512xf32>
    %284 = arith.addf %283, %11 : vector<8x512xf32>
    %285 = vector.extract_strided_slice %5 {offsets = [56, 0], sizes = [8, 512], strides = [1, 1]} : vector<64x512xf32> to vector<8x512xf32>
    %cst_71 = arith.constant dense<0.000000e+00> : vector<8x512xf32>
    %286 = tpu.matmul %264, %6, %cst_71 {dimension_numbers = #tpu.dot_dimension_numbers<[1], [0], [0], [1], [0, 0, 1, 1], [], []>} : vector<8x128xf32>, vector<128x512xf32>, vector<8x512xf32> -> vector<8x512xf32>
    %287 = arith.addf %285, %286 : vector<8x512xf32>
    %288 = math.tanh %287 : vector<8x512xf32>
    %cst_72 = arith.constant 5.000000e-01 : f32
    %289 = vector.broadcast %cst_72 : f32 to vector<8x512xf32>
    %290 = arith.mulf %288, %289 : vector<8x512xf32>
    %cst_73 = arith.constant 5.000000e-01 : f32
    %291 = vector.broadcast %cst_73 : f32 to vector<8x512xf32>
    %292 = arith.addf %290, %291 : vector<8x512xf32>
    %293 = arith.select %17, %288, %292 : vector<8x512xi1>, vector<8x512xf32>
    %294 = vector.extract_strided_slice %293 {offsets = [0, 0], sizes = [8, 128], strides = [1, 1]} : vector<8x512xf32> to vector<8x128xf32>
    %295 = vector.extract_strided_slice %293 {offsets = [0, 128], sizes = [8, 128], strides = [1, 1]} : vector<8x512xf32> to vector<8x128xf32>
    %296 = vector.extract_strided_slice %293 {offsets = [0, 256], sizes = [8, 128], strides = [1, 1]} : vector<8x512xf32> to vector<8x128xf32>
    %297 = vector.extract_strided_slice %293 {offsets = [0, 384], sizes = [8, 128], strides = [1, 1]} : vector<8x512xf32> to vector<8x128xf32>
    %298 = arith.mulf %295, %262 : vector<8x128xf32>
    %299 = arith.mulf %294, %296 : vector<8x128xf32>
    %300 = arith.addf %298, %299 : vector<8x128xf32>
    %301 = math.tanh %300 : vector<8x128xf32>
    %302 = arith.mulf %297, %301 : vector<8x128xf32>
    %cst_74 = arith.constant dense<0.000000e+00> : vector<8x512xf32>
    %303 = tpu.matmul %302, %7, %cst_74 {dimension_numbers = #tpu.dot_dimension_numbers<[1], [0], [0], [1], [0, 0, 1, 1], [], []>} : vector<8x128xf32>, vector<128x512xf32>, vector<8x512xf32> -> vector<8x512xf32>
    %304 = arith.addf %303, %284 : vector<8x512xf32>
    %305 = math.tanh %304 : vector<8x512xf32>
    %cst_75 = arith.constant 5.000000e-01 : f32
    %306 = vector.broadcast %cst_75 : f32 to vector<8x512xf32>
    %307 = arith.mulf %305, %306 : vector<8x512xf32>
    %cst_76 = arith.constant 5.000000e-01 : f32
    %308 = vector.broadcast %cst_76 : f32 to vector<8x512xf32>
    %309 = arith.addf %307, %308 : vector<8x512xf32>
    %310 = arith.select %17, %305, %309 : vector<8x512xi1>, vector<8x512xf32>
    %311 = vector.extract_strided_slice %310 {offsets = [0, 0], sizes = [8, 128], strides = [1, 1]} : vector<8x512xf32> to vector<8x128xf32>
    %312 = vector.extract_strided_slice %310 {offsets = [0, 128], sizes = [8, 128], strides = [1, 1]} : vector<8x512xf32> to vector<8x128xf32>
    %313 = vector.extract_strided_slice %310 {offsets = [0, 256], sizes = [8, 128], strides = [1, 1]} : vector<8x512xf32> to vector<8x128xf32>
    %314 = vector.extract_strided_slice %310 {offsets = [0, 384], sizes = [8, 128], strides = [1, 1]} : vector<8x512xf32> to vector<8x128xf32>
    %315 = arith.mulf %312, %279 : vector<8x128xf32>
    %316 = arith.mulf %311, %313 : vector<8x128xf32>
    %317 = arith.addf %315, %316 : vector<8x128xf32>
    %318 = math.tanh %317 : vector<8x128xf32>
    %319 = arith.mulf %314, %318 : vector<8x128xf32>
    %c56 = arith.constant 56 : index
    %c0_77 = arith.constant 0 : index
    %320 = vector.load %arg12[%c56, %c0_77] : memref<64x128xf32, #tpu.memory_space<vmem>>, vector<8x128xf32>
    tpu.vector_store %arg12[%c56, %c0_77], %319 {strides = array<i32>} : memref<64x128xf32, #tpu.memory_space<vmem>>, vector<8x128xf32>,
    %c0_78 = arith.constant 0 : index
    %c0_79 = arith.constant 0 : index
    %321 = vector.load %arg12[%c0_78, %c0_79] : memref<64x128xf32, #tpu.memory_space<vmem>>, vector<64x128xf32>
    %c0_80 = arith.constant 0 : index
    %c0_81 = arith.constant 0 : index
    %322 = vector.load %arg7[%c0_80, %c0_81] : memref<128x32xf32, #tpu.memory_space<vmem>>, vector<128x32xf32>
    %cst_82 = arith.constant dense<0.000000e+00> : vector<64x32xf32>
    %323 = tpu.matmul %321, %322, %cst_82 {dimension_numbers = #tpu.dot_dimension_numbers<[1], [0], [0], [1], [0, 0, 1, 1], [], []>} : vector<64x128xf32>, vector<128x32xf32>, vector<64x32xf32> -> vector<64x32xf32>
    %c0_83 = arith.constant 0 : index
    %c0_84 = arith.constant 0 : index
    %324 = vector.load %arg8[%c0_83, %c0_84] : memref<1x32xf32, #tpu.memory_space<vmem>>, vector<1x32xf32>
    %325 = vector.broadcast %324 : vector<1x32xf32> to vector<64x32xf32>
    %326 = arith.addf %323, %325 : vector<64x32xf32>
    %cst_85 = arith.constant 0.000000e+00 : f32
    %327 = vector.broadcast %cst_85 : f32 to vector<64x32xf32>
    %328 = arith.maximumf %326, %327 : vector<64x32xf32>
    %c0_86 = arith.constant 0 : index
    %c0_87 = arith.constant 0 : index
    %329 = vector.load %arg9[%c0_86, %c0_87] : memref<32x2xf32, #tpu.memory_space<vmem>>, vector<32x2xf32>
    %cst_88 = arith.constant dense<0.000000e+00> : vector<64x2xf32>
    %330 = tpu.matmul %328, %329, %cst_88 {dimension_numbers = #tpu.dot_dimension_numbers<[1], [0], [0], [1], [0, 0, 1, 1], [], []>} : vector<64x32xf32>, vector<32x2xf32>, vector<64x2xf32> -> vector<64x2xf32>
    %c0_89 = arith.constant 0 : index
    %c0_90 = arith.constant 0 : index
    %331 = vector.load %arg10[%c0_89, %c0_90] : memref<1x2xf32, #tpu.memory_space<vmem>>, vector<1x2xf32>
    %332 = vector.broadcast %331 : vector<1x2xf32> to vector<64x2xf32>
    %333 = arith.addf %330, %332 : vector<64x2xf32>
    %c0_91 = arith.constant 0 : index
    %c0_92 = arith.constant 0 : index
    %334 = vector.load %arg11[%c0_91, %c0_92] : memref<64x2xf32, #tpu.memory_space<vmem>>, vector<64x2xf32>
    tpu.vector_store %arg11[%c0_91, %c0_92], %333 {strides = array<i32>} : memref<64x2xf32, #tpu.memory_space<vmem>>, vector<64x2xf32>,
    return
  }
}

</mosaic_0001>

<bundles_post_ra>
// kernel: key_model_forward.1
= control target key start
LH: loop header
LB: loop body
LE: loop exit
PB: predicated region body
PF: predicated region fallthrough
CT: control target
= control target key end

     0   :  { %v8516_v3 = vmov 0.0   ;;  %vm84_vm0 = vcmask 261120   ;;  %vm4492_vm1 = vcmask 15360   ;;  %s8504_s1 = inlined_call_operand.vmem [shape: f32[32,512], index: 1, kind: input, shape index: {}]   ;;  %s8505_s2 = inlined_call_operand.vmem [shape: f32[128,512], index: 2, kind: input, shape index: {}]   ;;  %s8506_s0 = inlined_call_operand.vmem [shape: f32[64,32], index: 0, kind: input, shape index: {}]   ;;  %s8507_s4 = inlined_call_operand.vmem [shape: f32[128,512], index: 4, kind: input, shape index: {}]   ;;  %s8508_s3 = inlined_call_operand.vmem [shape: f32[1,512], index: 3, kind: input, shape index: {}]   ;;  %s8509_s5 = inlined_call_operand.vmem [shape: f32[128,512], index: 5, kind: input, shape index: {}]   ;;  %s8510_s6 = inlined_call_operand.vmem [shape: f32[1,512], index: 6, kind: input, shape index: {}]   ;;  %s8511_s7 = inlined_call_operand.vmem [shape: f32[128,32], index: 7, kind: input, shape index: {}]   ;;  %s8512_s9 = inlined_call_operand.vmem [shape: f32[32,2], index: 9, kind: input, shape index: {}]   ;;  %s8513_s8 = inlined_call_operand.vmem [shape: f32[1,32], index: 8, kind: input, shape index: {}]   ;;  %s8514_s10 = inlined_call_operand.vmem [shape: f32[1,2], index: 10, kind: input, shape index: {}]   ;;  %s8515_s11 = inlined_call_operand.vmem [shape: f32[64,2], index: 11, kind: output, shape index: {}]  }
   0x1   :  { %v47_v0 = vld [vmem:[%s8504_s1 + $0x8] sm:$0xff]  ;;  %v49_v2 = vld [vmem:[%s8504_s1 + $0x18] sm:$0xff]  ;;  %173 = vmatprep.mubr.f32.mxu0 %v8516_v3  ;;  %286 = vmatprep.mubr.f32.mxu1 %v8516_v3  ;;  %v46_v6 = vld [vmem:[%s8504_s1] sm:$0xff] }
   0x2   :  { %v51_v1 = vld [vmem:[%s8504_s1 + $0x28] sm:$0xff]  ;;  %v53_v5 = vld [vmem:[%s8504_s1 + $0x38] sm:$0xff]  ;;  %v50_v7 = vld [vmem:[%s8504_s1 + $0x20] sm:$0xff] }
   0x3   :  { %v4631_v4 = vpack.c.bf16 %v51_v1, %v47_v0  ;;  %v4639_v8 = vpack.c.bf16 %v53_v5, %v49_v2  ;;  %v4633_v9 = vpack.c.bf16 %v50_v7, %v46_v6  ;;  %v48_v10 = vld [vmem:[%s8504_s1 + $0x10] sm:$0xff]  ;;  %v55_v12 = vld [vmem:[%s8504_s1 + $0x48] sm:$0xff]  ;;  %v57_v15 = vld [vmem:[%s8504_s1 + $0x58] sm:$0xff] }
   0x4   :  { %v52_v11 = vld [vmem:[%s8504_s1 + $0x30] sm:$0xff]  ;;  %v59_v14 = vld [vmem:[%s8504_s1 + $0x68] sm:$0xff]  ;;  %v61_v16 = vld [vmem:[%s8504_s1 + $0x78] sm:$0xff] }
   0x5   :  { %4632 = vmatprep.subr.bf16.mxu0 %v4631_v4  ;;  %v4641_v13 = vpack.c.bf16 %v52_v11, %v48_v10  ;;  %4640 = vmatprep.subr.bf16.mxu1 %v4639_v8  ;;  %v4635_v17 = vpack.c.bf16 %v59_v14, %v55_v12  ;;  %v4643_v18 = vpack.c.bf16 %v61_v16, %v57_v15  ;;  %v54_v19 = vld [vmem:[%s8504_s1 + $0x40] sm:$0xff]  ;;  %v56_v21 = vld [vmem:[%s8504_s1 + $0x50] sm:$0xff]  ;;  %v336_v24 = vld [vmem:[%s8505_s2 + $0x8] sm:$0xff] }
   0x6   :  { %4634 = vmatpush1.bf16.msra.mxu0 %v4633_v9  ;;  %v58_v20 = vld [vmem:[%s8504_s1 + $0x60] sm:$0xff]  ;;  %v60_v23 = vld [vmem:[%s8504_s1 + $0x70] sm:$0xff]  ;;  %v340_v26 = vld [vmem:[%s8505_s2 + $0x28] sm:$0xff] }
   0x7   :  { %4642 = vmatpush1.bf16.msra.mxu1 %v4641_v13  ;;  %v4637_v22 = vpack.c.bf16 %v58_v20, %v54_v19  ;;  %4636 = vmatprep.subr.bf16.mxu0 %v4635_v17  ;;  %v4645_v25 = vpack.c.bf16 %v60_v23, %v56_v21  ;;  %v338_v27 = vld [vmem:[%s8505_s2 + $0x18] sm:$0xff]  ;;  %v6563_v29 = vpack.c.bf16 %v340_v26, %v336_v24  ;;  %v335_v31 = vld [vmem:[%s8505_s2] sm:$0xff]  ;;  %v337_v33 = vld [vmem:[%s8505_s2 + $0x10] sm:$0xff] }
   0x8   :  { %4644 = vmatprep.subr.bf16.mxu1 %v4643_v18  ;;  %v342_v28 = vld [vmem:[%s8505_s2 + $0x38] sm:$0xff]  ;;  %v339_v32 = vld [vmem:[%s8505_s2 + $0x20] sm:$0xff]  ;;  %v341_v36 = vld [vmem:[%s8505_s2 + $0x30] sm:$0xff] }
   0x9   :  { %8663 = vst [vmem:[#allocation3_spill] sm:$0xff] %v6563_v29  ;;  %v6565_v30 = vpack.c.bf16 %v342_v28, %v338_v27  ;;  %v38_v34 = vld [vmem:[%s8506_s0] sm:$0xff]  ;;  %v6579_v35 = vpack.c.bf16 %v339_v32, %v335_v31  ;;  %v344_v37 = vld [vmem:[%s8505_s2 + $0x48] sm:$0xff]  ;;  %v6588_v38 = vpack.c.bf16 %v341_v36, %v337_v33  ;;  %v346_v40 = vld [vmem:[%s8505_s2 + $0x58] sm:$0xff] }
   0xa   :  { %4638 = vmatpush1.bf16.msra.mxu0 %v4637_v22  ;;  %v348_v39 = vld [vmem:[%s8505_s2 + $0x68] sm:$0xff]  ;;  %v350_v41 = vld [vmem:[%s8505_s2 + $0x78] sm:$0xff]  ;;  %v343_v43 = vld [vmem:[%s8505_s2 + $0x40] sm:$0xff] }
   0xb   :  { %8664 = vst [vmem:[#allocation4_spill] sm:$0xff] %v6565_v30  ;;  %4646 = vmatpush1.bf16.msra.mxu1 %v4645_v25  ;;  %4648 = vmatprep.subr.bf16.mxu0 %v6563_v29  ;;  %v6600_v42 = vpack.c.bf16 %v348_v39, %v344_v37  ;;  %v347_v44 = vld [vmem:[%s8505_s2 + $0x60] sm:$0xff]  ;;  %v345_v45 = vld [vmem:[%s8505_s2 + $0x50] sm:$0xff]  ;;  %v39_v46 = vld [vmem:[%s8506_s0 + $0x8] sm:$0xff]  ;;  %v6615_v47 = vpack.c.bf16 %v350_v41, %v346_v40 }
   0xc   :  { %4680 = vmatprep.subr.bf16.mxu1 %v6565_v30  ;;  %v349_v48 = vld [vmem:[%s8505_s2 + $0x70] sm:$0xff]  ;;  %v352_v49 = vld [vmem:[%s8505_s2 + $0x88] sm:$0xff]  ;;  %v6625_v50 = vpack.c.bf16 %v347_v44, %v343_v43  ;;  %v354_v52 = vld [vmem:[%s8505_s2 + $0x98] sm:$0xff] }
   0xd   :  { %4505 = vmatmul.mubr.msk.f32.vlgmr.msra.gmra.mrb[0].mxu0 %vm84_vm0, %v38_v34  ;;  %v356_v51 = vld [vmem:[%s8505_s2 + $0xa8] sm:$0xff]  ;;  %v358_v53 = vld [vmem:[%s8505_s2 + $0xb8] sm:$0xff]  ;;  %v6638_v54 = vpack.c.bf16 %v349_v48, %v345_v45  ;;  %v351_v55 = vld [vmem:[%s8505_s2 + $0x80] sm:$0xff] }
   0xe   :  { %4513 = vmatmul.mubr.msk.f32.vlgmr.msra.gmra.mrb[0].mxu1 %vm84_vm0, %v38_v34  ;;  %4650 = vmatpush1.bf16.msra.mxu0 %v6579_v35  ;;  %v355_v56 = vld [vmem:[%s8505_s2 + $0xa0] sm:$0xff]  ;;  %v6648_v57 = vpack.c.bf16 %v356_v51, %v352_v49  ;;  %v353_v58 = vld [vmem:[%s8505_s2 + $0x90] sm:$0xff]  ;;  %v6658_v60 = vpack.c.bf16 %v358_v53, %v354_v52  ;;  %v360_v61 = vld [vmem:[%s8505_s2 + $0xc8] sm:$0xff] }
   0xf   :  { %4682 = vmatpush1.bf16.msra.mxu1 %v6588_v38  ;;  %179 = vmatprep.mubr.f32.mxu0 %v8516_v3  ;;  %v357_v59 = vld [vmem:[%s8505_s2 + $0xb0] sm:$0xff]  ;;  %v364_v62 = vld [vmem:[%s8505_s2 + $0xe8] sm:$0xff]  ;;  %v6671_v0 = vpack.c.bf16 %v355_v56, %v351_v55  ;;  %v362_v1 = vld [vmem:[%s8505_s2 + $0xd8] sm:$0xff] }
  0x10   :  { %292 = vmatprep.mubr.f32.mxu1 %v8516_v3  ;;  %4652 = vmatprep.subr.bf16.mxu0 %v6600_v42  ;;  %v40_v63 = vld [vmem:[%s8506_s0 + $0x10] sm:$0xff]  ;;  %v366_v2 = vld [vmem:[%s8505_s2 + $0xf8] sm:$0xff]  ;;  %v6681_v4 = vpack.c.bf16 %v357_v59, %v353_v58  ;;  %v359_v5 = vld [vmem:[%s8505_s2 + $0xc0] sm:$0xff]  ;;  %v6691_v7 = vpack.c.bf16 %v364_v62, %v360_v61 }
  0x11   :  { %4506 = vmatmul.mubr.msk.f32.gmra.mrb[2].mxu0 %vm84_vm0, %v39_v46  ;;  %4684 = vmatprep.subr.bf16.mxu1 %v6615_v47  ;;  %v363_v6 = vld [vmem:[%s8505_s2 + $0xe0] sm:$0xff]  ;;  %v361_v8 = vld [vmem:[%s8505_s2 + $0xd0] sm:$0xff]  ;;  %v6701_v10 = vpack.c.bf16 %v366_v2, %v362_v1  ;;  %v368_v11 = vld [vmem:[%s8505_s2 + $0x108] sm:$0xff] }
  0x12   :  { %4514 = vmatmul.mubr.msk.f32.gmra.mrb[2].mxu1 %vm84_vm0, %v39_v46  ;;  %4654 = vmatpush1.bf16.msra.mxu0 %v6625_v50  ;;  %v365_v9 = vld [vmem:[%s8505_s2 + $0xf0] sm:$0xff]  ;;  %v372_v12 = vld [vmem:[%s8505_s2 + $0x128] sm:$0xff]  ;;  %v41_v13 = vld [vmem:[%s8506_s0 + $0x18] sm:$0xff]  ;;  %v6714_v14 = vpack.c.bf16 %v363_v6, %v359_v5 }
  0x13   :  { %4686 = vmatpush1.bf16.msra.mxu1 %v6638_v54  ;;  %185 = vmatprep.mubr.f32.mxu0 %v8516_v3  ;;  %v370_v15 = vld [vmem:[%s8505_s2 + $0x118] sm:$0xff]  ;;  %v6724_v17 = vpack.c.bf16 %v365_v9, %v361_v8  ;;  %v367_v18 = vld [vmem:[%s8505_s2 + $0x100] sm:$0xff]  ;;  %v6734_v20 = vpack.c.bf16 %v372_v12, %v368_v11  ;;  %v369_v21 = vld [vmem:[%s8505_s2 + $0x110] sm:$0xff] }
  0x14   :  { %298 = vmatprep.mubr.f32.mxu1 %v8516_v3  ;;  %4656 = vmatprep.subr.bf16.mxu0 %v6648_v57  ;;  %v374_v16 = vld [vmem:[%s8505_s2 + $0x138] sm:$0xff]  ;;  %v371_v19 = vld [vmem:[%s8505_s2 + $0x120] sm:$0xff]  ;;  %v373_v22 = vld [vmem:[%s8505_s2 + $0x130] sm:$0xff] }
  0x15   :  { %4507 = vmatmul.mubr.msk.f32.gmra.mrb[4].mxu0 %vm84_vm0, %v40_v63  ;;  %4688 = vmatprep.subr.bf16.mxu1 %v6658_v60  ;;  %v6744_v23 = vpack.c.bf16 %v374_v16, %v370_v15  ;;  %v376_v24 = vld [vmem:[%s8505_s2 + $0x148] sm:$0xff]  ;;  %v42_v26 = vld [vmem:[%s8506_s0 + $0x20] sm:$0xff]  ;;  %v6757_v27 = vpack.c.bf16 %v371_v19, %v367_v18  ;;  %v378_v28 = vld [vmem:[%s8505_s2 + $0x158] sm:$0xff]  ;;  %v6767_v32 = vpack.c.bf16 %v373_v22, %v369_v21 }
  0x16   :  { %4515 = vmatmul.mubr.msk.f32.gmra.mrb[4].mxu1 %vm84_vm0, %v40_v63  ;;  %4658 = vmatpush1.bf16.msra.mxu0 %v6671_v0  ;;  %v380_v25 = vld [vmem:[%s8505_s2 + $0x168] sm:$0xff]  ;;  %v382_v31 = vld [vmem:[%s8505_s2 + $0x178] sm:$0xff]  ;;  %v375_v33 = vld [vmem:[%s8505_s2 + $0x140] sm:$0xff] }
  0x17   :  { %4690 = vmatpush1.bf16.msra.mxu1 %v6681_v4  ;;  %191 = vmatprep.mubr.f32.mxu0 %v8516_v3  ;;  %v379_v34 = vld [vmem:[%s8505_s2 + $0x160] sm:$0xff]  ;;  %v6777_v36 = vpack.c.bf16 %v380_v25, %v376_v24  ;;  %v377_v37 = vld [vmem:[%s8505_s2 + $0x150] sm:$0xff]  ;;  %v6787_v40 = vpack.c.bf16 %v382_v31, %v378_v28  ;;  %v384_v41 = vld [vmem:[%s8505_s2 + $0x188] sm:$0xff] }
  0x18   :  { %304 = vmatprep.mubr.f32.mxu1 %v8516_v3  ;;  %4660 = vmatprep.subr.bf16.mxu0 %v6691_v7  ;;  %v381_v39 = vld [vmem:[%s8505_s2 + $0x170] sm:$0xff]  ;;  %v388_v43 = vld [vmem:[%s8505_s2 + $0x1a8] sm:$0xff]  ;;  %v6800_v45 = vpack.c.bf16 %v379_v34, %v375_v33  ;;  %v386_v46 = vld [vmem:[%s8505_s2 + $0x198] sm:$0xff] }
  0x19   :  { %4508 = vmatmul.mubr.msk.f32.gmra.mrb[6].mxu0 %vm84_vm0, %v41_v13  ;;  %4692 = vmatprep.subr.bf16.mxu1 %v6701_v10  ;;  %v43_v44 = vld [vmem:[%s8506_s0 + $0x28] sm:$0xff]  ;;  %v390_v48 = vld [vmem:[%s8505_s2 + $0x1b8] sm:$0xff]  ;;  %v6810_v49 = vpack.c.bf16 %v381_v39, %v377_v37  ;;  %v383_v51 = vld [vmem:[%s8505_s2 + $0x180] sm:$0xff]  ;;  %v6820_v53 = vpack.c.bf16 %v388_v43, %v384_v41 }
  0x1a   :  { %4516 = vmatmul.mubr.msk.f32.gmra.mrb[6].mxu1 %vm84_vm0, %v41_v13  ;;  %4662 = vmatpush1.bf16.msra.mxu0 %v6714_v14  ;;  %v387_v52 = vld [vmem:[%s8505_s2 + $0x1a0] sm:$0xff]  ;;  %v385_v55 = vld [vmem:[%s8505_s2 + $0x190] sm:$0xff]  ;;  %v6830_v58 = vpack.c.bf16 %v390_v48, %v386_v46  ;;  %v392_v59 = vld [vmem:[%s8505_s2 + $0x1c8] sm:$0xff] }
  0x1b   :  { %4694 = vmatpush1.bf16.msra.mxu1 %v6724_v17  ;;  %197 = vmatprep.mubr.f32.mxu0 %v8516_v3  ;;  %v389_v56 = vld [vmem:[%s8505_s2 + $0x1b0] sm:$0xff]  ;;  %v396_v61 = vld [vmem:[%s8505_s2 + $0x1e8] sm:$0xff]  ;;  %v6843_v63 = vpack.c.bf16 %v387_v52, %v383_v51  ;;  %v394_v1 = vld [vmem:[%s8505_s2 + $0x1d8] sm:$0xff] }
  0x1c   :  { %310 = vmatprep.mubr.f32.mxu1 %v8516_v3  ;;  %4664 = vmatprep.subr.bf16.mxu0 %v6734_v20  ;;  %v44_v62 = vld [vmem:[%s8506_s0 + $0x30] sm:$0xff]  ;;  %v398_v2 = vld [vmem:[%s8505_s2 + $0x1f8] sm:$0xff]  ;;  %v6853_v5 = vpack.c.bf16 %v389_v56, %v385_v55  ;;  %v391_v6 = vld [vmem:[%s8505_s2 + $0x1c0] sm:$0xff]  ;;  %v6863_v9 = vpack.c.bf16 %v396_v61, %v392_v59 }
  0x1d   :  { %4509 = vmatmul.mubr.msk.f32.gmra.mrb[8].mxu0 %vm84_vm0, %v42_v26  ;;  %4696 = vmatprep.subr.bf16.mxu1 %v6744_v23  ;;  %v395_v8 = vld [vmem:[%s8505_s2 + $0x1e0] sm:$0xff]  ;;  %v393_v11 = vld [vmem:[%s8505_s2 + $0x1d0] sm:$0xff]  ;;  %v6873_v13 = vpack.c.bf16 %v398_v2, %v394_v1  ;;  %v45_v15 = vld [vmem:[%s8506_s0 + $0x38] sm:$0xff] }
  0x1e   :  { %4517 = vmatmul.mubr.msk.f32.gmra.mrb[8].mxu1 %vm84_vm0, %v42_v26  ;;  %4666 = vmatpush1.bf16.msra.mxu0 %v6757_v27  ;;  %v397_v12 = vld [vmem:[%s8505_s2 + $0x1f0] sm:$0xff]  ;;  %v6880_v16 = vpack.c.bf16 %v395_v8, %v391_v6  ;;  %v400_v19 = vld [vmem:[%s8507_s4 + $0x8] sm:$0xff]  ;;  %v402_v22 = vld [vmem:[%s8507_s4 + $0x18] sm:$0xff] }
  0x1f   :  { %4698 = vmatpush1.bf16.msra.mxu1 %v6767_v32  ;;  %203 = vmatprep.mubr.f32.mxu0 %v8516_v3  ;;  %v6884_v18 = vpack.c.bf16 %v397_v12, %v393_v11  ;;  %v404_v21 = vld [vmem:[%s8507_s4 + $0x28] sm:$0xff]  ;;  %v406_v25 = vld [vmem:[%s8507_s4 + $0x38] sm:$0xff]  ;;  %v399_v26 = vld [vmem:[%s8507_s4] sm:$0xff] }
  0x20   :  { %316 = vmatprep.mubr.f32.mxu1 %v8516_v3  ;;  %4668 = vmatprep.subr.bf16.mxu0 %v6777_v36  ;;  %v6908_v24 = vpack.c.bf16 %v404_v21, %v400_v19  ;;  %v403_v28 = vld [vmem:[%s8507_s4 + $0x20] sm:$0xff]  ;;  %v6919_v31 = vpack.c.bf16 %v406_v25, %v402_v22  ;;  %v401_v34 = vld [vmem:[%s8507_s4 + $0x10] sm:$0xff]  ;;  %v408_v41 = vld [vmem:[%s8507_s4 + $0x48] sm:$0xff] }
  0x21   :  { %4510 = vmatmul.mubr.msk.f32.gmra.mrb[10].mxu0 %vm84_vm0, %v43_v44  ;;  %4700 = vmatprep.subr.bf16.mxu1 %v6787_v40  ;;  %v6921_v33 = vpack.c.bf16 %v403_v28, %v399_v26  ;;  %v405_v37 = vld [vmem:[%s8507_s4 + $0x30] sm:$0xff]  ;;  %v412_v43 = vld [vmem:[%s8507_s4 + $0x68] sm:$0xff]  ;;  %v414_v48 = vld [vmem:[%s8507_s4 + $0x78] sm:$0xff] }
  0x22   :  { %4518 = vmatmul.mubr.msk.f32.gmra.mrb[10].mxu1 %vm84_vm0, %v43_v44  ;;  %4670 = vmatpush1.bf16.msra.mxu0 %v6800_v45  ;;  %v6930_v39 = vpack.c.bf16 %v405_v37, %v401_v34  ;;  %v410_v44 = vld [vmem:[%s8507_s4 + $0x58] sm:$0xff]  ;;  %v6944_v46 = vpack.c.bf16 %v412_v43, %v408_v41  ;;  %v407_v51 = vld [vmem:[%s8507_s4 + $0x40] sm:$0xff]  ;;  %v409_v59 = vld [vmem:[%s8507_s4 + $0x50] sm:$0xff] }
  0x23   :  { %4702 = vmatpush1.bf16.msra.mxu1 %v6810_v49  ;;  %209 = vmatprep.mubr.f32.mxu0 %v8516_v3  ;;  %v411_v52 = vld [vmem:[%s8507_s4 + $0x60] sm:$0xff]  ;;  %v6955_v55 = vpack.c.bf16 %v414_v48, %v410_v44  ;;  %v413_v61 = vld [vmem:[%s8507_s4 + $0x70] sm:$0xff]  ;;  %v416_v1 = vld [vmem:[%s8507_s4 + $0x88] sm:$0xff] }
  0x24   :  { %322 = vmatprep.mubr.f32.mxu1 %v8516_v3  ;;  %4672 = vmatprep.subr.bf16.mxu0 %v6820_v53  ;;  %v6957_v56 = vpack.c.bf16 %v411_v52, %v407_v51  ;;  %v420_v2 = vld [vmem:[%s8507_s4 + $0xa8] sm:$0xff]  ;;  %v418_v6 = vld [vmem:[%s8507_s4 + $0x98] sm:$0xff]  ;;  %v415_v12 = vld [vmem:[%s8507_s4 + $0x80] sm:$0xff] }
  0x25   :  { %4511 = vmatmul.mubr.msk.f32.gmra.mrb[12].mxu0 %vm84_vm0, %v44_v62  ;;  %4704 = vmatprep.subr.bf16.mxu1 %v6830_v58  ;;  %v6980_v8 = vpack.c.bf16 %v420_v2, %v416_v1  ;;  %v422_v11 = vld [vmem:[%s8507_s4 + $0xb8] sm:$0xff]  ;;  %v417_v22 = vld [vmem:[%s8507_s4 + $0x90] sm:$0xff]  ;;  %v424_v28 = vld [vmem:[%s8507_s4 + $0xc8] sm:$0xff] }
  0x26   :  { %4519 = vmatmul.mubr.msk.f32.gmra.mrb[12].mxu1 %vm84_vm0, %v44_v62  ;;  %4674 = vmatpush1.bf16.msra.mxu0 %v6843_v63  ;;  %v6966_v62 = vpack.c.bf16 %v413_v61, %v409_v59  ;;  %v6991_v19 = vpack.c.bf16 %v422_v11, %v418_v6  ;;  %v421_v25 = vld [vmem:[%s8507_s4 + $0xb0] sm:$0xff]  ;;  %v428_v34 = vld [vmem:[%s8507_s4 + $0xe8] sm:$0xff]  ;;  %v426_v37 = vld [vmem:[%s8507_s4 + $0xd8] sm:$0xff] }
  0x27   :  { %4706 = vmatpush1.bf16.msra.mxu1 %v6853_v5  ;;  %215 = vmatprep.mubr.f32.mxu0 %v8516_v3  ;;  %8665 = vst [vmem:[#allocation5_spill] sm:$0xff] %v6980_v8  ;;  %v7002_v26 = vpack.c.bf16 %v421_v25, %v417_v22  ;;  %v7016_v41 = vpack.c.bf16 %v428_v34, %v424_v28  ;;  %v430_v43 = vld [vmem:[%s8507_s4 + $0xf8] sm:$0xff]  ;;  %v423_v44 = vld [vmem:[%s8507_s4 + $0xc0] sm:$0xff]  ;;  %v425_v59 = vld [vmem:[%s8507_s4 + $0xd0] sm:$0xff] }
  0x28   :  { %328 = vmatprep.mubr.f32.mxu1 %v8516_v3  ;;  %4676 = vmatprep.subr.bf16.mxu0 %v6863_v9  ;;  %8666 = vst [vmem:[#allocation6_spill] sm:$0xff] %v6991_v19  ;;  %v427_v48 = vld [vmem:[%s8507_s4 + $0xe0] sm:$0xff]  ;;  %v7027_v51 = vpack.c.bf16 %v430_v43, %v426_v37  ;;  %v429_v61 = vld [vmem:[%s8507_s4 + $0xf0] sm:$0xff]  ;;  %v432_v2 = vld [vmem:[%s8507_s4 + $0x108] sm:$0xff] }
  0x29   :  { %4512 = vmatmul.mubr.msk.f32.gmra.mrb[14].mxu0 %vm84_vm0, %v45_v15  ;;  %4708 = vmatprep.subr.bf16.mxu1 %v6873_v13  ;;  %8668 = vst [vmem:[#allocation8_spill] sm:$0xff] %v7002_v26  ;;  %8669 = vst [vmem:[#allocation9_spill] sm:$0xff] %v7016_v41  ;;  %v7029_v52 = vpack.c.bf16 %v427_v48, %v423_v44  ;;  %v7038_v1 = vpack.c.bf16 %v429_v61, %v425_v59  ;;  %v436_v6 = vld [vmem:[%s8507_s4 + $0x128] sm:$0xff]  ;;  %v434_v11 = vld [vmem:[%s8507_s4 + $0x118] sm:$0xff] }
  0x2a   :  { %4520 = vmatmul.mubr.msk.f32.gmra.mrb[14].mxu1 %vm84_vm0, %v45_v15  ;;  %4678 = vmatpush1.bf16.msra.mxu0 %v6880_v16  ;;  %v419_v15 = vld [vmem:[%s8507_s4 + $0xa0] sm:$0xff]  ;;  %8670 = vst [vmem:[#allocation10_spill] sm:$0xff] %v7027_v51  ;;  %v433_v37 = vld [vmem:[%s8507_s4 + $0x110] sm:$0xff]  ;;  %v440_v48 = vld [vmem:[%s8507_s4 + $0x148] sm:$0xff] }
  0x2b   :  { %4710 = vmatpush1.bf16.msra.mxu1 %v6884_v18  ;;  %630 = vmatprep.mubr.f32.mxu0 %v8516_v3  ;;  %v6993_v21 = vpack.c.bf16 %v419_v15, %v415_v12  ;;  %8671 = vst [vmem:[#allocation11_spill] sm:$0xff] %v7029_v52  ;;  %8672 = vst [vmem:[#allocation12_spill] sm:$0xff] %v7038_v1  ;;  %v7052_v12 = vpack.c.bf16 %v436_v6, %v432_v2  ;;  %v438_v15 = vld [vmem:[%s8507_s4 + $0x138] sm:$0xff]  ;;  %v431_v22 = vld [vmem:[%s8507_s4 + $0x100] sm:$0xff] }
  0x2c   :  { %701 = vmatprep.mubr.f32.mxu1 %v8516_v3  ;;  %4712 = vmatprep.subr.bf16.mxu0 %v6908_v24  ;;  %v435_v25 = vld [vmem:[%s8507_s4 + $0x120] sm:$0xff]  ;;  %v7063_v28 = vpack.c.bf16 %v438_v15, %v434_v11  ;;  %v437_v43 = vld [vmem:[%s8507_s4 + $0x130] sm:$0xff]  ;;  %v444_v59 = vld [vmem:[%s8507_s4 + $0x168] sm:$0xff] }
  0x2d   :  { %631 = vmatmul.mubr.f32.vlgmr.msra.gmra.mrb[0].mxu0 %v8516_v3  ;;  %4744 = vmatprep.subr.bf16.mxu1 %v6919_v31  ;;  %8667 = vst [vmem:[#allocation7_spill] sm:$0xff] %v6993_v21  ;;  %8673 = vst [vmem:[#allocation13_spill] sm:$0xff] %v7052_v12  ;;  %v7065_v34 = vpack.c.bf16 %v435_v25, %v431_v22  ;;  %v7074_v44 = vpack.c.bf16 %v437_v43, %v433_v37  ;;  %v442_v61 = vld [vmem:[%s8507_s4 + $0x158] sm:$0xff]  ;;  %v439_v11 = vld [vmem:[%s8507_s4 + $0x140] sm:$0xff] }
  0x2e   :  { %702 = vmatmul.mubr.f32.vlgmr.msra.gmra.mrb[0].mxu1 %v8516_v3  ;;  %797 = vmatprep.mubr.f32.mxu0 %v8516_v3  ;;  %8674 = vst [vmem:[#allocation14_spill] sm:$0xff] %v7063_v28  ;;  %v7088_v2 = vpack.c.bf16 %v444_v59, %v440_v48  ;;  %v446_v6 = vld [vmem:[%s8507_s4 + $0x178] sm:$0xff]  ;;  %v443_v15 = vld [vmem:[%s8507_s4 + $0x160] sm:$0xff]  ;;  %v441_v37 = vld [vmem:[%s8507_s4 + $0x150] sm:$0xff] }
  0x2f   :  { %868 = vmatprep.mubr.f32.mxu1 %v8516_v3  ;;  %4714 = vmatpush1.bf16.msra.mxu0 %v6921_v33  ;;  %8675 = vst [vmem:[#allocation15_spill] sm:$0xff] %v7065_v34  ;;  %8676 = vst [vmem:[#allocation16_spill] sm:$0xff] %v7074_v44  ;;  %v7099_v22 = vpack.c.bf16 %v446_v6, %v442_v61  ;;  %v7101_v25 = vpack.c.bf16 %v443_v15, %v439_v11  ;;  %v445_v43 = vld [vmem:[%s8507_s4 + $0x170] sm:$0xff]  ;;  %v448_v59 = vld [vmem:[%s8507_s4 + $0x188] sm:$0xff] }
  0x30   :  { %4746 = vmatpush1.bf16.msra.mxu1 %v6930_v39  ;;  %4716 = vmatprep.subr.bf16.mxu0 %v6944_v46  ;;  %8677 = vst [vmem:[#allocation17_spill] sm:$0xff] %v7088_v2  ;;  %v7110_v48 = vpack.c.bf16 %v445_v43, %v441_v37  ;;  %v452_v61 = vld [vmem:[%s8507_s4 + $0x1a8] sm:$0xff]  ;;  %v450_v6 = vld [vmem:[%s8507_s4 + $0x198] sm:$0xff]  ;;  %v447_v37 = vld [vmem:[%s8507_s4 + $0x180] sm:$0xff] }
  0x31   :  { %4748 = vmatprep.subr.bf16.mxu1 %v6955_v55  ;;  %8678 = vst [vmem:[#allocation18_spill] sm:$0xff] %v7099_v22  ;;  %8679 = vst [vmem:[#allocation19_spill] sm:$0xff] %v7101_v25  ;;  %v7124_v11 = vpack.c.bf16 %v452_v61, %v448_v59  ;;  %v454_v15 = vld [vmem:[%s8507_s4 + $0x1b8] sm:$0xff]  ;;  %v451_v43 = vld [vmem:[%s8507_s4 + $0x1a0] sm:$0xff] }
  0x32   :  { %8680 = vst [vmem:[#allocation20_spill] sm:$0xff] %v7110_v48  ;;  %v7135_v3 = vpack.c.bf16 %v454_v15, %v450_v6  ;;  %v449_v59 = vld [vmem:[%s8507_s4 + $0x190] sm:$0xff]  ;;  %v456_v6 = vld [vmem:[%s8507_s4 + $0x1c8] sm:$0xff] }
  0x33   :  { %4718 = vmatpush1.bf16.msra.mxu0 %v6957_v56  ;;  %8681 = vst [vmem:[#allocation21_spill] sm:$0xff] %v7124_v11  ;;  %v453_v61 = vld [vmem:[%s8507_s4 + $0x1b0] sm:$0xff]  ;;  %v460_v15 = vld [vmem:[%s8507_s4 + $0x1e8] sm:$0xff] }
  0x34   :  { %4750 = vmatpush1.bf16.msra.mxu1 %v6966_v62  ;;  %4720 = vmatprep.subr.bf16.mxu0 %v6980_v8  ;;  %8682 = vst [vmem:[#allocation22_spill] sm:$0xff] %v7135_v3 }
  0x35   :  { %4752 = vmatprep.subr.bf16.mxu1 %v6991_v19 }
  0x37   :  { %4722 = vmatpush1.bf16.msra.mxu0 %v6993_v21 }
  0x38   :  { %4754 = vmatpush1.bf16.msra.mxu1 %v7002_v26  ;;  %4724 = vmatprep.subr.bf16.mxu0 %v7016_v41 }
  0x39   :  { %4756 = vmatprep.subr.bf16.mxu1 %v7027_v51 }
  0x3b   :  { %4726 = vmatpush1.bf16.msra.mxu0 %v7029_v52 }
  0x3c   :  { %4758 = vmatpush1.bf16.msra.mxu1 %v7038_v1  ;;  %4728 = vmatprep.subr.bf16.mxu0 %v7052_v12 }
  0x3d   :  { %4760 = vmatprep.subr.bf16.mxu1 %v7063_v28 }
  0x3f   :  { %4730 = vmatpush1.bf16.msra.mxu0 %v7065_v34 }
  0x40   :  { %4762 = vmatpush1.bf16.msra.mxu1 %v7074_v44  ;;  %4732 = vmatprep.subr.bf16.mxu0 %v7088_v2 }
  0x41   :  { %4764 = vmatprep.subr.bf16.mxu1 %v7099_v22 }
  0x43   :  { %4734 = vmatpush1.bf16.msra.mxu0 %v7101_v25  ;;  %v7137_v25 = vpack.c.bf16 %v451_v43, %v447_v37  ;;  %v458_v37 = vld [vmem:[%s8507_s4 + $0x1d8] sm:$0xff]  ;;  %v7160_v43 = vpack.c.bf16 %v460_v15, %v456_v6  ;;  %v457_v6 = vld [vmem:[%s8507_s4 + $0x1d0] sm:$0xff] }
  0x44   :  { %4766 = vmatpush1.bf16.msra.mxu1 %v7110_v48  ;;  %4736 = vmatprep.subr.bf16.mxu0 %v7124_v11  ;;  %v7146_v48 = vpack.c.bf16 %v453_v61, %v449_v59  ;;  %v462_v59 = vld [vmem:[%s8507_s4 + $0x1f8] sm:$0xff]  ;;  %v455_v61 = vld [vmem:[%s8507_s4 + $0x1c0] sm:$0xff]  ;;  %v461_v15 = vld [vmem:[%s8507_s4 + $0x1f0] sm:$0xff] }
  0x45   :  { %8683 = vst [vmem:[#allocation23_spill] sm:$0xff] %v7137_v25  ;;  %4768 = vmatprep.subr.bf16.mxu1 %v7135_v3  ;;  %8685 = vst [vmem:[#allocation25_spill] sm:$0xff] %v7160_v43  ;;  %v7171_v3 = vpack.c.bf16 %v462_v59, %v458_v37 }
  0x46   :  { %8684 = vst [vmem:[#allocation24_spill] sm:$0xff] %v7146_v48 }
  0x47   :  { %4738 = vmatpush1.bf16.msra.mxu0 %v7137_v25  ;;  %v459_v25 = vld [vmem:[%s8507_s4 + $0x1e0] sm:$0xff]  ;;  %8686 = vst [vmem:[#allocation26_spill] sm:$0xff] %v7171_v3 }
  0x48   :  { %4770 = vmatpush1.bf16.msra.mxu1 %v7146_v48  ;;  %v7173_v11 = vpack.c.bf16 %v459_v25, %v455_v61  ;;  %4740 = vmatprep.subr.bf16.mxu0 %v7160_v43  ;;  %v7182_v48 = vpack.c.bf16 %v461_v15, %v457_v6  ;;  %v64_v25 = vlaneseq  ;;  %v62_v61 = vld [vmem:[%s8508_s3] sm:$0xf] }
  0x49   :  { %4772 = vmatprep.subr.bf16.mxu1 %v7171_v3 }
  0x4a   :  { %8687 = vst [vmem:[#allocation27_spill] sm:$0xff] %v7173_v11  ;;  %8688 = vst [vmem:[#allocation28_spill] sm:$0xff] %v7182_v48  ;;  %v7187_v37 = vshrl.u32 %v64_v25, 7 }
  0x4b   :  { %4742 = vmatpush1.bf16.msra.mxu0 %v7173_v11 }
  0x4c   :  { %4774 = vmatpush1.bf16.msra.mxu1 %v7182_v48  ;;  %v8546_v59 = vsub.s32 0, %v7187_v37  ;;  %v8549_v22 = vsub.s32 1, %v7187_v37  ;;  %v8550_v6 = vsub.s32 2, %v7187_v37  ;;  %v8563_v28 = vsub.s32 3, %v7187_v37 }
  0x4e   :  { %v7197_v15 = vrot.slane %v62_v61, %v8546_v59  ;;  %v7201_v48 = vrot.slane %v62_v61, %v8549_v22  ;;  %v7205_v25 = vrot.slane %v62_v61, %v8550_v6  ;;  %v7213_v22 = vrot.slane %v62_v61, %v8563_v28 }
  0x50   :  { %8689 = vst [vmem:[#allocation29_spill] sm:$0xff] %v7197_v15  ;;  %8690 = vst [vmem:[#allocation30_spill] sm:$0xff] %v7201_v48 }
  0x51   :  { %8691 = vst [vmem:[#allocation31_spill] sm:$0xff] %v7205_v25  ;;  %8692 = vst [vmem:[#allocation32_spill] sm:$0xff] %v7213_v22 }
 0x100   :  { %v632_v11 = vpop.f32.mrb[0].mxu0 }
 0x101   :  { %v6159_v3 = vadd.f32 %v632_v11, %v7197_v15  ;;  %v703_v43 = vpop.f32.mrb[0].mxu1  ;;  %v634_v2 = vpop.f32.mrb[1].mxu0 }
 0x102   :  { %v6160_v44 = vadd.f32 %v634_v2, %v7201_v48  ;;  %v705_v34 = vpop.f32.mrb[1].mxu1  ;;  %v6175_v59 = vadd.f32 %v703_v43, %v7205_v25 }
 0x103   :  { %6280 = vtanh.f32 %v6159_v3  ;;  %v6176_v6 = vadd.f32 %v705_v34, %v7213_v22 }
 0x104   :  { %6282 = vtanh.f32 %v6160_v44 }
 0x105   :  { %6284 = vtanh.f32 %v6175_v59 }
 0x106   :  { %6286 = vtanh.f32 %v6176_v6  ;;  %v463_v6 = vld [vmem:[%s8509_s5] sm:$0xff] }
 0x10d   :  { %v6281_v12 = vpop.eup %6280 }
 0x10e   :  { %v716_v11 = vmul.f32 0.5, %v6281_v12  ;;  %v6283_v15 = vpop.eup %6282  ;;  %v8694_v12 = vmov 0.0  }
 0x10f   :  { %v717_v52 = vmul.f32 0.5, %v6283_v15  ;;  %v6285_v2 = vpop.eup %6284  ;;  %v467_v15 = vld [vmem:[%s8509_s5 + $0x20] sm:$0xff] }
 0x110   :  { %v720_v1 = vadd.f32 0.5, %v716_v11  ;;  %v6287_v44 = vpop.eup %6286 }
 0x111   :  { %v721_v3 = vadd.f32 0.5, %v717_v52  ;;  %v719_v59 = vmul.f32 0.5, %v6287_v44  ;;  %v464_v52 = vld [vmem:[%s8509_s5 + $0x8] sm:$0xff] }
 0x112   :  { %v729_v48 = vmul.f32 %v6285_v2, %v720_v1  ;;  %v468_v1 = vld [vmem:[%s8509_s5 + $0x28] sm:$0xff]  ;;  %v7247_v2 = vpack.c.bf16 %v467_v15, %v463_v6  ;;  %v475_v6 = vld [vmem:[%s8509_s5 + $0x60] sm:$0xff] }
 0x113   :  { %v728_v43 = vmul.f32 0.0, %v721_v3  ;;  %v723_v61 = vadd.f32 0.5, %v719_v59  ;;  %v7234_v34 = vpack.c.bf16 %v468_v1, %v464_v52  ;;  %v465_v3 = vld [vmem:[%s8509_s5 + $0x10] sm:$0xff]  ;;  %v472_v59 = vld [vmem:[%s8509_s5 + $0x48] sm:$0xff]  ;;  %v474_v52 = vld [vmem:[%s8509_s5 + $0x58] sm:$0xff] }
 0x114   :  { %8697 = vst [vmem:[#allocation36_spill] sm:$0xff] %v7247_v2 }
 0x115   :  { %v7216_v25 = vadd.f32 %v729_v48, %v728_v43  ;;  %8695 = vst [vmem:[#allocation34_spill] sm:$0xff] %v7234_v34  ;;  %v470_v48 = vld [vmem:[%s8509_s5 + $0x38] sm:$0xff]  ;;  %v469_v43 = vld [vmem:[%s8509_s5 + $0x30] sm:$0xff]  ;;  %4776 = vmatprep.subr.bf16.mxu0 %v7234_v34 }
 0x116   :  { %v7256_v44 = vpack.c.bf16 %v469_v43, %v465_v3  ;;  %v473_v43 = vld [vmem:[%s8509_s5 + $0x50] sm:$0xff] }
 0x117   :  { %8693 = vst [vmem:[#allocation33_spill] sm:$0xff] %v7216_v25  ;;  %6288 = vtanh.f32 %v7216_v25 }
 0x118   :  { %8698 = vst [vmem:[#allocation37_spill] sm:$0xff] %v7256_v44 }
 0x121   :  { %v6289_v28 = vpop.eup %6288 }
 0x122   :  { %v7219_v51 = vmul.f32 %v6289_v28, %v723_v61  ;;  %v466_v28 = vld [vmem:[%s8509_s5 + $0x18] sm:$0xff]  ;;  %v476_v61 = vld [vmem:[%s8509_s5 + $0x68] sm:$0xff] }
 0x123   :  { %v7245_v11 = vpack.c.bf16 %v470_v48, %v466_v28  ;;  %v7270_v1 = vpack.c.bf16 %v476_v61, %v472_v59  ;;  %v478_v28 = vld [vmem:[%s8509_s5 + $0x78] sm:$0xff]  ;;  %v471_v48 = vld [vmem:[%s8509_s5 + $0x40] sm:$0xff]  ;;  %v477_v59 = vld [vmem:[%s8509_s5 + $0x70] sm:$0xff] }
 0x124   :  { %798 = vmatmul.mubr.f32.vlgmr.msra.gmra.mrb[16].mxu0 %v7219_v51  ;;  %869 = vmatmul.mubr.f32.vlgmr.msra.gmra.mrb[16].mxu1 %v7219_v51  ;;  %v7281_v15 = vpack.c.bf16 %v478_v28, %v474_v52  ;;  %v7283_v3 = vpack.c.bf16 %v475_v6, %v471_v48  ;;  %v7292_v61 = vpack.c.bf16 %v477_v59, %v473_v43  ;;  %v480_v52 = vld [vmem:[%s8509_s5 + $0x88] sm:$0xff]  ;;  %v482_v48 = vld [vmem:[%s8509_s5 + $0x98] sm:$0xff]  ;;  %v479_v59 = vld [vmem:[%s8509_s5 + $0x80] sm:$0xff] }
 0x125   :  { %961 = vmatprep.mubr.f32.mxu0 %v8694_v12  ;;  %1032 = vmatprep.mubr.f32.mxu1 %v8694_v12  ;;  %8696 = vst [vmem:[#allocation35_spill] sm:$0xff] %v7245_v11  ;;  %8699 = vst [vmem:[#allocation38_spill] sm:$0xff] %v7270_v1  ;;  %v484_v28 = vld [vmem:[%s8509_s5 + $0xa8] sm:$0xff]  ;;  %v486_v43 = vld [vmem:[%s8509_s5 + $0xb8] sm:$0xff] }
 0x126   :  { %4808 = vmatprep.subr.bf16.mxu1 %v7245_v11  ;;  %4778 = vmatpush1.bf16.msra.mxu0 %v7247_v2  ;;  %8700 = vst [vmem:[#allocation39_spill] sm:$0xff] %v7281_v15  ;;  %8701 = vst [vmem:[#allocation40_spill] sm:$0xff] %v7283_v3  ;;  %v7306_v6 = vpack.c.bf16 %v484_v28, %v480_v52  ;;  %v481_v52 = vld [vmem:[%s8509_s5 + $0x90] sm:$0xff] }
 0x127   :  { %4810 = vmatpush1.bf16.msra.mxu1 %v7256_v44  ;;  %4780 = vmatprep.subr.bf16.mxu0 %v7270_v1  ;;  %8702 = vst [vmem:[#allocation41_spill] sm:$0xff] %v7292_v61  ;;  %v485_v28 = vld [vmem:[%s8509_s5 + $0xb0] sm:$0xff] }
 0x128   :  { %4812 = vmatprep.subr.bf16.mxu1 %v7281_v15  ;;  %8703 = vst [vmem:[#allocation42_spill] sm:$0xff] %v7306_v6  ;;  %v7317_v15 = vpack.c.bf16 %v486_v43, %v482_v48  ;;  %v492_v48 = vld [vmem:[%s8509_s5 + $0xe8] sm:$0xff]  ;;  %v490_v43 = vld [vmem:[%s8509_s5 + $0xd8] sm:$0xff] }
 0x12a   :  { %4782 = vmatpush1.bf16.msra.mxu0 %v7283_v3  ;;  %v483_v3 = vld [vmem:[%s8509_s5 + $0xa0] sm:$0xff]  ;;  %8704 = vst [vmem:[#allocation43_spill] sm:$0xff] %v7317_v15 }
 0x12b   :  { %4814 = vmatpush1.bf16.msra.mxu1 %v7292_v61  ;;  %v7319_v1 = vpack.c.bf16 %v483_v3, %v479_v59  ;;  %4784 = vmatprep.subr.bf16.mxu0 %v7306_v6  ;;  %v7328_v61 = vpack.c.bf16 %v485_v28, %v481_v52  ;;  %v488_v3 = vld [vmem:[%s8509_s5 + $0xc8] sm:$0xff]  ;;  %v494_v52 = vld [vmem:[%s8509_s5 + $0xf8] sm:$0xff]  ;;  %v487_v28 = vld [vmem:[%s8509_s5 + $0xc0] sm:$0xff] }
 0x12c   :  { %4816 = vmatprep.subr.bf16.mxu1 %v7317_v15  ;;  %v7342_v59 = vpack.c.bf16 %v492_v48, %v488_v3  ;;  %v7353_v15 = vpack.c.bf16 %v494_v52, %v490_v43  ;;  %v489_v3 = vld [vmem:[%s8509_s5 + $0xd0] sm:$0xff]  ;;  %v500_v43 = vld [vmem:[%s8509_s5 + $0x128] sm:$0xff]  ;;  %v498_v52 = vld [vmem:[%s8509_s5 + $0x118] sm:$0xff] }
 0x12d   :  { %8705 = vst [vmem:[#allocation44_spill] sm:$0xff] %v7319_v1  ;;  %8706 = vst [vmem:[#allocation45_spill] sm:$0xff] %v7328_v61  ;;  %v493_v48 = vld [vmem:[%s8509_s5 + $0xf0] sm:$0xff] }
 0x12e   :  { %4786 = vmatpush1.bf16.msra.mxu0 %v7319_v1  ;;  %8707 = vst [vmem:[#allocation46_spill] sm:$0xff] %v7342_v59  ;;  %v491_v1 = vld [vmem:[%s8509_s5 + $0xe0] sm:$0xff]  ;;  %8708 = vst [vmem:[#allocation47_spill] sm:$0xff] %v7353_v15 }
 0x12f   :  { %4818 = vmatpush1.bf16.msra.mxu1 %v7328_v61  ;;  %v7355_v6 = vpack.c.bf16 %v491_v1, %v487_v28  ;;  %4788 = vmatprep.subr.bf16.mxu0 %v7342_v59  ;;  %v7364_v61 = vpack.c.bf16 %v493_v48, %v489_v3  ;;  %v496_v1 = vld [vmem:[%s8509_s5 + $0x108] sm:$0xff]  ;;  %v502_v3 = vld [vmem:[%s8509_s5 + $0x138] sm:$0xff]  ;;  %v495_v48 = vld [vmem:[%s8509_s5 + $0x100] sm:$0xff] }
 0x130   :  { %4820 = vmatprep.subr.bf16.mxu1 %v7353_v15  ;;  %v7378_v28 = vpack.c.bf16 %v500_v43, %v496_v1  ;;  %v7389_v15 = vpack.c.bf16 %v502_v3, %v498_v52  ;;  %v497_v1 = vld [vmem:[%s8509_s5 + $0x110] sm:$0xff]  ;;  %v508_v52 = vld [vmem:[%s8509_s5 + $0x168] sm:$0xff]  ;;  %v506_v3 = vld [vmem:[%s8509_s5 + $0x158] sm:$0xff] }
 0x131   :  { %8709 = vst [vmem:[#allocation48_spill] sm:$0xff] %v7355_v6  ;;  %8710 = vst [vmem:[#allocation49_spill] sm:$0xff] %v7364_v61  ;;  %v501_v43 = vld [vmem:[%s8509_s5 + $0x130] sm:$0xff] }
 0x132   :  { %4790 = vmatpush1.bf16.msra.mxu0 %v7355_v6  ;;  %8711 = vst [vmem:[#allocation50_spill] sm:$0xff] %v7378_v28  ;;  %v499_v6 = vld [vmem:[%s8509_s5 + $0x120] sm:$0xff]  ;;  %8712 = vst [vmem:[#allocation51_spill] sm:$0xff] %v7389_v15 }
 0x133   :  { %4822 = vmatpush1.bf16.msra.mxu1 %v7364_v61  ;;  %v7391_v59 = vpack.c.bf16 %v499_v6, %v495_v48  ;;  %4792 = vmatprep.subr.bf16.mxu0 %v7378_v28  ;;  %v7400_v61 = vpack.c.bf16 %v501_v43, %v497_v1  ;;  %v504_v6 = vld [vmem:[%s8509_s5 + $0x148] sm:$0xff]  ;;  %v510_v1 = vld [vmem:[%s8509_s5 + $0x178] sm:$0xff]  ;;  %v503_v43 = vld [vmem:[%s8509_s5 + $0x140] sm:$0xff] }
 0x134   :  { %4824 = vmatprep.subr.bf16.mxu1 %v7389_v15  ;;  %v7414_v48 = vpack.c.bf16 %v508_v52, %v504_v6  ;;  %v7425_v15 = vpack.c.bf16 %v510_v1, %v506_v3  ;;  %v505_v6 = vld [vmem:[%s8509_s5 + $0x150] sm:$0xff]  ;;  %v516_v3 = vld [vmem:[%s8509_s5 + $0x1a8] sm:$0xff]  ;;  %v514_v1 = vld [vmem:[%s8509_s5 + $0x198] sm:$0xff] }
 0x135   :  { %8713 = vst [vmem:[#allocation52_spill] sm:$0xff] %v7391_v59  ;;  %8714 = vst [vmem:[#allocation53_spill] sm:$0xff] %v7400_v61  ;;  %v509_v52 = vld [vmem:[%s8509_s5 + $0x170] sm:$0xff] }
 0x136   :  { %4794 = vmatpush1.bf16.msra.mxu0 %v7391_v59  ;;  %8715 = vst [vmem:[#allocation54_spill] sm:$0xff] %v7414_v48  ;;  %v507_v59 = vld [vmem:[%s8509_s5 + $0x160] sm:$0xff]  ;;  %8716 = vst [vmem:[#allocation55_spill] sm:$0xff] %v7425_v15 }
 0x137   :  { %4826 = vmatpush1.bf16.msra.mxu1 %v7400_v61  ;;  %v7427_v28 = vpack.c.bf16 %v507_v59, %v503_v43  ;;  %4796 = vmatprep.subr.bf16.mxu0 %v7414_v48  ;;  %v7436_v61 = vpack.c.bf16 %v509_v52, %v505_v6  ;;  %v512_v59 = vld [vmem:[%s8509_s5 + $0x188] sm:$0xff]  ;;  %v518_v6 = vld [vmem:[%s8509_s5 + $0x1b8] sm:$0xff]  ;;  %v511_v52 = vld [vmem:[%s8509_s5 + $0x180] sm:$0xff] }
 0x138   :  { %4828 = vmatprep.subr.bf16.mxu1 %v7425_v15  ;;  %v7450_v43 = vpack.c.bf16 %v516_v3, %v512_v59  ;;  %v7461_v15 = vpack.c.bf16 %v518_v6, %v514_v1  ;;  %v513_v59 = vld [vmem:[%s8509_s5 + $0x190] sm:$0xff]  ;;  %v524_v1 = vld [vmem:[%s8509_s5 + $0x1e8] sm:$0xff]  ;;  %v522_v6 = vld [vmem:[%s8509_s5 + $0x1d8] sm:$0xff] }
 0x139   :  { %8717 = vst [vmem:[#allocation56_spill] sm:$0xff] %v7427_v28  ;;  %8718 = vst [vmem:[#allocation57_spill] sm:$0xff] %v7436_v61  ;;  %v517_v3 = vld [vmem:[%s8509_s5 + $0x1b0] sm:$0xff] }
 0x13a   :  { %4798 = vmatpush1.bf16.msra.mxu0 %v7427_v28  ;;  %8719 = vst [vmem:[#allocation58_spill] sm:$0xff] %v7450_v43  ;;  %v515_v28 = vld [vmem:[%s8509_s5 + $0x1a0] sm:$0xff]  ;;  %8720 = vst [vmem:[#allocation59_spill] sm:$0xff] %v7461_v15 }
 0x13b   :  { %4830 = vmatpush1.bf16.msra.mxu1 %v7436_v61  ;;  %v7463_v48 = vpack.c.bf16 %v515_v28, %v511_v52  ;;  %4800 = vmatprep.subr.bf16.mxu0 %v7450_v43  ;;  %v7472_v61 = vpack.c.bf16 %v517_v3, %v513_v59  ;;  %v520_v28 = vld [vmem:[%s8509_s5 + $0x1c8] sm:$0xff]  ;;  %v526_v59 = vld [vmem:[%s8509_s5 + $0x1f8] sm:$0xff]  ;;  %v519_v3 = vld [vmem:[%s8509_s5 + $0x1c0] sm:$0xff] }
 0x13c   :  { %4832 = vmatprep.subr.bf16.mxu1 %v7461_v15  ;;  %v7486_v52 = vpack.c.bf16 %v524_v1, %v520_v28  ;;  %v7497_v15 = vpack.c.bf16 %v526_v59, %v522_v6  ;;  %v521_v28 = vld [vmem:[%s8509_s5 + $0x1d0] sm:$0xff]  ;;  %v8727_v6 = vsub.s32 0, %v7187_v37 }
 0x13d   :  { %8721 = vst [vmem:[#allocation60_spill] sm:$0xff] %v7463_v48  ;;  %8722 = vst [vmem:[#allocation61_spill] sm:$0xff] %v7472_v61  ;;  %v525_v1 = vld [vmem:[%s8509_s5 + $0x1f0] sm:$0xff] }
 0x13e   :  { %4802 = vmatpush1.bf16.msra.mxu0 %v7463_v48  ;;  %8723 = vst [vmem:[#allocation62_spill] sm:$0xff] %v7486_v52  ;;  %v523_v48 = vld [vmem:[%s8509_s5 + $0x1e0] sm:$0xff]  ;;  %8724 = vst [vmem:[#allocation63_spill] sm:$0xff] %v7497_v15 }
 0x13f   :  { %4834 = vmatpush1.bf16.msra.mxu1 %v7472_v61  ;;  %v7499_v43 = vpack.c.bf16 %v523_v48, %v519_v3  ;;  %4804 = vmatprep.subr.bf16.mxu0 %v7486_v52  ;;  %v7508_v61 = vpack.c.bf16 %v525_v1, %v521_v28  ;;  %v527_v48 = vld [vmem:[%s8510_s6] sm:$0xf]  ;;  %v8729_v3 = vsub.s32 1, %v7187_v37  ;;  %v8731_v1 = vsub.s32 2, %v7187_v37 }
 0x140   :  { %4836 = vmatprep.subr.bf16.mxu1 %v7497_v15  ;;  %v7520_v59 = vrot.slane %v527_v48, %v8727_v6 }
 0x141   :  { %8725 = vst [vmem:[#allocation64_spill] sm:$0xff] %v7499_v43  ;;  %8726 = vst [vmem:[#allocation65_spill] sm:$0xff] %v7508_v61  ;;  %v7524_v28 = vrot.slane %v527_v48, %v8729_v3  ;;  %v8732_v3 = vsub.s32 3, %v7187_v37 }
 0x142   :  { %4806 = vmatpush1.bf16.msra.mxu0 %v7499_v43  ;;  %8728 = vst [vmem:[#allocation66_spill] sm:$0xff] %v7520_v59  ;;  %v7528_v43 = vrot.slane %v527_v48, %v8731_v1 }
 0x143   :  { %4838 = vmatpush1.bf16.msra.mxu1 %v7508_v61  ;;  %4840 = vmatprep.subr.bf16.mxu0 %v6563_v29  ;;  %8730 = vst [vmem:[#allocation67_spill] sm:$0xff] %v7524_v28  ;;  %v7535_v2 = vrot.slane %v527_v48, %v8732_v3  ;;  %v8742_v3 = vld [vmem:[#allocation17_spill] sm:$0xff] }
 0x144   :  { %4872 = vmatprep.subr.bf16.mxu1 %v6565_v30 }
 0x1f7   :  { %v799_v61 = vpop.f32.mrb[16].mxu0  ;;  %v870_v29 = vpop.f32.mrb[16].mxu1 }
 0x1f8   :  { %v800_v30 = vadd.f32 %v799_v61, %v7520_v59  ;;  %v801_v15 = vpop.f32.mrb[17].mxu0  ;;  %v872_v52 = vpop.f32.mrb[17].mxu1  ;;  %v871_v6 = vadd.f32 %v870_v29, %v7528_v43 }
 0x1f9   :  { %v802_v44 = vadd.f32 %v801_v15, %v7524_v28  ;;  %v873_v1 = vadd.f32 %v872_v52, %v7535_v2  ;;  %v8740_v52 = vld [vmem:[#allocation15_spill] sm:$0xff] }
 0x1fa   :  { %6290 = vtanh.f32 %v800_v30 }
 0x1fb   :  { %6292 = vtanh.f32 %v802_v44 }
 0x1fc   :  { %6294 = vtanh.f32 %v871_v6 }
 0x1fd   :  { %6296 = vtanh.f32 %v873_v1  ;;  %v8743_v1 = vld [vmem:[#allocation18_spill] sm:$0xff] }
 0x204   :  { %v6291_v25 = vpop.eup %6290 }
 0x205   :  { %v879_v22 = vmul.f32 0.5, %v6291_v25  ;;  %v6293_v11 = vpop.eup %6292  ;;  %v8737_v25 = vld [vmem:[#allocation12_spill] sm:$0xff] }
 0x206   :  { %v880_v61 = vmul.f32 0.5, %v6293_v11  ;;  %v6295_v59 = vpop.eup %6294  ;;  %v8739_v11 = vld [vmem:[#allocation14_spill] sm:$0xff] }
 0x207   :  { %v883_v34 = vadd.f32 0.5, %v879_v22  ;;  %v6297_v29 = vpop.eup %6296  ;;  %v8736_v22 = vld [vmem:[#allocation11_spill] sm:$0xff] }
 0x208   :  { %v884_v41 = vadd.f32 0.5, %v880_v61  ;;  %v882_v37 = vmul.f32 0.5, %v6297_v29  ;;  %v8744_v61 = vld [vmem:[#allocation19_spill] sm:$0xff]  ;;  %v8747_v29 = vld [vmem:[#allocation22_spill] sm:$0xff] }
 0x209   :  { %v892_v15 = vmul.f32 %v6295_v59, %v883_v34  ;;  %v8738_v34 = vld [vmem:[#allocation13_spill] sm:$0xff]  ;;  %v8741_v59 = vld [vmem:[#allocation16_spill] sm:$0xff] }
 0x20a   :  { %v891_v30 = vmul.f32 0.0, %v884_v41  ;;  %v886_v44 = vadd.f32 0.5, %v882_v37  ;;  %v8734_v41 = vld [vmem:[#allocation9_spill] sm:$0xff]  ;;  %v8748_v37 = vld [vmem:[#allocation23_spill] sm:$0xff] }
 0x20c   :  { %v7538_v28 = vadd.f32 %v892_v15, %v891_v30  ;;  %v8745_v15 = vld [vmem:[#allocation20_spill] sm:$0xff]  ;;  %v8746_v30 = vld [vmem:[#allocation21_spill] sm:$0xff] }
 0x20e   :  { %6298 = vtanh.f32 %v7538_v28 }
 0x218   :  { %v6299_v48 = vpop.eup %6298 }
 0x219   :  { %v7541_v6 = vmul.f32 %v6299_v48, %v886_v44  ;;  %v8749_v44 = vld [vmem:[#allocation24_spill] sm:$0xff]  ;;  %v8750_v48 = vld [vmem:[#allocation25_spill] sm:$0xff] }
 0x21b   :  { %8733 = vst [vmem:[#allocation68_spill] sm:$0xff] %v7541_v6  ;;  %962 = vmatmul.mubr.f32.vlgmr.msra.gmra.mrb[18].mxu0 %v7541_v6  ;;  %1033 = vmatmul.mubr.f32.vlgmr.msra.gmra.mrb[18].mxu1 %v7541_v6  ;;  %v8751_v6 = vld [vmem:[#allocation26_spill] sm:$0xff] }
 0x21c   :  { %4842 = vmatpush1.bf16.msra.mxu0 %v6579_v35  ;;  %4874 = vmatpush1.bf16.msra.mxu1 %v6588_v38 }
 0x21d   :  { %4844 = vmatprep.subr.bf16.mxu0 %v6600_v42  ;;  %4876 = vmatprep.subr.bf16.mxu1 %v6615_v47 }
 0x21e   :  { %1103 = vmatprep.mubr.f32.mxu0 %v8694_v12  ;;  %1174 = vmatprep.mubr.f32.mxu1 %v8694_v12 }
 0x220   :  { %4846 = vmatpush1.bf16.msra.mxu0 %v6625_v50  ;;  %4878 = vmatpush1.bf16.msra.mxu1 %v6638_v54 }
 0x221   :  { %4848 = vmatprep.subr.bf16.mxu0 %v6648_v57  ;;  %4880 = vmatprep.subr.bf16.mxu1 %v6658_v60 }
 0x224   :  { %4850 = vmatpush1.bf16.msra.mxu0 %v6671_v0  ;;  %4882 = vmatpush1.bf16.msra.mxu1 %v6681_v4 }
 0x225   :  { %4852 = vmatprep.subr.bf16.mxu0 %v6691_v7  ;;  %4884 = vmatprep.subr.bf16.mxu1 %v6701_v10 }
 0x228   :  { %4854 = vmatpush1.bf16.msra.mxu0 %v6714_v14  ;;  %4886 = vmatpush1.bf16.msra.mxu1 %v6724_v17 }
 0x229   :  { %4856 = vmatprep.subr.bf16.mxu0 %v6734_v20  ;;  %4888 = vmatprep.subr.bf16.mxu1 %v6744_v23 }
 0x22c   :  { %4858 = vmatpush1.bf16.msra.mxu0 %v6757_v27  ;;  %4890 = vmatpush1.bf16.msra.mxu1 %v6767_v32 }
 0x22d   :  { %4860 = vmatprep.subr.bf16.mxu0 %v6777_v36  ;;  %4892 = vmatprep.subr.bf16.mxu1 %v6787_v40 }
 0x230   :  { %4862 = vmatpush1.bf16.msra.mxu0 %v6800_v45  ;;  %4894 = vmatpush1.bf16.msra.mxu1 %v6810_v49 }
 0x231   :  { %4864 = vmatprep.subr.bf16.mxu0 %v6820_v53  ;;  %4896 = vmatprep.subr.bf16.mxu1 %v6830_v58 }
 0x234   :  { %4866 = vmatpush1.bf16.msra.mxu0 %v6843_v63  ;;  %4898 = vmatpush1.bf16.msra.mxu1 %v6853_v5 }
 0x235   :  { %4868 = vmatprep.subr.bf16.mxu0 %v6863_v9  ;;  %4900 = vmatprep.subr.bf16.mxu1 %v6873_v13 }
 0x238   :  { %4870 = vmatpush1.bf16.msra.mxu0 %v6880_v16  ;;  %4902 = vmatpush1.bf16.msra.mxu1 %v6884_v18 }
 0x239   :  { %4904 = vmatprep.subr.bf16.mxu0 %v6908_v24  ;;  %4936 = vmatprep.subr.bf16.mxu1 %v6919_v31 }
 0x23b   :  { %1104 = vmatmul.mubr.f32.vlgmr.msra.gmra.mrb[2].mxu0 %v7219_v51  ;;  %1175 = vmatmul.mubr.f32.vlgmr.msra.gmra.mrb[2].mxu1 %v7219_v51  ;;  %v8735_v51 = vld [vmem:[#allocation10_spill] sm:$0xff] }
 0x23c   :  { %4906 = vmatpush1.bf16.msra.mxu0 %v6921_v33  ;;  %4938 = vmatpush1.bf16.msra.mxu1 %v6930_v39 }
 0x23d   :  { %4908 = vmatprep.subr.bf16.mxu0 %v6944_v46  ;;  %4940 = vmatprep.subr.bf16.mxu1 %v6955_v55 }
 0x23e   :  { %1270 = vmatprep.mubr.f32.mxu0 %v8694_v12  ;;  %1341 = vmatprep.mubr.f32.mxu1 %v8694_v12 }
 0x240   :  { %4910 = vmatpush1.bf16.msra.mxu0 %v6957_v56  ;;  %4942 = vmatpush1.bf16.msra.mxu1 %v6966_v62 }
 0x241   :  { %4912 = vmatprep.subr.bf16.mxu0 %v6980_v8  ;;  %4944 = vmatprep.subr.bf16.mxu1 %v6991_v19 }
 0x244   :  { %4914 = vmatpush1.bf16.msra.mxu0 %v6993_v21  ;;  %4946 = vmatpush1.bf16.msra.mxu1 %v7002_v26 }
 0x245   :  { %4916 = vmatprep.subr.bf16.mxu0 %v8734_v41  ;;  %4948 = vmatprep.subr.bf16.mxu1 %v8735_v51 }
 0x248   :  { %4918 = vmatpush1.bf16.msra.mxu0 %v8736_v22  ;;  %4950 = vmatpush1.bf16.msra.mxu1 %v8737_v25 }
 0x249   :  { %4920 = vmatprep.subr.bf16.mxu0 %v8738_v34  ;;  %4952 = vmatprep.subr.bf16.mxu1 %v8739_v11  ;;  %v8757_v34 = vld [vmem:[#allocation30_spill] sm:$0xff] }
 0x24c   :  { %4922 = vmatpush1.bf16.msra.mxu0 %v8740_v52  ;;  %4954 = vmatpush1.bf16.msra.mxu1 %v8741_v59  ;;  %v8752_v59 = vld [vmem:[#allocation27_spill] sm:$0xff]  ;;  %v8756_v52 = vld [vmem:[#allocation29_spill] sm:$0xff] }
 0x24d   :  { %4924 = vmatprep.subr.bf16.mxu0 %v8742_v3  ;;  %4956 = vmatprep.subr.bf16.mxu1 %v8743_v1  ;;  %v8753_v3 = vld [vmem:[#allocation28_spill] sm:$0xff]  ;;  %v8754_v1 = vld [vmem:[#allocation34_spill] sm:$0xff] }
 0x250   :  { %4926 = vmatpush1.bf16.msra.mxu0 %v8744_v61  ;;  %4958 = vmatpush1.bf16.msra.mxu1 %v8745_v15  ;;  %v8755_v61 = vld [vmem:[#allocation35_spill] sm:$0xff] }
 0x251   :  { %4928 = vmatprep.subr.bf16.mxu0 %v8746_v30  ;;  %4960 = vmatprep.subr.bf16.mxu1 %v8747_v29 }
 0x254   :  { %4930 = vmatpush1.bf16.msra.mxu0 %v8748_v37  ;;  %4962 = vmatpush1.bf16.msra.mxu1 %v8749_v44 }
 0x255   :  { %4932 = vmatprep.subr.bf16.mxu0 %v8750_v48  ;;  %4964 = vmatprep.subr.bf16.mxu1 %v8751_v6  ;;  %v8758_v48 = vld [vmem:[#allocation31_spill] sm:$0xff] }
 0x258   :  { %4934 = vmatpush1.bf16.msra.mxu0 %v8752_v59  ;;  %4966 = vmatpush1.bf16.msra.mxu1 %v8753_v3  ;;  %v8759_v59 = vld [vmem:[#allocation32_spill] sm:$0xff] }
 0x259   :  { %4968 = vmatprep.subr.bf16.mxu0 %v8754_v1  ;;  %5000 = vmatprep.subr.bf16.mxu1 %v8755_v61 }
 0x30e   :  { %v1105_v15 = vpop.f32.mrb[2].mxu0  ;;  %v1176_v30 = vpop.f32.mrb[2].mxu1 }
 0x30f   :  { %v6161_v29 = vadd.f32 %v1105_v15, %v8756_v52  ;;  %v1107_v11 = vpop.f32.mrb[3].mxu0  ;;  %v1178_v37 = vpop.f32.mrb[3].mxu1  ;;  %v6177_v25 = vadd.f32 %v1176_v30, %v8758_v48  ;;  %v8760_v52 = vld [vmem:[#allocation33_spill] sm:$0xff] }
 0x310   :  { %v6162_v44 = vadd.f32 %v1107_v11, %v8757_v34  ;;  %v6178_v6 = vadd.f32 %v1178_v37, %v8759_v59 }
 0x311   :  { %6300 = vtanh.f32 %v6161_v29 }
 0x312   :  { %6302 = vtanh.f32 %v6162_v44  ;;  %v8772_v44 = vld [vmem:[#allocation46_spill] sm:$0xff] }
 0x313   :  { %6304 = vtanh.f32 %v6177_v25 }
 0x314   :  { %6306 = vtanh.f32 %v6178_v6  ;;  %v8762_v6 = vld [vmem:[#allocation36_spill] sm:$0xff] }
 0x31b   :  { %v6301_v3 = vpop.eup %6300 }
 0x31c   :  { %v1189_v22 = vmul.f32 0.5, %v6301_v3  ;;  %v6303_v1 = vpop.eup %6302  ;;  %v8769_v3 = vld [vmem:[#allocation43_spill] sm:$0xff] }
 0x31d   :  { %v1190_v61 = vmul.f32 0.5, %v6303_v1  ;;  %v6305_v41 = vpop.eup %6304  ;;  %v8770_v1 = vld [vmem:[#allocation44_spill] sm:$0xff] }
 0x31e   :  { %v1193_v51 = vadd.f32 0.5, %v1189_v22  ;;  %v6307_v11 = vpop.eup %6306  ;;  %v8763_v22 = vld [vmem:[#allocation37_spill] sm:$0xff] }
 0x31f   :  { %v1194_v26 = vadd.f32 0.5, %v1190_v61  ;;  %v1192_v30 = vmul.f32 0.5, %v6307_v11  ;;  %v8771_v61 = vld [vmem:[#allocation45_spill] sm:$0xff]  ;;  %v8774_v11 = vld [vmem:[#allocation48_spill] sm:$0xff] }
 0x320   :  { %v1202_v15 = vmul.f32 %v6305_v41, %v1193_v51  ;;  %v8764_v41 = vld [vmem:[#allocation38_spill] sm:$0xff]  ;;  %v8767_v51 = vld [vmem:[#allocation41_spill] sm:$0xff] }
 0x321   :  { %v1201_v21 = vmul.f32 %v1194_v26, %v8760_v52  ;;  %v1196_v25 = vadd.f32 0.5, %v1192_v30  ;;  %v8766_v26 = vld [vmem:[#allocation40_spill] sm:$0xff]  ;;  %v8768_v52 = vld [vmem:[#allocation42_spill] sm:$0xff]  ;;  %v8775_v30 = vld [vmem:[#allocation49_spill] sm:$0xff] }
 0x323   :  { %v7620_v19 = vadd.f32 %v1202_v15, %v1201_v21  ;;  %v8765_v21 = vld [vmem:[#allocation39_spill] sm:$0xff] }
 0x324   :  { %v8773_v15 = vld [vmem:[#allocation47_spill] sm:$0xff] }
 0x325   :  { %8761 = vst [vmem:[#allocation30_spill] sm:$0xff] %v7620_v19  ;;  %6308 = vtanh.f32 %v7620_v19 }
 0x32f   :  { %v6309_v29 = vpop.eup %6308 }
 0x330   :  { %v7623_v37 = vmul.f32 %v6309_v29, %v1196_v25  ;;  %v8776_v25 = vld [vmem:[#allocation50_spill] sm:$0xff]  ;;  %v8777_v29 = vld [vmem:[#allocation51_spill] sm:$0xff] }
 0x332   :  { %1271 = vmatmul.mubr.f32.vlgmr.msra.gmra.mrb[18].mxu0 %v7623_v37  ;;  %1342 = vmatmul.mubr.f32.vlgmr.msra.gmra.mrb[18].mxu1 %v7623_v37 }
 0x333   :  { %4970 = vmatpush1.bf16.msra.mxu0 %v8762_v6  ;;  %5002 = vmatpush1.bf16.msra.mxu1 %v8763_v22 }
 0x334   :  { %4972 = vmatprep.subr.bf16.mxu0 %v8764_v41  ;;  %5004 = vmatprep.subr.bf16.mxu1 %v8765_v21  ;;  %v8795_v41 = vld [vmem:[#allocation67_spill] sm:$0xff] }
 0x335   :  { %1434 = vmatprep.mubr.f32.mxu0 %v8694_v12  ;;  %1505 = vmatprep.mubr.f32.mxu1 %v8694_v12 }
 0x337   :  { %4974 = vmatpush1.bf16.msra.mxu0 %v8766_v26  ;;  %5006 = vmatpush1.bf16.msra.mxu1 %v8767_v51  ;;  %v8778_v51 = vld [vmem:[#allocation52_spill] sm:$0xff]  ;;  %v8794_v26 = vld [vmem:[#allocation66_spill] sm:$0xff] }
 0x338   :  { %4976 = vmatprep.subr.bf16.mxu0 %v8768_v52  ;;  %5008 = vmatprep.subr.bf16.mxu1 %v8769_v3  ;;  %v8779_v52 = vld [vmem:[#allocation53_spill] sm:$0xff]  ;;  %v8780_v3 = vld [vmem:[#allocation54_spill] sm:$0xff] }
 0x33b   :  { %4978 = vmatpush1.bf16.msra.mxu0 %v8770_v1  ;;  %5010 = vmatpush1.bf16.msra.mxu1 %v8771_v61  ;;  %v8781_v1 = vld [vmem:[#allocation55_spill] sm:$0xff]  ;;  %v8782_v61 = vld [vmem:[#allocation56_spill] sm:$0xff] }
 0x33c   :  { %4980 = vmatprep.subr.bf16.mxu0 %v8772_v44  ;;  %5012 = vmatprep.subr.bf16.mxu1 %v8773_v15  ;;  %v8783_v44 = vld [vmem:[#allocation57_spill] sm:$0xff]  ;;  %v8784_v15 = vld [vmem:[#allocation58_spill] sm:$0xff] }
 0x33f   :  { %4982 = vmatpush1.bf16.msra.mxu0 %v8774_v11  ;;  %5014 = vmatpush1.bf16.msra.mxu1 %v8775_v30  ;;  %v8785_v11 = vld [vmem:[#allocation59_spill] sm:$0xff]  ;;  %v8786_v30 = vld [vmem:[#allocation60_spill] sm:$0xff] }
 0x340   :  { %4984 = vmatprep.subr.bf16.mxu0 %v8776_v25  ;;  %5016 = vmatprep.subr.bf16.mxu1 %v8777_v29  ;;  %v8787_v25 = vld [vmem:[#allocation61_spill] sm:$0xff]  ;;  %v8788_v29 = vld [vmem:[#allocation62_spill] sm:$0xff] }
 0x343   :  { %4986 = vmatpush1.bf16.msra.mxu0 %v8778_v51  ;;  %5018 = vmatpush1.bf16.msra.mxu1 %v8779_v52  ;;  %v8789_v51 = vld [vmem:[#allocation63_spill] sm:$0xff]  ;;  %v8790_v52 = vld [vmem:[#allocation64_spill] sm:$0xff] }
 0x344   :  { %4988 = vmatprep.subr.bf16.mxu0 %v8780_v3  ;;  %5020 = vmatprep.subr.bf16.mxu1 %v8781_v1  ;;  %v8791_v3 = vld [vmem:[#allocation65_spill] sm:$0xff]  ;;  %v8792_v1 = vld [vmem:[#allocation3_spill] sm:$0xff] }
 0x347   :  { %4990 = vmatpush1.bf16.msra.mxu0 %v8782_v61  ;;  %5022 = vmatpush1.bf16.msra.mxu1 %v8783_v44  ;;  %v8793_v61 = vld [vmem:[#allocation4_spill] sm:$0xff] }
 0x348   :  { %4992 = vmatprep.subr.bf16.mxu0 %v8784_v15  ;;  %5024 = vmatprep.subr.bf16.mxu1 %v8785_v11 }
 0x34b   :  { %4994 = vmatpush1.bf16.msra.mxu0 %v8786_v30  ;;  %5026 = vmatpush1.bf16.msra.mxu1 %v8787_v25 }
 0x34c   :  { %4996 = vmatprep.subr.bf16.mxu0 %v8788_v29  ;;  %5028 = vmatprep.subr.bf16.mxu1 %v8789_v51 }
 0x34f   :  { %4998 = vmatpush1.bf16.msra.mxu0 %v8790_v52  ;;  %5030 = vmatpush1.bf16.msra.mxu1 %v8791_v3 }
 0x350   :  { %5032 = vmatprep.subr.bf16.mxu0 %v8792_v1  ;;  %5064 = vmatprep.subr.bf16.mxu1 %v8793_v61 }
 0x405   :  { %v1272_v44 = vpop.f32.mrb[18].mxu0  ;;  %v1343_v15 = vpop.f32.mrb[18].mxu1 }
 0x406   :  { %v6191_v11 = vadd.f32 %v1272_v44, %v8794_v26  ;;  %v1274_v21 = vpop.f32.mrb[19].mxu0  ;;  %v1345_v30 = vpop.f32.mrb[19].mxu1  ;;  %v6193_v29 = vadd.f32 %v1343_v15, %v7528_v43 }
 0x407   :  { %v6192_v25 = vadd.f32 %v1274_v21, %v8795_v41  ;;  %v6194_v52 = vadd.f32 %v1345_v30, %v7535_v2 }
 0x408   :  { %6310 = vtanh.f32 %v6191_v11 }
 0x409   :  { %6312 = vtanh.f32 %v6192_v25 }
 0x40a   :  { %6314 = vtanh.f32 %v6193_v29  ;;  %v8808_v29 = vld [vmem:[#allocation17_spill] sm:$0xff] }
 0x40b   :  { %6316 = vtanh.f32 %v6194_v52  ;;  %v8804_v52 = vld [vmem:[#allocation13_spill] sm:$0xff] }
 0x412   :  { %v6311_v3 = vpop.eup %6310 }
 0x413   :  { %v1352_v51 = vmul.f32 0.5, %v6311_v3  ;;  %v6313_v1 = vpop.eup %6312  ;;  %v8805_v3 = vld [vmem:[#allocation14_spill] sm:$0xff] }
 0x414   :  { %v1353_v61 = vmul.f32 0.5, %v6313_v1  ;;  %v6315_v6 = vpop.eup %6314  ;;  %v8806_v1 = vld [vmem:[#allocation15_spill] sm:$0xff] }
 0x415   :  { %v1356_v22 = vadd.f32 0.5, %v1352_v51  ;;  %v6317_v21 = vpop.eup %6316  ;;  %v8803_v51 = vld [vmem:[#allocation12_spill] sm:$0xff] }
 0x416   :  { %v1357_v19 = vadd.f32 0.5, %v1353_v61  ;;  %v1355_v15 = vmul.f32 0.5, %v6317_v21  ;;  %v8807_v61 = vld [vmem:[#allocation16_spill] sm:$0xff]  ;;  %v8810_v21 = vld [vmem:[#allocation19_spill] sm:$0xff] }
 0x417   :  { %v1365_v44 = vmul.f32 %v6315_v6, %v1356_v22  ;;  %v8800_v6 = vld [vmem:[#allocation9_spill] sm:$0xff]  ;;  %v8801_v22 = vld [vmem:[#allocation10_spill] sm:$0xff] }
 0x418   :  { %v1364_v26 = vmul.f32 %v1357_v19, %v7538_v28  ;;  %v1359_v11 = vadd.f32 0.5, %v1355_v15  ;;  %v8797_v19 = vld [vmem:[#allocation6_spill] sm:$0xff]  ;;  %v8798_v28 = vld [vmem:[#allocation7_spill] sm:$0xff]  ;;  %v8811_v15 = vld [vmem:[#allocation20_spill] sm:$0xff] }
 0x41a   :  { %v7666_v59 = vadd.f32 %v1365_v44, %v1364_v26  ;;  %v8802_v26 = vld [vmem:[#allocation11_spill] sm:$0xff]  ;;  %v8809_v44 = vld [vmem:[#allocation18_spill] sm:$0xff] }
 0x41c   :  { %6318 = vtanh.f32 %v7666_v59 }
 0x426   :  { %v6319_v25 = vpop.eup %6318 }
 0x427   :  { %v7669_v30 = vmul.f32 %v6319_v25, %v1359_v11  ;;  %v8812_v11 = vld [vmem:[#allocation21_spill] sm:$0xff]  ;;  %v8813_v25 = vld [vmem:[#allocation22_spill] sm:$0xff] }
 0x429   :  { %8796 = vst [vmem:[#allocation31_spill] sm:$0xff] %v7669_v30  ;;  %1435 = vmatmul.mubr.f32.vlgmr.msra.gmra.mrb[20].mxu0 %v7669_v30  ;;  %1506 = vmatmul.mubr.f32.vlgmr.msra.gmra.mrb[20].mxu1 %v7669_v30  ;;  %v8814_v30 = vld [vmem:[#allocation23_spill] sm:$0xff] }
 0x42a   :  { %5034 = vmatpush1.bf16.msra.mxu0 %v6579_v35  ;;  %5066 = vmatpush1.bf16.msra.mxu1 %v6588_v38 }
 0x42b   :  { %5036 = vmatprep.subr.bf16.mxu0 %v6600_v42  ;;  %5068 = vmatprep.subr.bf16.mxu1 %v6615_v47 }
 0x42c   :  { %1576 = vmatprep.mubr.f32.mxu0 %v8694_v12  ;;  %1647 = vmatprep.mubr.f32.mxu1 %v8694_v12 }
 0x42e   :  { %5038 = vmatpush1.bf16.msra.mxu0 %v6625_v50  ;;  %5070 = vmatpush1.bf16.msra.mxu1 %v6638_v54 }
 0x42f   :  { %5040 = vmatprep.subr.bf16.mxu0 %v6648_v57  ;;  %5072 = vmatprep.subr.bf16.mxu1 %v6658_v60 }
 0x432   :  { %5042 = vmatpush1.bf16.msra.mxu0 %v6671_v0  ;;  %5074 = vmatpush1.bf16.msra.mxu1 %v6681_v4 }
 0x433   :  { %5044 = vmatprep.subr.bf16.mxu0 %v6691_v7  ;;  %5076 = vmatprep.subr.bf16.mxu1 %v6701_v10 }
 0x436   :  { %5046 = vmatpush1.bf16.msra.mxu0 %v6714_v14  ;;  %5078 = vmatpush1.bf16.msra.mxu1 %v6724_v17 }
 0x437   :  { %5048 = vmatprep.subr.bf16.mxu0 %v6734_v20  ;;  %5080 = vmatprep.subr.bf16.mxu1 %v6744_v23 }
 0x43a   :  { %5050 = vmatpush1.bf16.msra.mxu0 %v6757_v27  ;;  %5082 = vmatpush1.bf16.msra.mxu1 %v6767_v32 }
 0x43b   :  { %5052 = vmatprep.subr.bf16.mxu0 %v6777_v36  ;;  %5084 = vmatprep.subr.bf16.mxu1 %v6787_v40 }
 0x43e   :  { %5054 = vmatpush1.bf16.msra.mxu0 %v6800_v45  ;;  %5086 = vmatpush1.bf16.msra.mxu1 %v6810_v49 }
 0x43f   :  { %5056 = vmatprep.subr.bf16.mxu0 %v6820_v53  ;;  %5088 = vmatprep.subr.bf16.mxu1 %v6830_v58 }
 0x442   :  { %5058 = vmatpush1.bf16.msra.mxu0 %v6843_v63  ;;  %5090 = vmatpush1.bf16.msra.mxu1 %v6853_v5 }
 0x443   :  { %5060 = vmatprep.subr.bf16.mxu0 %v6863_v9  ;;  %5092 = vmatprep.subr.bf16.mxu1 %v6873_v13 }
 0x446   :  { %5062 = vmatpush1.bf16.msra.mxu0 %v6880_v16  ;;  %5094 = vmatpush1.bf16.msra.mxu1 %v6884_v18 }
 0x447   :  { %5096 = vmatprep.subr.bf16.mxu0 %v6908_v24  ;;  %5128 = vmatprep.subr.bf16.mxu1 %v6919_v31 }
 0x449   :  { %1577 = vmatmul.mubr.f32.vlgmr.msra.gmra.mrb[4].mxu0 %v7623_v37  ;;  %1648 = vmatmul.mubr.f32.vlgmr.msra.gmra.mrb[4].mxu1 %v7623_v37  ;;  %v8799_v37 = vld [vmem:[#allocation8_spill] sm:$0xff] }
 0x44a   :  { %5098 = vmatpush1.bf16.msra.mxu0 %v6921_v33  ;;  %5130 = vmatpush1.bf16.msra.mxu1 %v6930_v39 }
 0x44b   :  { %5100 = vmatprep.subr.bf16.mxu0 %v6944_v46  ;;  %5132 = vmatprep.subr.bf16.mxu1 %v6955_v55 }
 0x44c   :  { %1743 = vmatprep.mubr.f32.mxu0 %v8694_v12  ;;  %1814 = vmatprep.mubr.f32.mxu1 %v8694_v12 }
 0x44e   :  { %5102 = vmatpush1.bf16.msra.mxu0 %v6957_v56  ;;  %5134 = vmatpush1.bf16.msra.mxu1 %v6966_v62 }
 0x44f   :  { %5104 = vmatprep.subr.bf16.mxu0 %v6980_v8  ;;  %5136 = vmatprep.subr.bf16.mxu1 %v8797_v19 }
 0x452   :  { %5106 = vmatpush1.bf16.msra.mxu0 %v8798_v28  ;;  %5138 = vmatpush1.bf16.msra.mxu1 %v8799_v37 }
 0x453   :  { %5108 = vmatprep.subr.bf16.mxu0 %v8800_v6  ;;  %5140 = vmatprep.subr.bf16.mxu1 %v8801_v22 }
 0x456   :  { %5110 = vmatpush1.bf16.msra.mxu0 %v8802_v26  ;;  %5142 = vmatpush1.bf16.msra.mxu1 %v8803_v51  ;;  %v8822_v51 = vld [vmem:[#allocation29_spill] sm:$0xff] }
 0x457   :  { %5112 = vmatprep.subr.bf16.mxu0 %v8804_v52  ;;  %5144 = vmatprep.subr.bf16.mxu1 %v8805_v3  ;;  %v8815_v52 = vld [vmem:[#allocation24_spill] sm:$0xff]  ;;  %v8816_v3 = vld [vmem:[#allocation25_spill] sm:$0xff] }
 0x45a   :  { %5114 = vmatpush1.bf16.msra.mxu0 %v8806_v1  ;;  %5146 = vmatpush1.bf16.msra.mxu1 %v8807_v61  ;;  %v8817_v1 = vld [vmem:[#allocation26_spill] sm:$0xff]  ;;  %v8818_v61 = vld [vmem:[#allocation27_spill] sm:$0xff] }
 0x45b   :  { %5116 = vmatprep.subr.bf16.mxu0 %v8808_v29  ;;  %5148 = vmatprep.subr.bf16.mxu1 %v8809_v44  ;;  %v8819_v29 = vld [vmem:[#allocation28_spill] sm:$0xff]  ;;  %v8820_v44 = vld [vmem:[#allocation34_spill] sm:$0xff] }
 0x45e   :  { %5118 = vmatpush1.bf16.msra.mxu0 %v8810_v21  ;;  %5150 = vmatpush1.bf16.msra.mxu1 %v8811_v15  ;;  %v8821_v21 = vld [vmem:[#allocation35_spill] sm:$0xff] }
 0x45f   :  { %5120 = vmatprep.subr.bf16.mxu0 %v8812_v11  ;;  %5152 = vmatprep.subr.bf16.mxu1 %v8813_v25 }
 0x462   :  { %5122 = vmatpush1.bf16.msra.mxu0 %v8814_v30  ;;  %5154 = vmatpush1.bf16.msra.mxu1 %v8815_v52 }
 0x463   :  { %5124 = vmatprep.subr.bf16.mxu0 %v8816_v3  ;;  %5156 = vmatprep.subr.bf16.mxu1 %v8817_v1 }
 0x466   :  { %5126 = vmatpush1.bf16.msra.mxu0 %v8818_v61  ;;  %5158 = vmatpush1.bf16.msra.mxu1 %v8819_v29  ;;  %v8823_v61 = vld [vmem:[#allocation32_spill] sm:$0xff] }
 0x467   :  { %5160 = vmatprep.subr.bf16.mxu0 %v8820_v44  ;;  %5192 = vmatprep.subr.bf16.mxu1 %v8821_v21 }
 0x51c   :  { %v1578_v15 = vpop.f32.mrb[4].mxu0  ;;  %v1649_v11 = vpop.f32.mrb[4].mxu1 }
 0x51d   :  { %v6163_v25 = vadd.f32 %v1578_v15, %v8822_v51  ;;  %v1580_v26 = vpop.f32.mrb[5].mxu0  ;;  %v1651_v30 = vpop.f32.mrb[5].mxu1  ;;  %v6179_v3 = vadd.f32 %v1649_v11, %v8758_v48  ;;  %v8824_v51 = vld [vmem:[#allocation30_spill] sm:$0xff] }
 0x51e   :  { %v6164_v52 = vadd.f32 %v1580_v26, %v8757_v34  ;;  %v6180_v1 = vadd.f32 %v1651_v30, %v8823_v61 }
 0x51f   :  { %6320 = vtanh.f32 %v6163_v25  ;;  %v8836_v25 = vld [vmem:[#allocation46_spill] sm:$0xff] }
 0x520   :  { %6322 = vtanh.f32 %v6164_v52 }
 0x521   :  { %6324 = vtanh.f32 %v6179_v3 }
 0x522   :  { %6326 = vtanh.f32 %v6180_v1  ;;  %v8827_v1 = vld [vmem:[#allocation37_spill] sm:$0xff] }
 0x529   :  { %v6321_v29 = vpop.eup %6320 }
 0x52a   :  { %v1662_v22 = vmul.f32 0.5, %v6321_v29  ;;  %v6323_v44 = vpop.eup %6322  ;;  %v8833_v29 = vld [vmem:[#allocation43_spill] sm:$0xff] }
 0x52b   :  { %v1663_v21 = vmul.f32 0.5, %v6323_v44  ;;  %v6325_v37 = vpop.eup %6324  ;;  %v8834_v44 = vld [vmem:[#allocation44_spill] sm:$0xff] }
 0x52c   :  { %v1666_v6 = vadd.f32 0.5, %v1662_v22  ;;  %v6327_v26 = vpop.eup %6326  ;;  %v8826_v22 = vld [vmem:[#allocation36_spill] sm:$0xff] }
 0x52d   :  { %v1667_v28 = vadd.f32 0.5, %v1663_v21  ;;  %v1665_v52 = vmul.f32 0.5, %v6327_v26  ;;  %v8835_v21 = vld [vmem:[#allocation45_spill] sm:$0xff]  ;;  %v8838_v26 = vld [vmem:[#allocation48_spill] sm:$0xff] }
 0x52e   :  { %v1675_v15 = vmul.f32 %v6325_v37, %v1666_v6  ;;  %v8828_v37 = vld [vmem:[#allocation38_spill] sm:$0xff]  ;;  %v8831_v6 = vld [vmem:[#allocation41_spill] sm:$0xff] }
 0x52f   :  { %v1674_v19 = vmul.f32 %v1667_v28, %v8824_v51  ;;  %v1669_v3 = vadd.f32 0.5, %v1665_v52  ;;  %v8830_v28 = vld [vmem:[#allocation40_spill] sm:$0xff]  ;;  %v8832_v51 = vld [vmem:[#allocation42_spill] sm:$0xff]  ;;  %v8839_v52 = vld [vmem:[#allocation49_spill] sm:$0xff] }
 0x531   :  { %v7748_v8 = vadd.f32 %v1675_v15, %v1674_v19  ;;  %v8829_v19 = vld [vmem:[#allocation39_spill] sm:$0xff] }
 0x532   :  { %v8837_v15 = vld [vmem:[#allocation47_spill] sm:$0xff] }
 0x533   :  { %8825 = vst [vmem:[#allocation33_spill] sm:$0xff] %v7748_v8  ;;  %6328 = vtanh.f32 %v7748_v8 }
 0x53d   :  { %v6329_v11 = vpop.eup %6328 }
 0x53e   :  { %v7751_v30 = vmul.f32 %v6329_v11, %v1669_v3  ;;  %v8840_v3 = vld [vmem:[#allocation50_spill] sm:$0xff]  ;;  %v8841_v11 = vld [vmem:[#allocation51_spill] sm:$0xff] }
 0x540   :  { %1744 = vmatmul.mubr.f32.vlgmr.msra.gmra.mrb[20].mxu0 %v7751_v30  ;;  %1815 = vmatmul.mubr.f32.vlgmr.msra.gmra.mrb[20].mxu1 %v7751_v30 }
 0x541   :  { %5162 = vmatpush1.bf16.msra.mxu0 %v8826_v22  ;;  %5194 = vmatpush1.bf16.msra.mxu1 %v8827_v1 }
 0x542   :  { %5164 = vmatprep.subr.bf16.mxu0 %v8828_v37  ;;  %5196 = vmatprep.subr.bf16.mxu1 %v8829_v19 }
 0x543   :  { %1907 = vmatprep.mubr.f32.mxu0 %v8694_v12  ;;  %1978 = vmatprep.mubr.f32.mxu1 %v8694_v12 }
 0x545   :  { %5166 = vmatpush1.bf16.msra.mxu0 %v8830_v28  ;;  %5198 = vmatpush1.bf16.msra.mxu1 %v8831_v6  ;;  %v8842_v6 = vld [vmem:[#allocation52_spill] sm:$0xff]  ;;  %v8858_v28 = vld [vmem:[#allocation66_spill] sm:$0xff] }
 0x546   :  { %5168 = vmatprep.subr.bf16.mxu0 %v8832_v51  ;;  %5200 = vmatprep.subr.bf16.mxu1 %v8833_v29  ;;  %v8843_v51 = vld [vmem:[#allocation53_spill] sm:$0xff]  ;;  %v8844_v29 = vld [vmem:[#allocation54_spill] sm:$0xff] }
 0x549   :  { %5170 = vmatpush1.bf16.msra.mxu0 %v8834_v44  ;;  %5202 = vmatpush1.bf16.msra.mxu1 %v8835_v21  ;;  %v8845_v44 = vld [vmem:[#allocation55_spill] sm:$0xff]  ;;  %v8846_v21 = vld [vmem:[#allocation56_spill] sm:$0xff] }
 0x54a   :  { %5172 = vmatprep.subr.bf16.mxu0 %v8836_v25  ;;  %5204 = vmatprep.subr.bf16.mxu1 %v8837_v15  ;;  %v8847_v25 = vld [vmem:[#allocation57_spill] sm:$0xff]  ;;  %v8848_v15 = vld [vmem:[#allocation58_spill] sm:$0xff] }
 0x54d   :  { %5174 = vmatpush1.bf16.msra.mxu0 %v8838_v26  ;;  %5206 = vmatpush1.bf16.msra.mxu1 %v8839_v52  ;;  %v8849_v26 = vld [vmem:[#allocation59_spill] sm:$0xff]  ;;  %v8850_v52 = vld [vmem:[#allocation60_spill] sm:$0xff] }
 0x54e   :  { %5176 = vmatprep.subr.bf16.mxu0 %v8840_v3  ;;  %5208 = vmatprep.subr.bf16.mxu1 %v8841_v11  ;;  %v8851_v3 = vld [vmem:[#allocation61_spill] sm:$0xff]  ;;  %v8852_v11 = vld [vmem:[#allocation62_spill] sm:$0xff] }
 0x551   :  { %5178 = vmatpush1.bf16.msra.mxu0 %v8842_v6  ;;  %5210 = vmatpush1.bf16.msra.mxu1 %v8843_v51  ;;  %v8853_v6 = vld [vmem:[#allocation63_spill] sm:$0xff]  ;;  %v8854_v51 = vld [vmem:[#allocation64_spill] sm:$0xff] }
 0x552   :  { %5180 = vmatprep.subr.bf16.mxu0 %v8844_v29  ;;  %5212 = vmatprep.subr.bf16.mxu1 %v8845_v44  ;;  %v8855_v29 = vld [vmem:[#allocation65_spill] sm:$0xff]  ;;  %v8856_v44 = vld [vmem:[#allocation3_spill] sm:$0xff] }
 0x555   :  { %5182 = vmatpush1.bf16.msra.mxu0 %v8846_v21  ;;  %5214 = vmatpush1.bf16.msra.mxu1 %v8847_v25  ;;  %v8857_v21 = vld [vmem:[#allocation4_spill] sm:$0xff] }
 0x556   :  { %5184 = vmatprep.subr.bf16.mxu0 %v8848_v15  ;;  %5216 = vmatprep.subr.bf16.mxu1 %v8849_v26 }
 0x559   :  { %5186 = vmatpush1.bf16.msra.mxu0 %v8850_v52  ;;  %5218 = vmatpush1.bf16.msra.mxu1 %v8851_v3 }
 0x55a   :  { %5188 = vmatprep.subr.bf16.mxu0 %v8852_v11  ;;  %5220 = vmatprep.subr.bf16.mxu1 %v8853_v6 }
 0x55d   :  { %5190 = vmatpush1.bf16.msra.mxu0 %v8854_v51  ;;  %5222 = vmatpush1.bf16.msra.mxu1 %v8855_v29 }
 0x55e   :  { %5224 = vmatprep.subr.bf16.mxu0 %v8856_v44  ;;  %5256 = vmatprep.subr.bf16.mxu1 %v8857_v21 }
 0x613   :  { %v1745_v25 = vpop.f32.mrb[20].mxu0  ;;  %v1816_v15 = vpop.f32.mrb[20].mxu1 }
 0x614   :  { %v6195_v26 = vadd.f32 %v1745_v25, %v8858_v28  ;;  %v1747_v19 = vpop.f32.mrb[21].mxu0  ;;  %v1818_v52 = vpop.f32.mrb[21].mxu1  ;;  %v6197_v11 = vadd.f32 %v1816_v15, %v7528_v43 }
 0x615   :  { %v6196_v3 = vadd.f32 %v1747_v19, %v8795_v41  ;;  %v6198_v51 = vadd.f32 %v1818_v52, %v7535_v2 }
 0x616   :  { %6330 = vtanh.f32 %v6195_v26 }
 0x617   :  { %6332 = vtanh.f32 %v6196_v3 }
 0x618   :  { %6334 = vtanh.f32 %v6197_v11  ;;  %v8871_v11 = vld [vmem:[#allocation16_spill] sm:$0xff] }
 0x619   :  { %6336 = vtanh.f32 %v6198_v51  ;;  %v8867_v51 = vld [vmem:[#allocation12_spill] sm:$0xff] }
 0x620   :  { %v6331_v29 = vpop.eup %6330 }
 0x621   :  { %v1825_v6 = vmul.f32 0.5, %v6331_v29  ;;  %v6333_v44 = vpop.eup %6332  ;;  %v8868_v29 = vld [vmem:[#allocation13_spill] sm:$0xff] }
 0x622   :  { %v1826_v21 = vmul.f32 0.5, %v6333_v44  ;;  %v6335_v1 = vpop.eup %6334  ;;  %v8869_v44 = vld [vmem:[#allocation14_spill] sm:$0xff] }
 0x623   :  { %v1829_v37 = vadd.f32 0.5, %v1825_v6  ;;  %v6337_v19 = vpop.eup %6336  ;;  %v8866_v6 = vld [vmem:[#allocation11_spill] sm:$0xff] }
 0x624   :  { %v1830_v22 = vadd.f32 0.5, %v1826_v21  ;;  %v1828_v15 = vmul.f32 0.5, %v6337_v19  ;;  %v8870_v21 = vld [vmem:[#allocation15_spill] sm:$0xff]  ;;  %v8873_v19 = vld [vmem:[#allocation18_spill] sm:$0xff] }
 0x625   :  { %v1838_v25 = vmul.f32 %v6335_v1, %v1829_v37  ;;  %v8863_v1 = vld [vmem:[#allocation8_spill] sm:$0xff]  ;;  %v8864_v37 = vld [vmem:[#allocation9_spill] sm:$0xff] }
 0x626   :  { %v1837_v28 = vmul.f32 %v1830_v22, %v7666_v59  ;;  %v1832_v26 = vadd.f32 0.5, %v1828_v15  ;;  %v8860_v59 = vld [vmem:[#allocation5_spill] sm:$0xff]  ;;  %v8861_v22 = vld [vmem:[#allocation6_spill] sm:$0xff]  ;;  %v8874_v15 = vld [vmem:[#allocation19_spill] sm:$0xff] }
 0x628   :  { %v7794_v8 = vadd.f32 %v1838_v25, %v1837_v28  ;;  %v8865_v28 = vld [vmem:[#allocation10_spill] sm:$0xff]  ;;  %v8872_v25 = vld [vmem:[#allocation17_spill] sm:$0xff] }
 0x62a   :  { %6338 = vtanh.f32 %v7794_v8 }
 0x634   :  { %v6339_v3 = vpop.eup %6338 }
 0x635   :  { %v7797_v52 = vmul.f32 %v6339_v3, %v1832_v26  ;;  %v8875_v26 = vld [vmem:[#allocation20_spill] sm:$0xff]  ;;  %v8876_v3 = vld [vmem:[#allocation21_spill] sm:$0xff] }
 0x637   :  { %8859 = vst [vmem:[#allocation67_spill] sm:$0xff] %v7797_v52  ;;  %1908 = vmatmul.mubr.f32.vlgmr.msra.gmra.mrb[22].mxu0 %v7797_v52  ;;  %1979 = vmatmul.mubr.f32.vlgmr.msra.gmra.mrb[22].mxu1 %v7797_v52  ;;  %v8877_v52 = vld [vmem:[#allocation22_spill] sm:$0xff] }
 0x638   :  { %5226 = vmatpush1.bf16.msra.mxu0 %v6579_v35  ;;  %5258 = vmatpush1.bf16.msra.mxu1 %v6588_v38 }
 0x639   :  { %5228 = vmatprep.subr.bf16.mxu0 %v6600_v42  ;;  %5260 = vmatprep.subr.bf16.mxu1 %v6615_v47 }
 0x63a   :  { %2049 = vmatprep.mubr.f32.mxu0 %v8694_v12  ;;  %2120 = vmatprep.mubr.f32.mxu1 %v8694_v12 }
 0x63c   :  { %5230 = vmatpush1.bf16.msra.mxu0 %v6625_v50  ;;  %5262 = vmatpush1.bf16.msra.mxu1 %v6638_v54 }
 0x63d   :  { %5232 = vmatprep.subr.bf16.mxu0 %v6648_v57  ;;  %5264 = vmatprep.subr.bf16.mxu1 %v6658_v60 }
 0x640   :  { %5234 = vmatpush1.bf16.msra.mxu0 %v6671_v0  ;;  %5266 = vmatpush1.bf16.msra.mxu1 %v6681_v4 }
 0x641   :  { %5236 = vmatprep.subr.bf16.mxu0 %v6691_v7  ;;  %5268 = vmatprep.subr.bf16.mxu1 %v6701_v10 }
 0x644   :  { %5238 = vmatpush1.bf16.msra.mxu0 %v6714_v14  ;;  %5270 = vmatpush1.bf16.msra.mxu1 %v6724_v17 }
 0x645   :  { %5240 = vmatprep.subr.bf16.mxu0 %v6734_v20  ;;  %5272 = vmatprep.subr.bf16.mxu1 %v6744_v23 }
 0x648   :  { %5242 = vmatpush1.bf16.msra.mxu0 %v6757_v27  ;;  %5274 = vmatpush1.bf16.msra.mxu1 %v6767_v32 }
 0x649   :  { %5244 = vmatprep.subr.bf16.mxu0 %v6777_v36  ;;  %5276 = vmatprep.subr.bf16.mxu1 %v6787_v40 }
 0x64c   :  { %5246 = vmatpush1.bf16.msra.mxu0 %v6800_v45  ;;  %5278 = vmatpush1.bf16.msra.mxu1 %v6810_v49 }
 0x64d   :  { %5248 = vmatprep.subr.bf16.mxu0 %v6820_v53  ;;  %5280 = vmatprep.subr.bf16.mxu1 %v6830_v58 }
 0x650   :  { %5250 = vmatpush1.bf16.msra.mxu0 %v6843_v63  ;;  %5282 = vmatpush1.bf16.msra.mxu1 %v6853_v5 }
 0x651   :  { %5252 = vmatprep.subr.bf16.mxu0 %v6863_v9  ;;  %5284 = vmatprep.subr.bf16.mxu1 %v6873_v13 }
 0x654   :  { %5254 = vmatpush1.bf16.msra.mxu0 %v6880_v16  ;;  %5286 = vmatpush1.bf16.msra.mxu1 %v6884_v18 }
 0x655   :  { %5288 = vmatprep.subr.bf16.mxu0 %v6908_v24  ;;  %5320 = vmatprep.subr.bf16.mxu1 %v6919_v31 }
 0x657   :  { %2050 = vmatmul.mubr.f32.vlgmr.msra.gmra.mrb[6].mxu0 %v7751_v30  ;;  %2121 = vmatmul.mubr.f32.vlgmr.msra.gmra.mrb[6].mxu1 %v7751_v30  ;;  %v8862_v30 = vld [vmem:[#allocation7_spill] sm:$0xff] }
 0x658   :  { %5290 = vmatpush1.bf16.msra.mxu0 %v6921_v33  ;;  %5322 = vmatpush1.bf16.msra.mxu1 %v6930_v39 }
 0x659   :  { %5292 = vmatprep.subr.bf16.mxu0 %v6944_v46  ;;  %5324 = vmatprep.subr.bf16.mxu1 %v6955_v55 }
 0x65a   :  { %2216 = vmatprep.mubr.f32.mxu0 %v8694_v12  ;;  %2287 = vmatprep.mubr.f32.mxu1 %v8694_v12 }
 0x65c   :  { %5294 = vmatpush1.bf16.msra.mxu0 %v6957_v56  ;;  %5326 = vmatpush1.bf16.msra.mxu1 %v6966_v62 }
 0x65d   :  { %5296 = vmatprep.subr.bf16.mxu0 %v8860_v59  ;;  %5328 = vmatprep.subr.bf16.mxu1 %v8861_v22 }
 0x660   :  { %5298 = vmatpush1.bf16.msra.mxu0 %v8862_v30  ;;  %5330 = vmatpush1.bf16.msra.mxu1 %v8863_v1 }
 0x661   :  { %5300 = vmatprep.subr.bf16.mxu0 %v8864_v37  ;;  %5332 = vmatprep.subr.bf16.mxu1 %v8865_v28 }
 0x664   :  { %5302 = vmatpush1.bf16.msra.mxu0 %v8866_v6  ;;  %5334 = vmatpush1.bf16.msra.mxu1 %v8867_v51  ;;  %v8878_v51 = vld [vmem:[#allocation23_spill] sm:$0xff]  ;;  %v8886_v6 = vld [vmem:[#allocation29_spill] sm:$0xff] }
 0x665   :  { %5304 = vmatprep.subr.bf16.mxu0 %v8868_v29  ;;  %5336 = vmatprep.subr.bf16.mxu1 %v8869_v44  ;;  %v8879_v29 = vld [vmem:[#allocation24_spill] sm:$0xff]  ;;  %v8880_v44 = vld [vmem:[#allocation25_spill] sm:$0xff] }
 0x668   :  { %5306 = vmatpush1.bf16.msra.mxu0 %v8870_v21  ;;  %5338 = vmatpush1.bf16.msra.mxu1 %v8871_v11  ;;  %v8881_v21 = vld [vmem:[#allocation26_spill] sm:$0xff]  ;;  %v8882_v11 = vld [vmem:[#allocation27_spill] sm:$0xff] }
 0x669   :  { %5308 = vmatprep.subr.bf16.mxu0 %v8872_v25  ;;  %5340 = vmatprep.subr.bf16.mxu1 %v8873_v19  ;;  %v8883_v25 = vld [vmem:[#allocation28_spill] sm:$0xff]  ;;  %v8884_v19 = vld [vmem:[#allocation34_spill] sm:$0xff] }
 0x66c   :  { %5310 = vmatpush1.bf16.msra.mxu0 %v8874_v15  ;;  %5342 = vmatpush1.bf16.msra.mxu1 %v8875_v26  ;;  %v8885_v15 = vld [vmem:[#allocation35_spill] sm:$0xff] }
 0x66d   :  { %5312 = vmatprep.subr.bf16.mxu0 %v8876_v3  ;;  %5344 = vmatprep.subr.bf16.mxu1 %v8877_v52 }
 0x670   :  { %5314 = vmatpush1.bf16.msra.mxu0 %v8878_v51  ;;  %5346 = vmatpush1.bf16.msra.mxu1 %v8879_v29 }
 0x671   :  { %5316 = vmatprep.subr.bf16.mxu0 %v8880_v44  ;;  %5348 = vmatprep.subr.bf16.mxu1 %v8881_v21 }
 0x674   :  { %5318 = vmatpush1.bf16.msra.mxu0 %v8882_v11  ;;  %5350 = vmatpush1.bf16.msra.mxu1 %v8883_v25 }
 0x675   :  { %5352 = vmatprep.subr.bf16.mxu0 %v8884_v19  ;;  %5384 = vmatprep.subr.bf16.mxu1 %v8885_v15 }
 0x72a   :  { %v2051_v26 = vpop.f32.mrb[6].mxu0  ;;  %v2122_v3 = vpop.f32.mrb[6].mxu1 }
 0x72b   :  { %v6165_v52 = vadd.f32 %v2051_v26, %v8886_v6  ;;  %v2053_v28 = vpop.f32.mrb[7].mxu0  ;;  %v2124_v51 = vpop.f32.mrb[7].mxu1  ;;  %v6181_v44 = vadd.f32 %v2122_v3, %v8758_v48  ;;  %v8887_v6 = vld [vmem:[#allocation33_spill] sm:$0xff]  ;;  %v8899_v3 = vld [vmem:[#allocation46_spill] sm:$0xff] }
 0x72c   :  { %v6166_v29 = vadd.f32 %v2053_v28, %v8757_v34  ;;  %v6182_v11 = vadd.f32 %v2124_v51, %v8823_v61 }
 0x72d   :  { %6340 = vtanh.f32 %v6165_v52 }
 0x72e   :  { %6342 = vtanh.f32 %v6166_v29 }
 0x72f   :  { %6344 = vtanh.f32 %v6181_v44 }
 0x730   :  { %6346 = vtanh.f32 %v6182_v11  ;;  %v8890_v11 = vld [vmem:[#allocation37_spill] sm:$0xff] }
 0x737   :  { %v6341_v25 = vpop.eup %6340 }
 0x738   :  { %v2135_v21 = vmul.f32 0.5, %v6341_v25  ;;  %v6343_v19 = vpop.eup %6342  ;;  %v8896_v25 = vld [vmem:[#allocation43_spill] sm:$0xff] }
 0x739   :  { %v2136_v15 = vmul.f32 0.5, %v6343_v19  ;;  %v6345_v1 = vpop.eup %6344  ;;  %v8897_v19 = vld [vmem:[#allocation44_spill] sm:$0xff] }
 0x73a   :  { %v2139_v37 = vadd.f32 0.5, %v2135_v21  ;;  %v6347_v52 = vpop.eup %6346  ;;  %v8889_v21 = vld [vmem:[#allocation36_spill] sm:$0xff] }
 0x73b   :  { %v2140_v30 = vadd.f32 0.5, %v2136_v15  ;;  %v2138_v28 = vmul.f32 0.5, %v6347_v52  ;;  %v8898_v15 = vld [vmem:[#allocation45_spill] sm:$0xff]  ;;  %v8901_v52 = vld [vmem:[#allocation48_spill] sm:$0xff] }
 0x73c   :  { %v2148_v26 = vmul.f32 %v6345_v1, %v2139_v37  ;;  %v8891_v1 = vld [vmem:[#allocation38_spill] sm:$0xff]  ;;  %v8894_v37 = vld [vmem:[#allocation41_spill] sm:$0xff] }
 0x73d   :  { %v2147_v22 = vmul.f32 %v2140_v30, %v8887_v6  ;;  %v2142_v29 = vadd.f32 0.5, %v2138_v28  ;;  %v8893_v30 = vld [vmem:[#allocation40_spill] sm:$0xff]  ;;  %v8895_v6 = vld [vmem:[#allocation42_spill] sm:$0xff]  ;;  %v8902_v28 = vld [vmem:[#allocation49_spill] sm:$0xff] }
 0x73f   :  { %v7876_v59 = vadd.f32 %v2148_v26, %v2147_v22  ;;  %v8892_v22 = vld [vmem:[#allocation39_spill] sm:$0xff] }
 0x740   :  { %v8900_v26 = vld [vmem:[#allocation47_spill] sm:$0xff] }
 0x741   :  { %8888 = vst [vmem:[#allocation32_spill] sm:$0xff] %v7876_v59  ;;  %6348 = vtanh.f32 %v7876_v59 }
 0x74b   :  { %v6349_v44 = vpop.eup %6348 }
 0x74c   :  { %v7879_v51 = vmul.f32 %v6349_v44, %v2142_v29  ;;  %v8903_v29 = vld [vmem:[#allocation50_spill] sm:$0xff]  ;;  %v8904_v44 = vld [vmem:[#allocation51_spill] sm:$0xff] }
 0x74e   :  { %2217 = vmatmul.mubr.f32.vlgmr.msra.gmra.mrb[22].mxu0 %v7879_v51  ;;  %2288 = vmatmul.mubr.f32.vlgmr.msra.gmra.mrb[22].mxu1 %v7879_v51 }
 0x74f   :  { %5354 = vmatpush1.bf16.msra.mxu0 %v8889_v21  ;;  %5386 = vmatpush1.bf16.msra.mxu1 %v8890_v11 }
 0x750   :  { %5356 = vmatprep.subr.bf16.mxu0 %v8891_v1  ;;  %5388 = vmatprep.subr.bf16.mxu1 %v8892_v22 }
 0x751   :  { %2380 = vmatprep.mubr.f32.mxu0 %v8694_v12  ;;  %2451 = vmatprep.mubr.f32.mxu1 %v8694_v12 }
 0x753   :  { %5358 = vmatpush1.bf16.msra.mxu0 %v8893_v30  ;;  %5390 = vmatpush1.bf16.msra.mxu1 %v8894_v37  ;;  %v8905_v37 = vld [vmem:[#allocation52_spill] sm:$0xff]  ;;  %v8921_v30 = vld [vmem:[#allocation66_spill] sm:$0xff] }
 0x754   :  { %5360 = vmatprep.subr.bf16.mxu0 %v8895_v6  ;;  %5392 = vmatprep.subr.bf16.mxu1 %v8896_v25  ;;  %v8906_v6 = vld [vmem:[#allocation53_spill] sm:$0xff]  ;;  %v8907_v25 = vld [vmem:[#allocation54_spill] sm:$0xff] }
 0x757   :  { %5362 = vmatpush1.bf16.msra.mxu0 %v8897_v19  ;;  %5394 = vmatpush1.bf16.msra.mxu1 %v8898_v15  ;;  %v8908_v19 = vld [vmem:[#allocation55_spill] sm:$0xff]  ;;  %v8909_v15 = vld [vmem:[#allocation56_spill] sm:$0xff] }
 0x758   :  { %5364 = vmatprep.subr.bf16.mxu0 %v8899_v3  ;;  %5396 = vmatprep.subr.bf16.mxu1 %v8900_v26  ;;  %v8910_v3 = vld [vmem:[#allocation57_spill] sm:$0xff]  ;;  %v8911_v26 = vld [vmem:[#allocation58_spill] sm:$0xff] }
 0x75b   :  { %5366 = vmatpush1.bf16.msra.mxu0 %v8901_v52  ;;  %5398 = vmatpush1.bf16.msra.mxu1 %v8902_v28  ;;  %v8912_v52 = vld [vmem:[#allocation59_spill] sm:$0xff]  ;;  %v8913_v28 = vld [vmem:[#allocation60_spill] sm:$0xff] }
 0x75c   :  { %5368 = vmatprep.subr.bf16.mxu0 %v8903_v29  ;;  %5400 = vmatprep.subr.bf16.mxu1 %v8904_v44  ;;  %v8914_v29 = vld [vmem:[#allocation61_spill] sm:$0xff]  ;;  %v8915_v44 = vld [vmem:[#allocation62_spill] sm:$0xff] }
 0x75f   :  { %5370 = vmatpush1.bf16.msra.mxu0 %v8905_v37  ;;  %5402 = vmatpush1.bf16.msra.mxu1 %v8906_v6  ;;  %v8916_v37 = vld [vmem:[#allocation63_spill] sm:$0xff]  ;;  %v8917_v6 = vld [vmem:[#allocation64_spill] sm:$0xff] }
 0x760   :  { %5372 = vmatprep.subr.bf16.mxu0 %v8907_v25  ;;  %5404 = vmatprep.subr.bf16.mxu1 %v8908_v19  ;;  %v8918_v25 = vld [vmem:[#allocation65_spill] sm:$0xff]  ;;  %v8919_v19 = vld [vmem:[#allocation3_spill] sm:$0xff] }
 0x763   :  { %5374 = vmatpush1.bf16.msra.mxu0 %v8909_v15  ;;  %5406 = vmatpush1.bf16.msra.mxu1 %v8910_v3  ;;  %v8920_v15 = vld [vmem:[#allocation4_spill] sm:$0xff] }
 0x764   :  { %5376 = vmatprep.subr.bf16.mxu0 %v8911_v26  ;;  %5408 = vmatprep.subr.bf16.mxu1 %v8912_v52 }
 0x767   :  { %5378 = vmatpush1.bf16.msra.mxu0 %v8913_v28  ;;  %5410 = vmatpush1.bf16.msra.mxu1 %v8914_v29 }
 0x768   :  { %5380 = vmatprep.subr.bf16.mxu0 %v8915_v44  ;;  %5412 = vmatprep.subr.bf16.mxu1 %v8916_v37 }
 0x76b   :  { %5382 = vmatpush1.bf16.msra.mxu0 %v8917_v6  ;;  %5414 = vmatpush1.bf16.msra.mxu1 %v8918_v25 }
 0x76c   :  { %5416 = vmatprep.subr.bf16.mxu0 %v8919_v19  ;;  %5448 = vmatprep.subr.bf16.mxu1 %v8920_v15 }
 0x821   :  { %v2218_v3 = vpop.f32.mrb[22].mxu0  ;;  %v2289_v26 = vpop.f32.mrb[22].mxu1 }
 0x822   :  { %v6199_v52 = vadd.f32 %v2218_v3, %v8921_v30  ;;  %v2220_v22 = vpop.f32.mrb[23].mxu0  ;;  %v2291_v28 = vpop.f32.mrb[23].mxu1  ;;  %v6201_v44 = vadd.f32 %v2289_v26, %v7528_v43 }
 0x823   :  { %v6200_v29 = vadd.f32 %v2220_v22, %v8795_v41  ;;  %v6202_v6 = vadd.f32 %v2291_v28, %v7535_v2 }
 0x824   :  { %6350 = vtanh.f32 %v6199_v52 }
 0x825   :  { %6352 = vtanh.f32 %v6200_v29 }
 0x826   :  { %6354 = vtanh.f32 %v6201_v44  ;;  %v8934_v44 = vld [vmem:[#allocation16_spill] sm:$0xff] }
 0x827   :  { %6356 = vtanh.f32 %v6202_v6  ;;  %v8930_v6 = vld [vmem:[#allocation12_spill] sm:$0xff] }
 0x82e   :  { %v6351_v25 = vpop.eup %6350 }
 0x82f   :  { %v2298_v37 = vmul.f32 0.5, %v6351_v25  ;;  %v6353_v19 = vpop.eup %6352  ;;  %v8931_v25 = vld [vmem:[#allocation13_spill] sm:$0xff] }
 0x830   :  { %v2299_v15 = vmul.f32 0.5, %v6353_v19  ;;  %v6355_v11 = vpop.eup %6354  ;;  %v8932_v19 = vld [vmem:[#allocation14_spill] sm:$0xff] }
 0x831   :  { %v2302_v1 = vadd.f32 0.5, %v2298_v37  ;;  %v6357_v22 = vpop.eup %6356  ;;  %v8929_v37 = vld [vmem:[#allocation11_spill] sm:$0xff] }
 0x832   :  { %v2303_v21 = vadd.f32 0.5, %v2299_v15  ;;  %v2301_v26 = vmul.f32 0.5, %v6357_v22  ;;  %v8933_v15 = vld [vmem:[#allocation15_spill] sm:$0xff]  ;;  %v8936_v22 = vld [vmem:[#allocation18_spill] sm:$0xff] }
 0x833   :  { %v2311_v3 = vmul.f32 %v6355_v11, %v2302_v1  ;;  %v8926_v11 = vld [vmem:[#allocation8_spill] sm:$0xff]  ;;  %v8927_v1 = vld [vmem:[#allocation9_spill] sm:$0xff] }
 0x834   :  { %v2310_v30 = vmul.f32 %v2303_v21, %v7794_v8  ;;  %v2305_v52 = vadd.f32 0.5, %v2301_v26  ;;  %v8923_v8 = vld [vmem:[#allocation5_spill] sm:$0xff]  ;;  %v8924_v21 = vld [vmem:[#allocation6_spill] sm:$0xff]  ;;  %v8937_v26 = vld [vmem:[#allocation19_spill] sm:$0xff] }
 0x836   :  { %v7922_v59 = vadd.f32 %v2311_v3, %v2310_v30  ;;  %v8928_v30 = vld [vmem:[#allocation10_spill] sm:$0xff]  ;;  %v8935_v3 = vld [vmem:[#allocation17_spill] sm:$0xff] }
 0x838   :  { %6358 = vtanh.f32 %v7922_v59 }
 0x842   :  { %v6359_v29 = vpop.eup %6358 }
 0x843   :  { %v7925_v28 = vmul.f32 %v6359_v29, %v2305_v52  ;;  %v8938_v52 = vld [vmem:[#allocation20_spill] sm:$0xff]  ;;  %v8939_v29 = vld [vmem:[#allocation21_spill] sm:$0xff] }
 0x845   :  { %8922 = vst [vmem:[#allocation30_spill] sm:$0xff] %v7925_v28  ;;  %2381 = vmatmul.mubr.f32.vlgmr.msra.gmra.mrb[24].mxu0 %v7925_v28  ;;  %2452 = vmatmul.mubr.f32.vlgmr.msra.gmra.mrb[24].mxu1 %v7925_v28  ;;  %v8940_v28 = vld [vmem:[#allocation22_spill] sm:$0xff] }
 0x846   :  { %5418 = vmatpush1.bf16.msra.mxu0 %v6579_v35  ;;  %5450 = vmatpush1.bf16.msra.mxu1 %v6588_v38 }
 0x847   :  { %5420 = vmatprep.subr.bf16.mxu0 %v6600_v42  ;;  %5452 = vmatprep.subr.bf16.mxu1 %v6615_v47 }
 0x848   :  { %2522 = vmatprep.mubr.f32.mxu0 %v8694_v12  ;;  %2593 = vmatprep.mubr.f32.mxu1 %v8694_v12 }
 0x84a   :  { %5422 = vmatpush1.bf16.msra.mxu0 %v6625_v50  ;;  %5454 = vmatpush1.bf16.msra.mxu1 %v6638_v54 }
 0x84b   :  { %5424 = vmatprep.subr.bf16.mxu0 %v6648_v57  ;;  %5456 = vmatprep.subr.bf16.mxu1 %v6658_v60 }
 0x84e   :  { %5426 = vmatpush1.bf16.msra.mxu0 %v6671_v0  ;;  %5458 = vmatpush1.bf16.msra.mxu1 %v6681_v4 }
 0x84f   :  { %5428 = vmatprep.subr.bf16.mxu0 %v6691_v7  ;;  %5460 = vmatprep.subr.bf16.mxu1 %v6701_v10 }
 0x852   :  { %5430 = vmatpush1.bf16.msra.mxu0 %v6714_v14  ;;  %5462 = vmatpush1.bf16.msra.mxu1 %v6724_v17 }
 0x853   :  { %5432 = vmatprep.subr.bf16.mxu0 %v6734_v20  ;;  %5464 = vmatprep.subr.bf16.mxu1 %v6744_v23 }
 0x856   :  { %5434 = vmatpush1.bf16.msra.mxu0 %v6757_v27  ;;  %5466 = vmatpush1.bf16.msra.mxu1 %v6767_v32 }
 0x857   :  { %5436 = vmatprep.subr.bf16.mxu0 %v6777_v36  ;;  %5468 = vmatprep.subr.bf16.mxu1 %v6787_v40 }
 0x85a   :  { %5438 = vmatpush1.bf16.msra.mxu0 %v6800_v45  ;;  %5470 = vmatpush1.bf16.msra.mxu1 %v6810_v49 }
 0x85b   :  { %5440 = vmatprep.subr.bf16.mxu0 %v6820_v53  ;;  %5472 = vmatprep.subr.bf16.mxu1 %v6830_v58 }
 0x85e   :  { %5442 = vmatpush1.bf16.msra.mxu0 %v6843_v63  ;;  %5474 = vmatpush1.bf16.msra.mxu1 %v6853_v5 }
 0x85f   :  { %5444 = vmatprep.subr.bf16.mxu0 %v6863_v9  ;;  %5476 = vmatprep.subr.bf16.mxu1 %v6873_v13 }
 0x862   :  { %5446 = vmatpush1.bf16.msra.mxu0 %v6880_v16  ;;  %5478 = vmatpush1.bf16.msra.mxu1 %v6884_v18 }
 0x863   :  { %5480 = vmatprep.subr.bf16.mxu0 %v6908_v24  ;;  %5512 = vmatprep.subr.bf16.mxu1 %v6919_v31 }
 0x865   :  { %2523 = vmatmul.mubr.f32.vlgmr.msra.gmra.mrb[8].mxu0 %v7879_v51  ;;  %2594 = vmatmul.mubr.f32.vlgmr.msra.gmra.mrb[8].mxu1 %v7879_v51  ;;  %v8925_v51 = vld [vmem:[#allocation7_spill] sm:$0xff] }
 0x866   :  { %5482 = vmatpush1.bf16.msra.mxu0 %v6921_v33  ;;  %5514 = vmatpush1.bf16.msra.mxu1 %v6930_v39 }
 0x867   :  { %5484 = vmatprep.subr.bf16.mxu0 %v6944_v46  ;;  %5516 = vmatprep.subr.bf16.mxu1 %v6955_v55 }
 0x868   :  { %2689 = vmatprep.mubr.f32.mxu0 %v8694_v12  ;;  %2760 = vmatprep.mubr.f32.mxu1 %v8694_v12 }
 0x86a   :  { %5486 = vmatpush1.bf16.msra.mxu0 %v6957_v56  ;;  %5518 = vmatpush1.bf16.msra.mxu1 %v6966_v62 }
 0x86b   :  { %5488 = vmatprep.subr.bf16.mxu0 %v8923_v8  ;;  %5520 = vmatprep.subr.bf16.mxu1 %v8924_v21 }
 0x86e   :  { %5490 = vmatpush1.bf16.msra.mxu0 %v8925_v51  ;;  %5522 = vmatpush1.bf16.msra.mxu1 %v8926_v11 }
 0x86f   :  { %5492 = vmatprep.subr.bf16.mxu0 %v8927_v1  ;;  %5524 = vmatprep.subr.bf16.mxu1 %v8928_v30 }
 0x872   :  { %5494 = vmatpush1.bf16.msra.mxu0 %v8929_v37  ;;  %5526 = vmatpush1.bf16.msra.mxu1 %v8930_v6  ;;  %v8941_v6 = vld [vmem:[#allocation23_spill] sm:$0xff]  ;;  %v8949_v37 = vld [vmem:[#allocation29_spill] sm:$0xff] }
 0x873   :  { %5496 = vmatprep.subr.bf16.mxu0 %v8931_v25  ;;  %5528 = vmatprep.subr.bf16.mxu1 %v8932_v19  ;;  %v8942_v25 = vld [vmem:[#allocation24_spill] sm:$0xff]  ;;  %v8943_v19 = vld [vmem:[#allocation25_spill] sm:$0xff] }
 0x876   :  { %5498 = vmatpush1.bf16.msra.mxu0 %v8933_v15  ;;  %5530 = vmatpush1.bf16.msra.mxu1 %v8934_v44  ;;  %v8944_v15 = vld [vmem:[#allocation26_spill] sm:$0xff]  ;;  %v8945_v44 = vld [vmem:[#allocation27_spill] sm:$0xff] }
 0x877   :  { %5500 = vmatprep.subr.bf16.mxu0 %v8935_v3  ;;  %5532 = vmatprep.subr.bf16.mxu1 %v8936_v22  ;;  %v8946_v3 = vld [vmem:[#allocation28_spill] sm:$0xff]  ;;  %v8947_v22 = vld [vmem:[#allocation34_spill] sm:$0xff] }
 0x87a   :  { %5502 = vmatpush1.bf16.msra.mxu0 %v8937_v26  ;;  %5534 = vmatpush1.bf16.msra.mxu1 %v8938_v52  ;;  %v8948_v26 = vld [vmem:[#allocation35_spill] sm:$0xff] }
 0x87b   :  { %5504 = vmatprep.subr.bf16.mxu0 %v8939_v29  ;;  %5536 = vmatprep.subr.bf16.mxu1 %v8940_v28 }
 0x87e   :  { %5506 = vmatpush1.bf16.msra.mxu0 %v8941_v6  ;;  %5538 = vmatpush1.bf16.msra.mxu1 %v8942_v25 }
 0x87f   :  { %5508 = vmatprep.subr.bf16.mxu0 %v8943_v19  ;;  %5540 = vmatprep.subr.bf16.mxu1 %v8944_v15 }
 0x882   :  { %5510 = vmatpush1.bf16.msra.mxu0 %v8945_v44  ;;  %5542 = vmatpush1.bf16.msra.mxu1 %v8946_v3 }
 0x883   :  { %5544 = vmatprep.subr.bf16.mxu0 %v8947_v22  ;;  %5576 = vmatprep.subr.bf16.mxu1 %v8948_v26 }
 0x938   :  { %v2524_v52 = vpop.f32.mrb[8].mxu0  ;;  %v2595_v29 = vpop.f32.mrb[8].mxu1 }
 0x939   :  { %v6167_v28 = vadd.f32 %v2524_v52, %v8949_v37  ;;  %v2526_v30 = vpop.f32.mrb[9].mxu0  ;;  %v2597_v6 = vpop.f32.mrb[9].mxu1  ;;  %v6183_v19 = vadd.f32 %v2595_v29, %v8758_v48  ;;  %v8950_v37 = vld [vmem:[#allocation32_spill] sm:$0xff]  ;;  %v8962_v29 = vld [vmem:[#allocation46_spill] sm:$0xff] }
 0x93a   :  { %v6168_v25 = vadd.f32 %v2526_v30, %v8757_v34  ;;  %v6184_v44 = vadd.f32 %v2597_v6, %v8823_v61 }
 0x93b   :  { %6360 = vtanh.f32 %v6167_v28 }
 0x93c   :  { %6362 = vtanh.f32 %v6168_v25 }
 0x93d   :  { %6364 = vtanh.f32 %v6183_v19 }
 0x93e   :  { %6366 = vtanh.f32 %v6184_v44  ;;  %v8953_v44 = vld [vmem:[#allocation37_spill] sm:$0xff] }
 0x945   :  { %v6361_v3 = vpop.eup %6360 }
 0x946   :  { %v2608_v15 = vmul.f32 0.5, %v6361_v3  ;;  %v6363_v22 = vpop.eup %6362  ;;  %v8959_v3 = vld [vmem:[#allocation43_spill] sm:$0xff] }
 0x947   :  { %v2609_v26 = vmul.f32 0.5, %v6363_v22  ;;  %v6365_v11 = vpop.eup %6364  ;;  %v8960_v22 = vld [vmem:[#allocation44_spill] sm:$0xff] }
 0x948   :  { %v2612_v1 = vadd.f32 0.5, %v2608_v15  ;;  %v6367_v28 = vpop.eup %6366  ;;  %v8952_v15 = vld [vmem:[#allocation36_spill] sm:$0xff] }
 0x949   :  { %v2613_v51 = vadd.f32 0.5, %v2609_v26  ;;  %v2611_v30 = vmul.f32 0.5, %v6367_v28  ;;  %v8961_v26 = vld [vmem:[#allocation45_spill] sm:$0xff]  ;;  %v8964_v28 = vld [vmem:[#allocation48_spill] sm:$0xff] }
 0x94a   :  { %v2621_v52 = vmul.f32 %v6365_v11, %v2612_v1  ;;  %v8954_v11 = vld [vmem:[#allocation38_spill] sm:$0xff]  ;;  %v8957_v1 = vld [vmem:[#allocation41_spill] sm:$0xff] }
 0x94b   :  { %v2620_v21 = vmul.f32 %v2613_v51, %v8950_v37  ;;  %v2615_v25 = vadd.f32 0.5, %v2611_v30  ;;  %v8956_v51 = vld [vmem:[#allocation40_spill] sm:$0xff]  ;;  %v8958_v37 = vld [vmem:[#allocation42_spill] sm:$0xff]  ;;  %v8965_v30 = vld [vmem:[#allocation49_spill] sm:$0xff] }
 0x94d   :  { %v8004_v8 = vadd.f32 %v2621_v52, %v2620_v21  ;;  %v8955_v21 = vld [vmem:[#allocation39_spill] sm:$0xff] }
 0x94e   :  { %v8963_v52 = vld [vmem:[#allocation47_spill] sm:$0xff] }
 0x94f   :  { %8951 = vst [vmem:[#allocation33_spill] sm:$0xff] %v8004_v8  ;;  %6368 = vtanh.f32 %v8004_v8 }
 0x959   :  { %v6369_v19 = vpop.eup %6368 }
 0x95a   :  { %v8007_v6 = vmul.f32 %v6369_v19, %v2615_v25  ;;  %v8966_v25 = vld [vmem:[#allocation50_spill] sm:$0xff]  ;;  %v8967_v19 = vld [vmem:[#allocation51_spill] sm:$0xff] }
 0x95c   :  { %2690 = vmatmul.mubr.f32.vlgmr.msra.gmra.mrb[24].mxu0 %v8007_v6  ;;  %2761 = vmatmul.mubr.f32.vlgmr.msra.gmra.mrb[24].mxu1 %v8007_v6 }
 0x95d   :  { %5546 = vmatpush1.bf16.msra.mxu0 %v8952_v15  ;;  %5578 = vmatpush1.bf16.msra.mxu1 %v8953_v44 }
 0x95e   :  { %5548 = vmatprep.subr.bf16.mxu0 %v8954_v11  ;;  %5580 = vmatprep.subr.bf16.mxu1 %v8955_v21 }
 0x95f   :  { %2853 = vmatprep.mubr.f32.mxu0 %v8694_v12  ;;  %2924 = vmatprep.mubr.f32.mxu1 %v8694_v12 }
 0x961   :  { %5550 = vmatpush1.bf16.msra.mxu0 %v8956_v51  ;;  %5582 = vmatpush1.bf16.msra.mxu1 %v8957_v1  ;;  %v8968_v1 = vld [vmem:[#allocation52_spill] sm:$0xff]  ;;  %v8984_v51 = vld [vmem:[#allocation66_spill] sm:$0xff] }
 0x962   :  { %5552 = vmatprep.subr.bf16.mxu0 %v8958_v37  ;;  %5584 = vmatprep.subr.bf16.mxu1 %v8959_v3  ;;  %v8969_v37 = vld [vmem:[#allocation53_spill] sm:$0xff]  ;;  %v8970_v3 = vld [vmem:[#allocation54_spill] sm:$0xff] }
 0x965   :  { %5554 = vmatpush1.bf16.msra.mxu0 %v8960_v22  ;;  %5586 = vmatpush1.bf16.msra.mxu1 %v8961_v26  ;;  %v8971_v22 = vld [vmem:[#allocation55_spill] sm:$0xff]  ;;  %v8972_v26 = vld [vmem:[#allocation56_spill] sm:$0xff] }
 0x966   :  { %5556 = vmatprep.subr.bf16.mxu0 %v8962_v29  ;;  %5588 = vmatprep.subr.bf16.mxu1 %v8963_v52  ;;  %v8973_v29 = vld [vmem:[#allocation57_spill] sm:$0xff]  ;;  %v8974_v52 = vld [vmem:[#allocation58_spill] sm:$0xff] }
 0x969   :  { %5558 = vmatpush1.bf16.msra.mxu0 %v8964_v28  ;;  %5590 = vmatpush1.bf16.msra.mxu1 %v8965_v30  ;;  %v8975_v28 = vld [vmem:[#allocation59_spill] sm:$0xff]  ;;  %v8976_v30 = vld [vmem:[#allocation60_spill] sm:$0xff] }
 0x96a   :  { %5560 = vmatprep.subr.bf16.mxu0 %v8966_v25  ;;  %5592 = vmatprep.subr.bf16.mxu1 %v8967_v19  ;;  %v8977_v25 = vld [vmem:[#allocation61_spill] sm:$0xff]  ;;  %v8978_v19 = vld [vmem:[#allocation62_spill] sm:$0xff] }
 0x96d   :  { %5562 = vmatpush1.bf16.msra.mxu0 %v8968_v1  ;;  %5594 = vmatpush1.bf16.msra.mxu1 %v8969_v37  ;;  %v8979_v1 = vld [vmem:[#allocation63_spill] sm:$0xff]  ;;  %v8980_v37 = vld [vmem:[#allocation64_spill] sm:$0xff] }
 0x96e   :  { %5564 = vmatprep.subr.bf16.mxu0 %v8970_v3  ;;  %5596 = vmatprep.subr.bf16.mxu1 %v8971_v22  ;;  %v8981_v3 = vld [vmem:[#allocation65_spill] sm:$0xff]  ;;  %v8982_v22 = vld [vmem:[#allocation3_spill] sm:$0xff] }
 0x971   :  { %5566 = vmatpush1.bf16.msra.mxu0 %v8972_v26  ;;  %5598 = vmatpush1.bf16.msra.mxu1 %v8973_v29  ;;  %v8983_v26 = vld [vmem:[#allocation4_spill] sm:$0xff] }
 0x972   :  { %5568 = vmatprep.subr.bf16.mxu0 %v8974_v52  ;;  %5600 = vmatprep.subr.bf16.mxu1 %v8975_v28 }
 0x975   :  { %5570 = vmatpush1.bf16.msra.mxu0 %v8976_v30  ;;  %5602 = vmatpush1.bf16.msra.mxu1 %v8977_v25 }
 0x976   :  { %5572 = vmatprep.subr.bf16.mxu0 %v8978_v19  ;;  %5604 = vmatprep.subr.bf16.mxu1 %v8979_v1 }
 0x979   :  { %5574 = vmatpush1.bf16.msra.mxu0 %v8980_v37  ;;  %5606 = vmatpush1.bf16.msra.mxu1 %v8981_v3 }
 0x97a   :  { %5608 = vmatprep.subr.bf16.mxu0 %v8982_v22  ;;  %5640 = vmatprep.subr.bf16.mxu1 %v8983_v26 }
 0xa2f   :  { %v2691_v29 = vpop.f32.mrb[24].mxu0  ;;  %v2762_v52 = vpop.f32.mrb[24].mxu1 }
 0xa30   :  { %v6203_v28 = vadd.f32 %v2691_v29, %v8984_v51  ;;  %v2693_v21 = vpop.f32.mrb[25].mxu0  ;;  %v2764_v30 = vpop.f32.mrb[25].mxu1  ;;  %v6205_v19 = vadd.f32 %v2762_v52, %v7528_v43 }
 0xa31   :  { %v6204_v25 = vadd.f32 %v2693_v21, %v8795_v41  ;;  %v6206_v37 = vadd.f32 %v2764_v30, %v7535_v2 }
 0xa32   :  { %6370 = vtanh.f32 %v6203_v28 }
 0xa33   :  { %6372 = vtanh.f32 %v6204_v25 }
 0xa34   :  { %6374 = vtanh.f32 %v6205_v19  ;;  %v8997_v19 = vld [vmem:[#allocation16_spill] sm:$0xff] }
 0xa35   :  { %6376 = vtanh.f32 %v6206_v37  ;;  %v8993_v37 = vld [vmem:[#allocation12_spill] sm:$0xff] }
 0xa3c   :  { %v6371_v3 = vpop.eup %6370 }
 0xa3d   :  { %v2771_v1 = vmul.f32 0.5, %v6371_v3  ;;  %v6373_v22 = vpop.eup %6372  ;;  %v8994_v3 = vld [vmem:[#allocation13_spill] sm:$0xff] }
 0xa3e   :  { %v2772_v26 = vmul.f32 0.5, %v6373_v22  ;;  %v6375_v44 = vpop.eup %6374  ;;  %v8995_v22 = vld [vmem:[#allocation14_spill] sm:$0xff] }
 0xa3f   :  { %v2775_v11 = vadd.f32 0.5, %v2771_v1  ;;  %v6377_v21 = vpop.eup %6376  ;;  %v8992_v1 = vld [vmem:[#allocation11_spill] sm:$0xff] }
 0xa40   :  { %v2776_v15 = vadd.f32 0.5, %v2772_v26  ;;  %v2774_v52 = vmul.f32 0.5, %v6377_v21  ;;  %v8996_v26 = vld [vmem:[#allocation15_spill] sm:$0xff]  ;;  %v8999_v21 = vld [vmem:[#allocation18_spill] sm:$0xff] }
 0xa41   :  { %v2784_v29 = vmul.f32 %v6375_v44, %v2775_v11  ;;  %v8989_v44 = vld [vmem:[#allocation8_spill] sm:$0xff]  ;;  %v8990_v11 = vld [vmem:[#allocation9_spill] sm:$0xff] }
 0xa42   :  { %v2783_v51 = vmul.f32 %v2776_v15, %v7922_v59  ;;  %v2778_v28 = vadd.f32 0.5, %v2774_v52  ;;  %v8986_v59 = vld [vmem:[#allocation5_spill] sm:$0xff]  ;;  %v8987_v15 = vld [vmem:[#allocation6_spill] sm:$0xff]  ;;  %v9000_v52 = vld [vmem:[#allocation19_spill] sm:$0xff] }
 0xa44   :  { %v8050_v8 = vadd.f32 %v2784_v29, %v2783_v51  ;;  %v8991_v51 = vld [vmem:[#allocation10_spill] sm:$0xff]  ;;  %v8998_v29 = vld [vmem:[#allocation17_spill] sm:$0xff] }
 0xa46   :  { %6378 = vtanh.f32 %v8050_v8 }
 0xa50   :  { %v6379_v25 = vpop.eup %6378 }
 0xa51   :  { %v8053_v30 = vmul.f32 %v6379_v25, %v2778_v28  ;;  %v9001_v28 = vld [vmem:[#allocation20_spill] sm:$0xff]  ;;  %v9002_v25 = vld [vmem:[#allocation21_spill] sm:$0xff] }
 0xa53   :  { %8985 = vst [vmem:[#allocation32_spill] sm:$0xff] %v8053_v30  ;;  %2854 = vmatmul.mubr.f32.vlgmr.msra.gmra.mrb[26].mxu0 %v8053_v30  ;;  %2925 = vmatmul.mubr.f32.vlgmr.msra.gmra.mrb[26].mxu1 %v8053_v30  ;;  %v9003_v30 = vld [vmem:[#allocation22_spill] sm:$0xff] }
 0xa54   :  { %5610 = vmatpush1.bf16.msra.mxu0 %v6579_v35  ;;  %5642 = vmatpush1.bf16.msra.mxu1 %v6588_v38 }
 0xa55   :  { %5612 = vmatprep.subr.bf16.mxu0 %v6600_v42  ;;  %5644 = vmatprep.subr.bf16.mxu1 %v6615_v47 }
 0xa56   :  { %2995 = vmatprep.mubr.f32.mxu0 %v8694_v12  ;;  %3066 = vmatprep.mubr.f32.mxu1 %v8694_v12 }
 0xa58   :  { %5614 = vmatpush1.bf16.msra.mxu0 %v6625_v50  ;;  %5646 = vmatpush1.bf16.msra.mxu1 %v6638_v54 }
 0xa59   :  { %5616 = vmatprep.subr.bf16.mxu0 %v6648_v57  ;;  %5648 = vmatprep.subr.bf16.mxu1 %v6658_v60 }
 0xa5c   :  { %5618 = vmatpush1.bf16.msra.mxu0 %v6671_v0  ;;  %5650 = vmatpush1.bf16.msra.mxu1 %v6681_v4 }
 0xa5d   :  { %5620 = vmatprep.subr.bf16.mxu0 %v6691_v7  ;;  %5652 = vmatprep.subr.bf16.mxu1 %v6701_v10 }
 0xa60   :  { %5622 = vmatpush1.bf16.msra.mxu0 %v6714_v14  ;;  %5654 = vmatpush1.bf16.msra.mxu1 %v6724_v17 }
 0xa61   :  { %5624 = vmatprep.subr.bf16.mxu0 %v6734_v20  ;;  %5656 = vmatprep.subr.bf16.mxu1 %v6744_v23 }
 0xa64   :  { %5626 = vmatpush1.bf16.msra.mxu0 %v6757_v27  ;;  %5658 = vmatpush1.bf16.msra.mxu1 %v6767_v32 }
 0xa65   :  { %5628 = vmatprep.subr.bf16.mxu0 %v6777_v36  ;;  %5660 = vmatprep.subr.bf16.mxu1 %v6787_v40 }
 0xa68   :  { %5630 = vmatpush1.bf16.msra.mxu0 %v6800_v45  ;;  %5662 = vmatpush1.bf16.msra.mxu1 %v6810_v49 }
 0xa69   :  { %5632 = vmatprep.subr.bf16.mxu0 %v6820_v53  ;;  %5664 = vmatprep.subr.bf16.mxu1 %v6830_v58 }
 0xa6c   :  { %5634 = vmatpush1.bf16.msra.mxu0 %v6843_v63  ;;  %5666 = vmatpush1.bf16.msra.mxu1 %v6853_v5 }
 0xa6d   :  { %5636 = vmatprep.subr.bf16.mxu0 %v6863_v9  ;;  %5668 = vmatprep.subr.bf16.mxu1 %v6873_v13 }
 0xa70   :  { %5638 = vmatpush1.bf16.msra.mxu0 %v6880_v16  ;;  %5670 = vmatpush1.bf16.msra.mxu1 %v6884_v18 }
 0xa71   :  { %5672 = vmatprep.subr.bf16.mxu0 %v6908_v24  ;;  %5704 = vmatprep.subr.bf16.mxu1 %v6919_v31 }
 0xa73   :  { %2996 = vmatmul.mubr.f32.vlgmr.msra.gmra.mrb[10].mxu0 %v8007_v6  ;;  %3067 = vmatmul.mubr.f32.vlgmr.msra.gmra.mrb[10].mxu1 %v8007_v6  ;;  %v8988_v6 = vld [vmem:[#allocation7_spill] sm:$0xff] }
 0xa74   :  { %5674 = vmatpush1.bf16.msra.mxu0 %v6921_v33  ;;  %5706 = vmatpush1.bf16.msra.mxu1 %v6930_v39 }
 0xa75   :  { %5676 = vmatprep.subr.bf16.mxu0 %v6944_v46  ;;  %5708 = vmatprep.subr.bf16.mxu1 %v6955_v55 }
 0xa76   :  { %3162 = vmatprep.mubr.f32.mxu0 %v8694_v12  ;;  %3233 = vmatprep.mubr.f32.mxu1 %v8694_v12 }
 0xa78   :  { %5678 = vmatpush1.bf16.msra.mxu0 %v6957_v56  ;;  %5710 = vmatpush1.bf16.msra.mxu1 %v6966_v62 }
 0xa79   :  { %5680 = vmatprep.subr.bf16.mxu0 %v8986_v59  ;;  %5712 = vmatprep.subr.bf16.mxu1 %v8987_v15 }
 0xa7c   :  { %5682 = vmatpush1.bf16.msra.mxu0 %v8988_v6  ;;  %5714 = vmatpush1.bf16.msra.mxu1 %v8989_v44 }
 0xa7d   :  { %5684 = vmatprep.subr.bf16.mxu0 %v8990_v11  ;;  %5716 = vmatprep.subr.bf16.mxu1 %v8991_v51 }
 0xa80   :  { %5686 = vmatpush1.bf16.msra.mxu0 %v8992_v1  ;;  %5718 = vmatpush1.bf16.msra.mxu1 %v8993_v37  ;;  %v9004_v37 = vld [vmem:[#allocation23_spill] sm:$0xff]  ;;  %v9012_v1 = vld [vmem:[#allocation29_spill] sm:$0xff] }
 0xa81   :  { %5688 = vmatprep.subr.bf16.mxu0 %v8994_v3  ;;  %5720 = vmatprep.subr.bf16.mxu1 %v8995_v22  ;;  %v9005_v3 = vld [vmem:[#allocation24_spill] sm:$0xff]  ;;  %v9006_v22 = vld [vmem:[#allocation25_spill] sm:$0xff] }
 0xa84   :  { %5690 = vmatpush1.bf16.msra.mxu0 %v8996_v26  ;;  %5722 = vmatpush1.bf16.msra.mxu1 %v8997_v19  ;;  %v9007_v26 = vld [vmem:[#allocation26_spill] sm:$0xff]  ;;  %v9008_v19 = vld [vmem:[#allocation27_spill] sm:$0xff] }
 0xa85   :  { %5692 = vmatprep.subr.bf16.mxu0 %v8998_v29  ;;  %5724 = vmatprep.subr.bf16.mxu1 %v8999_v21  ;;  %v9009_v29 = vld [vmem:[#allocation28_spill] sm:$0xff]  ;;  %v9010_v21 = vld [vmem:[#allocation34_spill] sm:$0xff] }
 0xa88   :  { %5694 = vmatpush1.bf16.msra.mxu0 %v9000_v52  ;;  %5726 = vmatpush1.bf16.msra.mxu1 %v9001_v28  ;;  %v9011_v52 = vld [vmem:[#allocation35_spill] sm:$0xff] }
 0xa89   :  { %5696 = vmatprep.subr.bf16.mxu0 %v9002_v25  ;;  %5728 = vmatprep.subr.bf16.mxu1 %v9003_v30 }
 0xa8c   :  { %5698 = vmatpush1.bf16.msra.mxu0 %v9004_v37  ;;  %5730 = vmatpush1.bf16.msra.mxu1 %v9005_v3 }
 0xa8d   :  { %5700 = vmatprep.subr.bf16.mxu0 %v9006_v22  ;;  %5732 = vmatprep.subr.bf16.mxu1 %v9007_v26 }
 0xa90   :  { %5702 = vmatpush1.bf16.msra.mxu0 %v9008_v19  ;;  %5734 = vmatpush1.bf16.msra.mxu1 %v9009_v29 }
 0xa91   :  { %5736 = vmatprep.subr.bf16.mxu0 %v9010_v21  ;;  %5768 = vmatprep.subr.bf16.mxu1 %v9011_v52 }
 0xb46   :  { %v2997_v28 = vpop.f32.mrb[10].mxu0  ;;  %v3068_v25 = vpop.f32.mrb[10].mxu1 }
 0xb47   :  { %v6169_v30 = vadd.f32 %v2997_v28, %v9012_v1  ;;  %v2999_v51 = vpop.f32.mrb[11].mxu0  ;;  %v3070_v37 = vpop.f32.mrb[11].mxu1  ;;  %v6185_v22 = vadd.f32 %v3068_v25, %v8758_v48  ;;  %v9013_v1 = vld [vmem:[#allocation33_spill] sm:$0xff]  ;;  %v9025_v25 = vld [vmem:[#allocation46_spill] sm:$0xff] }
 0xb48   :  { %v6170_v3 = vadd.f32 %v2999_v51, %v8757_v34  ;;  %v6186_v19 = vadd.f32 %v3070_v37, %v8823_v61 }
 0xb49   :  { %6380 = vtanh.f32 %v6169_v30 }
 0xb4a   :  { %6382 = vtanh.f32 %v6170_v3 }
 0xb4b   :  { %6384 = vtanh.f32 %v6185_v22 }
 0xb4c   :  { %6386 = vtanh.f32 %v6186_v19  ;;  %v9016_v19 = vld [vmem:[#allocation37_spill] sm:$0xff] }
 0xb53   :  { %v6381_v29 = vpop.eup %6380 }
 0xb54   :  { %v3081_v26 = vmul.f32 0.5, %v6381_v29  ;;  %v6383_v21 = vpop.eup %6382  ;;  %v9022_v29 = vld [vmem:[#allocation43_spill] sm:$0xff] }
 0xb55   :  { %v3082_v52 = vmul.f32 0.5, %v6383_v21  ;;  %v6385_v44 = vpop.eup %6384  ;;  %v9023_v21 = vld [vmem:[#allocation44_spill] sm:$0xff] }
 0xb56   :  { %v3085_v11 = vadd.f32 0.5, %v3081_v26  ;;  %v6387_v30 = vpop.eup %6386  ;;  %v9015_v26 = vld [vmem:[#allocation36_spill] sm:$0xff] }
 0xb57   :  { %v3086_v6 = vadd.f32 0.5, %v3082_v52  ;;  %v3084_v51 = vmul.f32 0.5, %v6387_v30  ;;  %v9024_v52 = vld [vmem:[#allocation45_spill] sm:$0xff]  ;;  %v9027_v30 = vld [vmem:[#allocation48_spill] sm:$0xff] }
 0xb58   :  { %v3094_v28 = vmul.f32 %v6385_v44, %v3085_v11  ;;  %v9017_v44 = vld [vmem:[#allocation38_spill] sm:$0xff]  ;;  %v9020_v11 = vld [vmem:[#allocation41_spill] sm:$0xff] }
 0xb59   :  { %v3093_v15 = vmul.f32 %v3086_v6, %v9013_v1  ;;  %v3088_v3 = vadd.f32 0.5, %v3084_v51  ;;  %v9019_v6 = vld [vmem:[#allocation40_spill] sm:$0xff]  ;;  %v9021_v1 = vld [vmem:[#allocation42_spill] sm:$0xff]  ;;  %v9028_v51 = vld [vmem:[#allocation49_spill] sm:$0xff] }
 0xb5b   :  { %v8132_v59 = vadd.f32 %v3094_v28, %v3093_v15  ;;  %v9018_v15 = vld [vmem:[#allocation39_spill] sm:$0xff] }
 0xb5c   :  { %v9026_v28 = vld [vmem:[#allocation47_spill] sm:$0xff] }
 0xb5d   :  { %9014 = vst [vmem:[#allocation33_spill] sm:$0xff] %v8132_v59  ;;  %6388 = vtanh.f32 %v8132_v59 }
 0xb67   :  { %v6389_v22 = vpop.eup %6388 }
 0xb68   :  { %v8135_v37 = vmul.f32 %v6389_v22, %v3088_v3  ;;  %v9029_v3 = vld [vmem:[#allocation50_spill] sm:$0xff]  ;;  %v9030_v22 = vld [vmem:[#allocation51_spill] sm:$0xff] }
 0xb6a   :  { %3163 = vmatmul.mubr.f32.vlgmr.msra.gmra.mrb[26].mxu0 %v8135_v37  ;;  %3234 = vmatmul.mubr.f32.vlgmr.msra.gmra.mrb[26].mxu1 %v8135_v37 }
 0xb6b   :  { %5738 = vmatpush1.bf16.msra.mxu0 %v9015_v26  ;;  %5770 = vmatpush1.bf16.msra.mxu1 %v9016_v19 }
 0xb6c   :  { %5740 = vmatprep.subr.bf16.mxu0 %v9017_v44  ;;  %5772 = vmatprep.subr.bf16.mxu1 %v9018_v15 }
 0xb6d   :  { %3326 = vmatprep.mubr.f32.mxu0 %v8694_v12  ;;  %3397 = vmatprep.mubr.f32.mxu1 %v8694_v12 }
 0xb6f   :  { %5742 = vmatpush1.bf16.msra.mxu0 %v9019_v6  ;;  %5774 = vmatpush1.bf16.msra.mxu1 %v9020_v11  ;;  %v9031_v11 = vld [vmem:[#allocation52_spill] sm:$0xff]  ;;  %v9047_v6 = vld [vmem:[#allocation66_spill] sm:$0xff] }
 0xb70   :  { %5744 = vmatprep.subr.bf16.mxu0 %v9021_v1  ;;  %5776 = vmatprep.subr.bf16.mxu1 %v9022_v29  ;;  %v9032_v1 = vld [vmem:[#allocation53_spill] sm:$0xff]  ;;  %v9033_v29 = vld [vmem:[#allocation54_spill] sm:$0xff] }
 0xb73   :  { %5746 = vmatpush1.bf16.msra.mxu0 %v9023_v21  ;;  %5778 = vmatpush1.bf16.msra.mxu1 %v9024_v52  ;;  %v9034_v21 = vld [vmem:[#allocation55_spill] sm:$0xff]  ;;  %v9035_v52 = vld [vmem:[#allocation56_spill] sm:$0xff] }
 0xb74   :  { %5748 = vmatprep.subr.bf16.mxu0 %v9025_v25  ;;  %5780 = vmatprep.subr.bf16.mxu1 %v9026_v28  ;;  %v9036_v25 = vld [vmem:[#allocation57_spill] sm:$0xff]  ;;  %v9037_v28 = vld [vmem:[#allocation58_spill] sm:$0xff] }
 0xb77   :  { %5750 = vmatpush1.bf16.msra.mxu0 %v9027_v30  ;;  %5782 = vmatpush1.bf16.msra.mxu1 %v9028_v51  ;;  %v9038_v30 = vld [vmem:[#allocation59_spill] sm:$0xff]  ;;  %v9039_v51 = vld [vmem:[#allocation60_spill] sm:$0xff] }
 0xb78   :  { %5752 = vmatprep.subr.bf16.mxu0 %v9029_v3  ;;  %5784 = vmatprep.subr.bf16.mxu1 %v9030_v22  ;;  %v9040_v3 = vld [vmem:[#allocation61_spill] sm:$0xff]  ;;  %v9041_v22 = vld [vmem:[#allocation62_spill] sm:$0xff] }
 0xb7b   :  { %5754 = vmatpush1.bf16.msra.mxu0 %v9031_v11  ;;  %5786 = vmatpush1.bf16.msra.mxu1 %v9032_v1  ;;  %v9042_v11 = vld [vmem:[#allocation63_spill] sm:$0xff]  ;;  %v9043_v1 = vld [vmem:[#allocation64_spill] sm:$0xff] }
 0xb7c   :  { %5756 = vmatprep.subr.bf16.mxu0 %v9033_v29  ;;  %5788 = vmatprep.subr.bf16.mxu1 %v9034_v21  ;;  %v9044_v29 = vld [vmem:[#allocation65_spill] sm:$0xff]  ;;  %v9045_v21 = vld [vmem:[#allocation3_spill] sm:$0xff] }
 0xb7f   :  { %5758 = vmatpush1.bf16.msra.mxu0 %v9035_v52  ;;  %5790 = vmatpush1.bf16.msra.mxu1 %v9036_v25  ;;  %v9046_v52 = vld [vmem:[#allocation4_spill] sm:$0xff] }
 0xb80   :  { %5760 = vmatprep.subr.bf16.mxu0 %v9037_v28  ;;  %5792 = vmatprep.subr.bf16.mxu1 %v9038_v30 }
 0xb83   :  { %5762 = vmatpush1.bf16.msra.mxu0 %v9039_v51  ;;  %5794 = vmatpush1.bf16.msra.mxu1 %v9040_v3 }
 0xb84   :  { %5764 = vmatprep.subr.bf16.mxu0 %v9041_v22  ;;  %5796 = vmatprep.subr.bf16.mxu1 %v9042_v11 }
 0xb87   :  { %5766 = vmatpush1.bf16.msra.mxu0 %v9043_v1  ;;  %5798 = vmatpush1.bf16.msra.mxu1 %v9044_v29 }
 0xb88   :  { %5800 = vmatprep.subr.bf16.mxu0 %v9045_v21  ;;  %5832 = vmatprep.subr.bf16.mxu1 %v9046_v52 }
 0xc3d   :  { %v3164_v25 = vpop.f32.mrb[26].mxu0  ;;  %v3235_v28 = vpop.f32.mrb[26].mxu1 }
 0xc3e   :  { %v6207_v30 = vadd.f32 %v3164_v25, %v9047_v6  ;;  %v3166_v15 = vpop.f32.mrb[27].mxu0  ;;  %v3237_v51 = vpop.f32.mrb[27].mxu1  ;;  %v6209_v22 = vadd.f32 %v3235_v28, %v7528_v43 }
 0xc3f   :  { %v6208_v3 = vadd.f32 %v3166_v15, %v8795_v41  ;;  %v6210_v1 = vadd.f32 %v3237_v51, %v7535_v2 }
 0xc40   :  { %6390 = vtanh.f32 %v6207_v30 }
 0xc41   :  { %6392 = vtanh.f32 %v6208_v3 }
 0xc42   :  { %6394 = vtanh.f32 %v6209_v22  ;;  %v9060_v22 = vld [vmem:[#allocation16_spill] sm:$0xff] }
 0xc43   :  { %6396 = vtanh.f32 %v6210_v1  ;;  %v9056_v1 = vld [vmem:[#allocation12_spill] sm:$0xff] }
 0xc4a   :  { %v6391_v29 = vpop.eup %6390 }
 0xc4b   :  { %v3244_v11 = vmul.f32 0.5, %v6391_v29  ;;  %v6393_v21 = vpop.eup %6392  ;;  %v9057_v29 = vld [vmem:[#allocation13_spill] sm:$0xff] }
 0xc4c   :  { %v3245_v52 = vmul.f32 0.5, %v6393_v21  ;;  %v6395_v19 = vpop.eup %6394  ;;  %v9058_v21 = vld [vmem:[#allocation14_spill] sm:$0xff] }
 0xc4d   :  { %v3248_v44 = vadd.f32 0.5, %v3244_v11  ;;  %v6397_v15 = vpop.eup %6396  ;;  %v9055_v11 = vld [vmem:[#allocation11_spill] sm:$0xff] }
 0xc4e   :  { %v3249_v26 = vadd.f32 0.5, %v3245_v52  ;;  %v3247_v28 = vmul.f32 0.5, %v6397_v15  ;;  %v9059_v52 = vld [vmem:[#allocation15_spill] sm:$0xff]  ;;  %v9062_v15 = vld [vmem:[#allocation18_spill] sm:$0xff] }
 0xc4f   :  { %v3257_v25 = vmul.f32 %v6395_v19, %v3248_v44  ;;  %v9052_v19 = vld [vmem:[#allocation8_spill] sm:$0xff]  ;;  %v9053_v44 = vld [vmem:[#allocation9_spill] sm:$0xff] }
 0xc50   :  { %v3256_v6 = vmul.f32 %v3249_v26, %v8050_v8  ;;  %v3251_v30 = vadd.f32 0.5, %v3247_v28  ;;  %v9049_v8 = vld [vmem:[#allocation5_spill] sm:$0xff]  ;;  %v9050_v26 = vld [vmem:[#allocation6_spill] sm:$0xff]  ;;  %v9063_v28 = vld [vmem:[#allocation19_spill] sm:$0xff] }
 0xc52   :  { %v8178_v59 = vadd.f32 %v3257_v25, %v3256_v6  ;;  %v9054_v6 = vld [vmem:[#allocation10_spill] sm:$0xff]  ;;  %v9061_v25 = vld [vmem:[#allocation17_spill] sm:$0xff] }
 0xc54   :  { %6398 = vtanh.f32 %v8178_v59 }
 0xc5e   :  { %v6399_v3 = vpop.eup %6398 }
 0xc5f   :  { %v8181_v51 = vmul.f32 %v6399_v3, %v3251_v30  ;;  %v9064_v30 = vld [vmem:[#allocation20_spill] sm:$0xff]  ;;  %v9065_v3 = vld [vmem:[#allocation21_spill] sm:$0xff] }
 0xc61   :  { %9048 = vst [vmem:[#allocation69_spill] sm:$0xff] %v8181_v51  ;;  %3327 = vmatmul.mubr.f32.vlgmr.msra.gmra.mrb[28].mxu0 %v8181_v51  ;;  %3398 = vmatmul.mubr.f32.vlgmr.msra.gmra.mrb[28].mxu1 %v8181_v51  ;;  %v9066_v51 = vld [vmem:[#allocation22_spill] sm:$0xff] }
 0xc62   :  { %5802 = vmatpush1.bf16.msra.mxu0 %v6579_v35  ;;  %5834 = vmatpush1.bf16.msra.mxu1 %v6588_v38 }
 0xc63   :  { %5804 = vmatprep.subr.bf16.mxu0 %v6600_v42  ;;  %5836 = vmatprep.subr.bf16.mxu1 %v6615_v47 }
 0xc64   :  { %3468 = vmatprep.mubr.f32.mxu0 %v8694_v12  ;;  %3539 = vmatprep.mubr.f32.mxu1 %v8694_v12 }
 0xc66   :  { %5806 = vmatpush1.bf16.msra.mxu0 %v6625_v50  ;;  %5838 = vmatpush1.bf16.msra.mxu1 %v6638_v54 }
 0xc67   :  { %5808 = vmatprep.subr.bf16.mxu0 %v6648_v57  ;;  %5840 = vmatprep.subr.bf16.mxu1 %v6658_v60 }
 0xc6a   :  { %5810 = vmatpush1.bf16.msra.mxu0 %v6671_v0  ;;  %5842 = vmatpush1.bf16.msra.mxu1 %v6681_v4 }
 0xc6b   :  { %5812 = vmatprep.subr.bf16.mxu0 %v6691_v7  ;;  %5844 = vmatprep.subr.bf16.mxu1 %v6701_v10 }
 0xc6e   :  { %5814 = vmatpush1.bf16.msra.mxu0 %v6714_v14  ;;  %5846 = vmatpush1.bf16.msra.mxu1 %v6724_v17 }
 0xc6f   :  { %5816 = vmatprep.subr.bf16.mxu0 %v6734_v20  ;;  %5848 = vmatprep.subr.bf16.mxu1 %v6744_v23 }
 0xc72   :  { %5818 = vmatpush1.bf16.msra.mxu0 %v6757_v27  ;;  %5850 = vmatpush1.bf16.msra.mxu1 %v6767_v32 }
 0xc73   :  { %5820 = vmatprep.subr.bf16.mxu0 %v6777_v36  ;;  %5852 = vmatprep.subr.bf16.mxu1 %v6787_v40 }
 0xc76   :  { %5822 = vmatpush1.bf16.msra.mxu0 %v6800_v45  ;;  %5854 = vmatpush1.bf16.msra.mxu1 %v6810_v49 }
 0xc77   :  { %5824 = vmatprep.subr.bf16.mxu0 %v6820_v53  ;;  %5856 = vmatprep.subr.bf16.mxu1 %v6830_v58 }
 0xc7a   :  { %5826 = vmatpush1.bf16.msra.mxu0 %v6843_v63  ;;  %5858 = vmatpush1.bf16.msra.mxu1 %v6853_v5 }
 0xc7b   :  { %5828 = vmatprep.subr.bf16.mxu0 %v6863_v9  ;;  %5860 = vmatprep.subr.bf16.mxu1 %v6873_v13 }
 0xc7e   :  { %5830 = vmatpush1.bf16.msra.mxu0 %v6880_v16  ;;  %5862 = vmatpush1.bf16.msra.mxu1 %v6884_v18 }
 0xc7f   :  { %5864 = vmatprep.subr.bf16.mxu0 %v6908_v24  ;;  %5896 = vmatprep.subr.bf16.mxu1 %v6919_v31 }
 0xc81   :  { %3469 = vmatmul.mubr.f32.vlgmr.msra.gmra.mrb[12].mxu0 %v8135_v37  ;;  %3540 = vmatmul.mubr.f32.vlgmr.msra.gmra.mrb[12].mxu1 %v8135_v37  ;;  %v9051_v37 = vld [vmem:[#allocation7_spill] sm:$0xff] }
 0xc82   :  { %5866 = vmatpush1.bf16.msra.mxu0 %v6921_v33  ;;  %5898 = vmatpush1.bf16.msra.mxu1 %v6930_v39 }
 0xc83   :  { %5868 = vmatprep.subr.bf16.mxu0 %v6944_v46  ;;  %5900 = vmatprep.subr.bf16.mxu1 %v6955_v55 }
 0xc84   :  { %3635 = vmatprep.mubr.f32.mxu0 %v8694_v12  ;;  %3706 = vmatprep.mubr.f32.mxu1 %v8694_v12 }
 0xc86   :  { %5870 = vmatpush1.bf16.msra.mxu0 %v6957_v56  ;;  %5902 = vmatpush1.bf16.msra.mxu1 %v6966_v62 }
 0xc87   :  { %5872 = vmatprep.subr.bf16.mxu0 %v9049_v8  ;;  %5904 = vmatprep.subr.bf16.mxu1 %v9050_v26 }
 0xc8a   :  { %5874 = vmatpush1.bf16.msra.mxu0 %v9051_v37  ;;  %5906 = vmatpush1.bf16.msra.mxu1 %v9052_v19 }
 0xc8b   :  { %5876 = vmatprep.subr.bf16.mxu0 %v9053_v44  ;;  %5908 = vmatprep.subr.bf16.mxu1 %v9054_v6 }
 0xc8e   :  { %5878 = vmatpush1.bf16.msra.mxu0 %v9055_v11  ;;  %5910 = vmatpush1.bf16.msra.mxu1 %v9056_v1  ;;  %v9067_v1 = vld [vmem:[#allocation23_spill] sm:$0xff]  ;;  %v9075_v11 = vld [vmem:[#allocation29_spill] sm:$0xff] }
 0xc8f   :  { %5880 = vmatprep.subr.bf16.mxu0 %v9057_v29  ;;  %5912 = vmatprep.subr.bf16.mxu1 %v9058_v21  ;;  %v9068_v29 = vld [vmem:[#allocation24_spill] sm:$0xff]  ;;  %v9069_v21 = vld [vmem:[#allocation25_spill] sm:$0xff] }
 0xc92   :  { %5882 = vmatpush1.bf16.msra.mxu0 %v9059_v52  ;;  %5914 = vmatpush1.bf16.msra.mxu1 %v9060_v22  ;;  %v9070_v52 = vld [vmem:[#allocation26_spill] sm:$0xff]  ;;  %v9071_v22 = vld [vmem:[#allocation27_spill] sm:$0xff] }
 0xc93   :  { %5884 = vmatprep.subr.bf16.mxu0 %v9061_v25  ;;  %5916 = vmatprep.subr.bf16.mxu1 %v9062_v15  ;;  %v9072_v25 = vld [vmem:[#allocation28_spill] sm:$0xff]  ;;  %v9073_v15 = vld [vmem:[#allocation34_spill] sm:$0xff] }
 0xc96   :  { %5886 = vmatpush1.bf16.msra.mxu0 %v9063_v28  ;;  %5918 = vmatpush1.bf16.msra.mxu1 %v9064_v30  ;;  %v9074_v28 = vld [vmem:[#allocation35_spill] sm:$0xff] }
 0xc97   :  { %5888 = vmatprep.subr.bf16.mxu0 %v9065_v3  ;;  %5920 = vmatprep.subr.bf16.mxu1 %v9066_v51 }
 0xc9a   :  { %5890 = vmatpush1.bf16.msra.mxu0 %v9067_v1  ;;  %5922 = vmatpush1.bf16.msra.mxu1 %v9068_v29 }
 0xc9b   :  { %5892 = vmatprep.subr.bf16.mxu0 %v9069_v21  ;;  %5924 = vmatprep.subr.bf16.mxu1 %v9070_v52 }
 0xc9e   :  { %5894 = vmatpush1.bf16.msra.mxu0 %v9071_v22  ;;  %5926 = vmatpush1.bf16.msra.mxu1 %v9072_v25 }
 0xc9f   :  { %5928 = vmatprep.subr.bf16.mxu0 %v9073_v15  ;;  %5960 = vmatprep.subr.bf16.mxu1 %v9074_v28 }
 0xd54   :  { %v3470_v30 = vpop.f32.mrb[12].mxu0  ;;  %v3541_v3 = vpop.f32.mrb[12].mxu1 }
 0xd55   :  { %v6171_v51 = vadd.f32 %v3470_v30, %v9075_v11  ;;  %v3472_v6 = vpop.f32.mrb[13].mxu0  ;;  %v3543_v1 = vpop.f32.mrb[13].mxu1  ;;  %v6187_v21 = vadd.f32 %v3541_v3, %v8758_v48  ;;  %v9076_v11 = vld [vmem:[#allocation33_spill] sm:$0xff]  ;;  %v9086_v3 = vld [vmem:[#allocation44_spill] sm:$0xff] }
 0xd56   :  { %v6172_v29 = vadd.f32 %v3472_v6, %v8757_v34  ;;  %v6188_v22 = vadd.f32 %v3543_v1, %v8823_v61 }
 0xd57   :  { %6400 = vtanh.f32 %v6171_v51 }
 0xd58   :  { %6402 = vtanh.f32 %v6172_v29 }
 0xd59   :  { %6404 = vtanh.f32 %v6187_v21 }
 0xd5a   :  { %6406 = vtanh.f32 %v6188_v22  ;;  %v9079_v22 = vld [vmem:[#allocation37_spill] sm:$0xff] }
 0xd61   :  { %v6401_v25 = vpop.eup %6400 }
 0xd62   :  { %v3554_v52 = vmul.f32 0.5, %v6401_v25  ;;  %v6403_v15 = vpop.eup %6402  ;;  %v9085_v25 = vld [vmem:[#allocation43_spill] sm:$0xff] }
 0xd63   :  { %v3555_v28 = vmul.f32 0.5, %v6403_v15  ;;  %v6405_v19 = vpop.eup %6404  ;;  %v9087_v15 = vld [vmem:[#allocation45_spill] sm:$0xff] }
 0xd64   :  { %v3558_v44 = vadd.f32 0.5, %v3554_v52  ;;  %v6407_v51 = vpop.eup %6406  ;;  %v9078_v52 = vld [vmem:[#allocation36_spill] sm:$0xff] }
 0xd65   :  { %v3559_v37 = vadd.f32 0.5, %v3555_v28  ;;  %v3557_v6 = vmul.f32 0.5, %v6407_v51  ;;  %v9088_v28 = vld [vmem:[#allocation46_spill] sm:$0xff]  ;;  %v9090_v51 = vld [vmem:[#allocation48_spill] sm:$0xff] }
 0xd66   :  { %v3567_v30 = vmul.f32 %v6405_v19, %v3558_v44  ;;  %v9080_v19 = vld [vmem:[#allocation38_spill] sm:$0xff]  ;;  %v9083_v44 = vld [vmem:[#allocation41_spill] sm:$0xff] }
 0xd67   :  { %v3566_v26 = vmul.f32 %v3559_v37, %v9076_v11  ;;  %v3561_v29 = vadd.f32 0.5, %v3557_v6  ;;  %v9082_v37 = vld [vmem:[#allocation40_spill] sm:$0xff]  ;;  %v9084_v11 = vld [vmem:[#allocation42_spill] sm:$0xff]  ;;  %v9091_v6 = vld [vmem:[#allocation49_spill] sm:$0xff] }
 0xd69   :  { %v8260_v8 = vadd.f32 %v3567_v30, %v3566_v26  ;;  %v9081_v26 = vld [vmem:[#allocation39_spill] sm:$0xff] }
 0xd6a   :  { %v9089_v30 = vld [vmem:[#allocation47_spill] sm:$0xff] }
 0xd6b   :  { %9077 = vst [vmem:[#allocation34_spill] sm:$0xff] %v8260_v8  ;;  %6408 = vtanh.f32 %v8260_v8 }
 0xd75   :  { %v6409_v21 = vpop.eup %6408 }
 0xd76   :  { %v8263_v1 = vmul.f32 %v6409_v21, %v3561_v29  ;;  %v9092_v29 = vld [vmem:[#allocation50_spill] sm:$0xff]  ;;  %v9093_v21 = vld [vmem:[#allocation51_spill] sm:$0xff] }
 0xd78   :  { %3636 = vmatmul.mubr.f32.vlgmr.msra.gmra.mrb[28].mxu0 %v8263_v1  ;;  %3707 = vmatmul.mubr.f32.vlgmr.msra.gmra.mrb[28].mxu1 %v8263_v1 }
 0xd79   :  { %5930 = vmatpush1.bf16.msra.mxu0 %v9078_v52  ;;  %5962 = vmatpush1.bf16.msra.mxu1 %v9079_v22  ;;  %v9094_v52 = vld [vmem:[#allocation52_spill] sm:$0xff]  ;;  %v9095_v22 = vld [vmem:[#allocation53_spill] sm:$0xff] }
 0xd7a   :  { %5932 = vmatprep.subr.bf16.mxu0 %v9080_v19  ;;  %5964 = vmatprep.subr.bf16.mxu1 %v9081_v26  ;;  %v9096_v19 = vld [vmem:[#allocation54_spill] sm:$0xff]  ;;  %v9097_v26 = vld [vmem:[#allocation55_spill] sm:$0xff] }
 0xd7b   :  { %3799 = vmatprep.mubr.f32.mxu0 %v8694_v12  ;;  %3870 = vmatprep.mubr.f32.mxu1 %v8694_v12 }
 0xd7d   :  { %5934 = vmatpush1.bf16.msra.mxu0 %v9082_v37  ;;  %5966 = vmatpush1.bf16.msra.mxu1 %v9083_v44  ;;  %v9098_v37 = vld [vmem:[#allocation56_spill] sm:$0xff]  ;;  %v9099_v44 = vld [vmem:[#allocation57_spill] sm:$0xff] }
 0xd7e   :  { %5936 = vmatprep.subr.bf16.mxu0 %v9084_v11  ;;  %5968 = vmatprep.subr.bf16.mxu1 %v9085_v25  ;;  %v9100_v11 = vld [vmem:[#allocation58_spill] sm:$0xff]  ;;  %v9101_v25 = vld [vmem:[#allocation59_spill] sm:$0xff] }
 0xd81   :  { %5938 = vmatpush1.bf16.msra.mxu0 %v9086_v3  ;;  %5970 = vmatpush1.bf16.msra.mxu1 %v9087_v15  ;;  %v9102_v3 = vld [vmem:[#allocation60_spill] sm:$0xff]  ;;  %v9103_v15 = vld [vmem:[#allocation61_spill] sm:$0xff] }
 0xd82   :  { %5940 = vmatprep.subr.bf16.mxu0 %v9088_v28  ;;  %5972 = vmatprep.subr.bf16.mxu1 %v9089_v30  ;;  %v9104_v28 = vld [vmem:[#allocation62_spill] sm:$0xff]  ;;  %v9105_v30 = vld [vmem:[#allocation63_spill] sm:$0xff] }
 0xd85   :  { %5942 = vmatpush1.bf16.msra.mxu0 %v9090_v51  ;;  %5974 = vmatpush1.bf16.msra.mxu1 %v9091_v6  ;;  %v9106_v51 = vld [vmem:[#allocation64_spill] sm:$0xff]  ;;  %v9107_v6 = vld [vmem:[#allocation65_spill] sm:$0xff] }
 0xd86   :  { %5944 = vmatprep.subr.bf16.mxu0 %v9092_v29  ;;  %5976 = vmatprep.subr.bf16.mxu1 %v9093_v21  ;;  %v9108_v29 = vld [vmem:[#allocation3_spill] sm:$0xff]  ;;  %v9109_v21 = vld [vmem:[#allocation4_spill] sm:$0xff] }
 0xd89   :  { %5946 = vmatpush1.bf16.msra.mxu0 %v9094_v52  ;;  %5978 = vmatpush1.bf16.msra.mxu1 %v9095_v22 }
 0xd8a   :  { %5948 = vmatprep.subr.bf16.mxu0 %v9096_v19  ;;  %5980 = vmatprep.subr.bf16.mxu1 %v9097_v26  ;;  %v9110_v19 = vld [vmem:[#allocation66_spill] sm:$0xff] }
 0xd8d   :  { %5950 = vmatpush1.bf16.msra.mxu0 %v9098_v37  ;;  %5982 = vmatpush1.bf16.msra.mxu1 %v9099_v44 }
 0xd8e   :  { %5952 = vmatprep.subr.bf16.mxu0 %v9100_v11  ;;  %5984 = vmatprep.subr.bf16.mxu1 %v9101_v25 }
 0xd91   :  { %5954 = vmatpush1.bf16.msra.mxu0 %v9102_v3  ;;  %5986 = vmatpush1.bf16.msra.mxu1 %v9103_v15 }
 0xd92   :  { %5956 = vmatprep.subr.bf16.mxu0 %v9104_v28  ;;  %5988 = vmatprep.subr.bf16.mxu1 %v9105_v30 }
 0xd95   :  { %5958 = vmatpush1.bf16.msra.mxu0 %v9106_v51  ;;  %5990 = vmatpush1.bf16.msra.mxu1 %v9107_v6 }
 0xd96   :  { %5992 = vmatprep.subr.bf16.mxu0 %v9108_v29  ;;  %6024 = vmatprep.subr.bf16.mxu1 %v9109_v21 }
 0xe4b   :  { %v3637_v52 = vpop.f32.mrb[28].mxu0  ;;  %v3708_v22 = vpop.f32.mrb[28].mxu1 }
 0xe4c   :  { %v6211_v26 = vadd.f32 %v3637_v52, %v9110_v19  ;;  %v3639_v37 = vpop.f32.mrb[29].mxu0  ;;  %v3710_v44 = vpop.f32.mrb[29].mxu1  ;;  %v6213_v25 = vadd.f32 %v3708_v22, %v7528_v43 }
 0xe4d   :  { %v6212_v11 = vadd.f32 %v3639_v37, %v8795_v41  ;;  %v6214_v3 = vadd.f32 %v3710_v44, %v7535_v2 }
 0xe4e   :  { %6410 = vtanh.f32 %v6211_v26 }
 0xe4f   :  { %6412 = vtanh.f32 %v6212_v11 }
 0xe50   :  { %6414 = vtanh.f32 %v6213_v25 }
 0xe51   :  { %6416 = vtanh.f32 %v6214_v3 }
 0xe58   :  { %v6411_v15 = vpop.eup %6410 }
 0xe59   :  { %v3717_v28 = vmul.f32 0.5, %v6411_v15  ;;  %v6413_v30 = vpop.eup %6412  ;;  %v9136_v15 = vld [vmem:[#allocation34_spill] sm:$0xff] }
 0xe5a   :  { %v3718_v6 = vmul.f32 0.5, %v6413_v30  ;;  %v6415_v29 = vpop.eup %6414 }
 0xe5b   :  { %v3721_v51 = vadd.f32 0.5, %v3717_v28  ;;  %v6417_v22 = vpop.eup %6416 }
 0xe5c   :  { %v3722_v21 = vadd.f32 0.5, %v3718_v6  ;;  %v3720_v26 = vmul.f32 0.5, %v6417_v22  ;;  %v4220_v22 = vld [vmem:[%s8511_s7 + $0x20] sm:$0xff] }
 0xe5d   :  { %v3730_v52 = vmul.f32 %v6415_v29, %v3721_v51 }
 0xe5e   :  { %v3729_v19 = vmul.f32 %v3722_v21, %v8178_v59  ;;  %v3724_v37 = vadd.f32 0.5, %v3720_v26  ;;  %v4221_v26 = vld [vmem:[%s8511_s7 + $0x28] sm:$0xff] }
 0xe60   :  { %v8306_v8 = vadd.f32 %v3730_v52, %v3729_v19 }
 0xe62   :  { %6418 = vtanh.f32 %v8306_v8 }
 0xe6c   :  { %v6419_v11 = vpop.eup %6418 }
 0xe6d   :  { %v8309_v44 = vmul.f32 %v6419_v11, %v3724_v37  ;;  %v9137_v37 = vld [vmem:[#allocation68_spill] sm:$0xff]  ;;  %v6127_v11 = vpack.c.bf16 %v4221_v26, %v4220_v22 }
 0xe6f   :  { %3800 = vmatmul.mubr.f32.vlgmr.msra.gmra.mrb[30].mxu0 %v8309_v44  ;;  %3871 = vmatmul.mubr.f32.vlgmr.msra.gmra.mrb[30].mxu1 %v8309_v44 }
 0xe70   :  { %5994 = vmatpush1.bf16.msra.mxu0 %v6579_v35  ;;  %6026 = vmatpush1.bf16.msra.mxu1 %v6588_v38  ;;  %v9111_v35 = vld [vmem:[#allocation5_spill] sm:$0xff]  ;;  %v9112_v38 = vld [vmem:[#allocation6_spill] sm:$0xff] }
 0xe71   :  { %5996 = vmatprep.subr.bf16.mxu0 %v6600_v42  ;;  %6028 = vmatprep.subr.bf16.mxu1 %v6615_v47  ;;  %v9113_v42 = vld [vmem:[#allocation7_spill] sm:$0xff]  ;;  %v9114_v47 = vld [vmem:[#allocation8_spill] sm:$0xff] }
 0xe72   :  { %3941 = vmatprep.mubr.f32.mxu0 %v8694_v12  ;;  %4012 = vmatprep.mubr.f32.mxu1 %v8694_v12 }
 0xe74   :  { %5998 = vmatpush1.bf16.msra.mxu0 %v6625_v50  ;;  %6030 = vmatpush1.bf16.msra.mxu1 %v6638_v54  ;;  %v9115_v50 = vld [vmem:[#allocation9_spill] sm:$0xff]  ;;  %v9116_v54 = vld [vmem:[#allocation10_spill] sm:$0xff] }
 0xe75   :  { %6000 = vmatprep.subr.bf16.mxu0 %v6648_v57  ;;  %6032 = vmatprep.subr.bf16.mxu1 %v6658_v60  ;;  %v9117_v57 = vld [vmem:[#allocation11_spill] sm:$0xff]  ;;  %v9118_v60 = vld [vmem:[#allocation12_spill] sm:$0xff] }
 0xe78   :  { %6002 = vmatpush1.bf16.msra.mxu0 %v6671_v0  ;;  %6034 = vmatpush1.bf16.msra.mxu1 %v6681_v4  ;;  %v9119_v0 = vld [vmem:[#allocation13_spill] sm:$0xff]  ;;  %v9120_v4 = vld [vmem:[#allocation14_spill] sm:$0xff] }
 0xe79   :  { %6004 = vmatprep.subr.bf16.mxu0 %v6691_v7  ;;  %6036 = vmatprep.subr.bf16.mxu1 %v6701_v10  ;;  %v9121_v7 = vld [vmem:[#allocation15_spill] sm:$0xff]  ;;  %v9122_v10 = vld [vmem:[#allocation16_spill] sm:$0xff] }
 0xe7c   :  { %6006 = vmatpush1.bf16.msra.mxu0 %v6714_v14  ;;  %6038 = vmatpush1.bf16.msra.mxu1 %v6724_v17  ;;  %v9123_v14 = vld [vmem:[#allocation17_spill] sm:$0xff]  ;;  %v9124_v17 = vld [vmem:[#allocation18_spill] sm:$0xff] }
 0xe7d   :  { %6008 = vmatprep.subr.bf16.mxu0 %v6734_v20  ;;  %6040 = vmatprep.subr.bf16.mxu1 %v6744_v23  ;;  %v9125_v20 = vld [vmem:[#allocation19_spill] sm:$0xff]  ;;  %v9126_v23 = vld [vmem:[#allocation20_spill] sm:$0xff] }
 0xe80   :  { %6010 = vmatpush1.bf16.msra.mxu0 %v6757_v27  ;;  %6042 = vmatpush1.bf16.msra.mxu1 %v6767_v32  ;;  %v9127_v27 = vld [vmem:[#allocation21_spill] sm:$0xff]  ;;  %v9128_v32 = vld [vmem:[#allocation22_spill] sm:$0xff] }
 0xe81   :  { %6012 = vmatprep.subr.bf16.mxu0 %v6777_v36  ;;  %6044 = vmatprep.subr.bf16.mxu1 %v6787_v40  ;;  %v9129_v36 = vld [vmem:[#allocation23_spill] sm:$0xff]  ;;  %v9130_v40 = vld [vmem:[#allocation24_spill] sm:$0xff] }
 0xe84   :  { %6014 = vmatpush1.bf16.msra.mxu0 %v6800_v45  ;;  %6046 = vmatpush1.bf16.msra.mxu1 %v6810_v49  ;;  %v9131_v45 = vld [vmem:[#allocation25_spill] sm:$0xff]  ;;  %v9132_v49 = vld [vmem:[#allocation26_spill] sm:$0xff] }
 0xe85   :  { %6016 = vmatprep.subr.bf16.mxu0 %v6820_v53  ;;  %6048 = vmatprep.subr.bf16.mxu1 %v6830_v58  ;;  %v9133_v53 = vld [vmem:[#allocation27_spill] sm:$0xff]  ;;  %v9134_v58 = vld [vmem:[#allocation28_spill] sm:$0xff] }
 0xe88   :  { %6018 = vmatpush1.bf16.msra.mxu0 %v6843_v63  ;;  %6050 = vmatpush1.bf16.msra.mxu1 %v6853_v5  ;;  %v4216_v63 = vld [vmem:[%s8511_s7] sm:$0xff]  ;;  %v4217_v5 = vld [vmem:[%s8511_s7 + $0x8] sm:$0xff] }
 0xe89   :  { %6020 = vmatprep.subr.bf16.mxu0 %v6863_v9  ;;  %6052 = vmatprep.subr.bf16.mxu1 %v6873_v13  ;;  %v6119_v9 = vpack.c.bf16 %v4217_v5, %v4216_v63  ;;  %v4355_v63 = vld [vmem:[%s8512_s9 + $0x18] sm:$0xff] }
 0xe8c   :  { %6022 = vmatpush1.bf16.msra.mxu0 %v6880_v16  ;;  %6054 = vmatpush1.bf16.msra.mxu1 %v6884_v18  ;;  %v9135_v18 = vld [vmem:[#allocation29_spill] sm:$0xff] }
 0xe8d   :  { %6056 = vmatprep.subr.bf16.mxu0 %v6908_v24  ;;  %6088 = vmatprep.subr.bf16.mxu1 %v6919_v31 }
 0xe8f   :  { %3942 = vmatmul.mubr.f32.vlgmr.msra.gmra.mrb[14].mxu0 %v8263_v1  ;;  %4013 = vmatmul.mubr.f32.vlgmr.msra.gmra.mrb[14].mxu1 %v8263_v1 }
 0xe90   :  { %6058 = vmatpush1.bf16.msra.mxu0 %v6921_v33  ;;  %6090 = vmatpush1.bf16.msra.mxu1 %v6930_v39 }
 0xe91   :  { %6060 = vmatprep.subr.bf16.mxu0 %v6944_v46  ;;  %6092 = vmatprep.subr.bf16.mxu1 %v6955_v55 }
 0xe92   :  { %4108 = vmatprep.mubr.f32.mxu0 %v8694_v12  ;;  %4179 = vmatprep.mubr.f32.mxu1 %v8694_v12 }
 0xe94   :  { %6062 = vmatpush1.bf16.msra.mxu0 %v6957_v56  ;;  %6094 = vmatpush1.bf16.msra.mxu1 %v6966_v62 }
 0xe95   :  { %6064 = vmatprep.subr.bf16.mxu0 %v9111_v35  ;;  %6096 = vmatprep.subr.bf16.mxu1 %v9112_v38  ;;  %v4222_v35 = vld [vmem:[%s8511_s7 + $0x30] sm:$0xff]  ;;  %v4223_v38 = vld [vmem:[%s8511_s7 + $0x38] sm:$0xff] }
 0xe98   :  { %6066 = vmatpush1.bf16.msra.mxu0 %v9113_v42  ;;  %6098 = vmatpush1.bf16.msra.mxu1 %v9114_v47  ;;  %v6131_v42 = vpack.c.bf16 %v4223_v38, %v4222_v35  ;;  %v4224_v47 = vld [vmem:[%s8511_s7 + $0x40] sm:$0xff] }
 0xe99   :  { %6068 = vmatprep.subr.bf16.mxu0 %v9115_v50  ;;  %6100 = vmatprep.subr.bf16.mxu1 %v9116_v54  ;;  %v4225_v50 = vld [vmem:[%s8511_s7 + $0x48] sm:$0xff] }
 0xe9a   :  { %v6135_v54 = vpack.c.bf16 %v4225_v50, %v4224_v47 }
 0xe9c   :  { %6070 = vmatpush1.bf16.msra.mxu0 %v9117_v57  ;;  %6102 = vmatpush1.bf16.msra.mxu1 %v9118_v60  ;;  %v4226_v57 = vld [vmem:[%s8511_s7 + $0x50] sm:$0xff]  ;;  %v4227_v60 = vld [vmem:[%s8511_s7 + $0x58] sm:$0xff] }
 0xe9d   :  { %6072 = vmatprep.subr.bf16.mxu0 %v9119_v0  ;;  %6104 = vmatprep.subr.bf16.mxu1 %v9120_v4  ;;  %v6139_v0 = vpack.c.bf16 %v4227_v60, %v4226_v57  ;;  %v4228_v4 = vld [vmem:[%s8511_s7 + $0x60] sm:$0xff] }
 0xe9e   :  { %v4522_v57 = vld [vmem:[%s8514_s10] ss:$0 sm:$0xff] }
 0xea0   :  { %6074 = vmatpush1.bf16.msra.mxu0 %v9121_v7  ;;  %6106 = vmatpush1.bf16.msra.mxu1 %v9122_v10  ;;  %v4229_v7 = vld [vmem:[%s8511_s7 + $0x68] sm:$0xff] }
 0xea1   :  { %6076 = vmatprep.subr.bf16.mxu0 %v9123_v14  ;;  %6108 = vmatprep.subr.bf16.mxu1 %v9124_v17  ;;  %v6143_v10 = vpack.c.bf16 %v4229_v7, %v4228_v4  ;;  %v4230_v14 = vld [vmem:[%s8511_s7 + $0x70] sm:$0xff]  ;;  %v4231_v17 = vld [vmem:[%s8511_s7 + $0x78] sm:$0xff] }
 0xea4   :  { %6078 = vmatpush1.bf16.msra.mxu0 %v9125_v20  ;;  %6110 = vmatpush1.bf16.msra.mxu1 %v9126_v23  ;;  %v6147_v20 = vpack.c.bf16 %v4231_v17, %v4230_v14  ;;  %v9138_v23 = vld [vmem:[#allocation31_spill] sm:$0xff] }
 0xea5   :  { %6080 = vmatprep.subr.bf16.mxu0 %v9127_v27  ;;  %6112 = vmatprep.subr.bf16.mxu1 %v9128_v32  ;;  %v9139_v27 = vld [vmem:[#allocation67_spill] sm:$0xff]  ;;  %v9140_v32 = vld [vmem:[#allocation30_spill] sm:$0xff] }
 0xea8   :  { %6082 = vmatpush1.bf16.msra.mxu0 %v9129_v36  ;;  %6114 = vmatpush1.bf16.msra.mxu1 %v9130_v40  ;;  %v9141_v36 = vld [vmem:[#allocation32_spill] sm:$0xff]  ;;  %v9142_v40 = vld [vmem:[#allocation69_spill] sm:$0xff] }
 0xea9   :  { %6084 = vmatprep.subr.bf16.mxu0 %v9131_v45  ;;  %6116 = vmatprep.subr.bf16.mxu1 %v9132_v49  ;;  %v4352_v45 = vld [vmem:[%s8512_s9] sm:$0xff]  ;;  %v4353_v49 = vld [vmem:[%s8512_s9 + $0x8] sm:$0xff] }
 0xeac   :  { %6086 = vmatpush1.bf16.msra.mxu0 %v9133_v53  ;;  %6118 = vmatpush1.bf16.msra.mxu1 %v9134_v58  ;;  %v6151_v53 = vpack.c.bf16 %v4353_v49, %v4352_v45  ;;  %v4354_v58 = vld [vmem:[%s8512_s9 + $0x10] sm:$0xff] }
 0xead   :  { %6120 = vmatprep.subr.bf16.mxu0 %v6119_v9 }
 0xeae   :  { %6152 = vmatprep.subr.bf16.mxu1 %v6151_v53 }
 0xf62   :  { %v3943_v13 = vpop.f32.mrb[14].mxu0  ;;  %v4014_v16 = vpop.f32.mrb[14].mxu1 }
 0xf63   :  { %v6173_v24 = vadd.f32 %v3943_v13, %v9135_v18  ;;  %v3945_v31 = vpop.f32.mrb[15].mxu0  ;;  %v4016_v33 = vpop.f32.mrb[15].mxu1  ;;  %v6189_v46 = vadd.f32 %v4014_v16, %v8758_v48  ;;  %v4218_v48 = vld [vmem:[%s8511_s7 + $0x10] sm:$0xff]  ;;  %v9143_v13 = vld [vmem:[#allocation66_spill] sm:$0xff] }
 0xf64   :  { %v6174_v39 = vadd.f32 %v3945_v31, %v8757_v34  ;;  %v6190_v55 = vadd.f32 %v4016_v33, %v8823_v61  ;;  %v4219_v61 = vld [vmem:[%s8511_s7 + $0x18] sm:$0xff] }
 0xf65   :  { %6420 = vtanh.f32 %v6173_v24  ;;  %v6123_v52 = vpack.c.bf16 %v4219_v61, %v4218_v48 }
 0xf66   :  { %6422 = vtanh.f32 %v6174_v39 }
 0xf67   :  { %6424 = vtanh.f32 %v6189_v46 }
 0xf68   :  { %6426 = vtanh.f32 %v6190_v55 }
 0xf6f   :  { %v6421_v56 = vpop.eup %6420 }
 0xf70   :  { %v4027_v62 = vmul.f32 0.5, %v6421_v56  ;;  %v6423_v12 = vpop.eup %6422 }
 0xf71   :  { %v4028_v1 = vmul.f32 0.5, %v6423_v12  ;;  %v6425_v19 = vpop.eup %6424 }
 0xf72   :  { %v4031_v59 = vadd.f32 0.5, %v4027_v62  ;;  %v6427_v34 = vpop.eup %6426 }
 0xf73   :  { %v4032_v25 = vadd.f32 0.5, %v4028_v1  ;;  %v4030_v51 = vmul.f32 0.5, %v6427_v34 }
 0xf74   :  { %v4040_v3 = vmul.f32 %v6425_v19, %v4031_v59 }
 0xf75   :  { %v4039_v28 = vmul.f32 %v4032_v25, %v9136_v15  ;;  %v4034_v6 = vadd.f32 0.5, %v4030_v51 }
 0xf77   :  { %v4041_v30 = vadd.f32 %v4040_v3, %v4039_v28 }
 0xf79   :  { %6428 = vtanh.f32 %v4041_v30 }
 0xf83   :  { %v6429_v29 = vpop.eup %6428 }
 0xf84   :  { %v4043_v21 = vmul.f32 %v6429_v29, %v4034_v6 }
 0xf86   :  { %4109 = vmatmul.mubr.f32.vlgmr.msra.gmra.mrb[30].mxu0 %v4043_v21  ;;  %4180 = vmatmul.mubr.f32.vlgmr.msra.gmra.mrb[30].mxu1 %v4043_v21 }
 0xf87   :  { %6122 = vmatpush3.bf16.msra.mxu0 %v6119_v9  ;;  %4599 = vmatprep.mubr.f32.mxu0 %v9137_v37 }
 0xf88   :  { %6124 = vmatprep.subr.bf16.mxu0 %v6123_v52  ;;  %6154 = vmatpush3.bf16.msra.mxu1 %v6151_v53 }
 0xf8b   :  { %6126 = vmatpush3.bf16.msra.mxu0 %v6123_v52 }
 0xf8c   :  { %6128 = vmatprep.subr.bf16.mxu0 %v6127_v11 }
 0xf8f   :  { %6130 = vmatpush3.bf16.msra.mxu0 %v6127_v11 }
 0xf90   :  { %6132 = vmatprep.subr.bf16.mxu0 %v6131_v42 }
 0xf93   :  { %6134 = vmatpush3.bf16.msra.mxu0 %v6131_v42 }
 0xf94   :  { %6136 = vmatprep.subr.bf16.mxu0 %v6135_v54 }
 0xf97   :  { %6138 = vmatpush3.bf16.msra.mxu0 %v6135_v54 }
 0xf98   :  { %6140 = vmatprep.subr.bf16.mxu0 %v6139_v0 }
 0xf9b   :  { %6142 = vmatpush3.bf16.msra.mxu0 %v6139_v0 }
 0xf9c   :  { %6144 = vmatprep.subr.bf16.mxu0 %v6143_v10 }
 0xf9f   :  { %6146 = vmatpush3.bf16.msra.mxu0 %v6143_v10 }
 0xfa0   :  { %6148 = vmatprep.subr.bf16.mxu0 %v6147_v20 }
 0xfa3   :  { %6150 = vmatpush3.bf16.msra.mxu0 %v6147_v20 }
 0xfa6   :  { %4600 = vmatmul.mubr.f32.vlgmr.msra.gmra.mrb[32].mxu0 %v9138_v23 }
 0xfa7   :  { %4602 = vmatprep.mubr.f32.mxu0 %v9139_v27 }
 0xfaa   :  { %4603 = vmatmul.mubr.f32.gmra.mrb[34].mxu0 %v9140_v32 }
 0xfab   :  { %4605 = vmatprep.mubr.f32.mxu0 %v9141_v36 }
 0xfae   :  { %4606 = vmatmul.mubr.f32.gmra.mrb[36].mxu0 %v9142_v40 }
 0xfaf   :  { %4608 = vmatprep.mubr.f32.mxu0 %v8309_v44  ;;  %v6155_v44 = vpack.c.bf16 %v4355_v63, %v4354_v58 }
 0xfb1   :  { %6156 = vmatprep.subr.bf16.mxu1 %v6155_v44 }
 0xfb2   :  { %6158 = vmatpush3.bf16.msra.mxu1 %v6155_v44 }
0x1059   :  { %v4110_v5 = vpop.f32.mrb[30].mxu0  ;;  %v4181_v9 = vpop.f32.mrb[30].mxu1 }
0x105a   :  { %v6215_v16 = vadd.f32 %v4110_v5, %v9143_v13  ;;  %v4112_v18 = vpop.f32.mrb[31].mxu0  ;;  %v4183_v24 = vpop.f32.mrb[31].mxu1  ;;  %v6217_v33 = vadd.f32 %v4181_v9, %v7528_v43  ;;  %v4521_v43 = vld [vmem:[%s8513_s8] ss:$0 sm:$0xff] }
0x105b   :  { %v6216_v31 = vadd.f32 %v4112_v18, %v8795_v41  ;;  %v6218_v39 = vadd.f32 %v4183_v24, %v7535_v2 }
0x105c   :  { %6430 = vtanh.f32 %v6215_v16 }
0x105d   :  { %6432 = vtanh.f32 %v6216_v31 }
0x105e   :  { %6434 = vtanh.f32 %v6217_v33 }
0x105f   :  { %6436 = vtanh.f32 %v6218_v39 }
0x1066   :  { %v6431_v46 = vpop.eup %6430 }
0x1067   :  { %v4190_v55 = vmul.f32 0.5, %v6431_v46  ;;  %v6433_v56 = vpop.eup %6432 }
0x1068   :  { %v4191_v12 = vmul.f32 0.5, %v6433_v56  ;;  %v6435_v59 = vpop.eup %6434 }
0x1069   :  { %v4194_v62 = vadd.f32 0.5, %v4190_v55  ;;  %v6437_v41 = vpop.eup %6436 }
0x106a   :  { %v4195_v1 = vadd.f32 0.5, %v4191_v12  ;;  %v4193_v15 = vmul.f32 0.5, %v6437_v41 }
0x106b   :  { %v4203_v19 = vmul.f32 %v6435_v59, %v4194_v62 }
0x106c   :  { %v4202_v25 = vmul.f32 %v4195_v1, %v8306_v8  ;;  %v4197_v28 = vadd.f32 0.5, %v4193_v15 }
0x106e   :  { %v4204_v3 = vadd.f32 %v4203_v19, %v4202_v25 }
0x1070   :  { %6438 = vtanh.f32 %v4204_v3 }
0x1079   :  { %v4601_v2 = vpop.f32.mrb[32].mxu0 }
0x107a   :  { %v4311_v30 = vadd.f32 %v4601_v2, %v4521_v43  ;;  %v4305_v34 = vpop.f32.mrb[33].mxu0  ;;  %v6439_v51 = vpop.eup %6438 }
0x107b   :  { %v4306_v48 = vadd.f32 %v4521_v43, %v4305_v34  ;;  %v4206_v61 = vmul.f32 %v6439_v51, %v4197_v28 }
0x107c   :  { %v4345_v21 = vmax.f32 %v4311_v30, 0.0 }
0x107d   :  { %v4344_v6 = vmax.f32 %v4306_v48, 0.0  ;;  %v4604_v29 = vpop.f32.mrb[34].mxu0  ;;  %4609 = vmatmul.mubr.f32.gmra.mrb[38].mxu0 %v4206_v61 }
0x107e   :  { %v4321_v52 = vadd.f32 %v4604_v29, %v4521_v43  ;;  %v4315_v8 = vpop.f32.mrb[35].mxu0 }
0x107f   :  { %v4316_v22 = vadd.f32 %v4521_v43, %v4315_v8  ;;  %4619 = vmatprep.mubr.msk.f32.mxu1 %vm84_vm0, %v4344_v6 }
0x1080   :  { %4620 = vmatmul.mubr.msk.f32.vlgmr.msra.gmra.mrb[32].mxu1 %vm84_vm0, %v4345_v21  ;;  %v4347_v11 = vmax.f32 %v4321_v52, 0.0 }
0x1081   :  { %v4346_v26 = vmax.f32 %v4316_v22, 0.0  ;;  %v4607_v37 = vpop.f32.mrb[36].mxu0 }
0x1082   :  { %v4331_v35 = vadd.f32 %v4607_v37, %v4521_v43  ;;  %v4325_v38 = vpop.f32.mrb[37].mxu0 }
0x1083   :  { %v4326_v42 = vadd.f32 %v4521_v43, %v4325_v38  ;;  %4622 = vmatprep.mubr.msk.f32.mxu1 %vm84_vm0, %v4346_v26 }
0x1084   :  { %4623 = vmatmul.mubr.msk.f32.gmra.mrb[34].mxu1 %vm84_vm0, %v4347_v11  ;;  %v4349_v50 = vmax.f32 %v4331_v35, 0.0 }
0x1085   :  { %v4348_v47 = vmax.f32 %v4326_v42, 0.0 }
0x1087   :  { %4625 = vmatprep.mubr.msk.f32.mxu1 %vm84_vm0, %v4348_v47 }
0x1088   :  { %4626 = vmatmul.mubr.msk.f32.gmra.mrb[36].mxu1 %vm84_vm0, %v4349_v50 }
0x1150   :  { %v4610_v54 = vpop.f32.mrb[38].mxu0 }
0x1151   :  { %v4341_v60 = vadd.f32 %v4610_v54, %v4521_v43  ;;  %v4335_v0 = vpop.f32.mrb[39].mxu0 }
0x1152   :  { %v4336_v4 = vadd.f32 %v4521_v43, %v4335_v0 }
0x1153   :  { %v4621_v7 = vpop.f32.mrb[32].mxu1  ;;  %v4351_v23 = vmax.f32 %v4341_v60, 0.0 }
0x1154   :  { %v4459_v10 = vadd.f32 %v4621_v7, %v4522_v57  ;;  %v4453_v14 = vpop.f32.mrb[33].mxu1  ;;  %v4350_v17 = vmax.f32 %v4336_v4, 0.0 }
0x1155   :  { %v4454_v20 = vadd.f32 %v4522_v57, %v4453_v14 }
0x1156   :  { %4494 = vst.msk [vmem:[%s8515_s11 + $0x8] sm:$0xff] %vm4492_vm1, %v4459_v10  ;;  %4628 = vmatprep.mubr.msk.f32.mxu1 %vm84_vm0, %v4350_v17 }
0x1157   :  { %4493 = vst.msk [vmem:[%s8515_s11] sm:$0xff] %vm4492_vm1, %v4454_v20  ;;  %v4624_v27 = vpop.f32.mrb[34].mxu1  ;;  %4629 = vmatmul.mubr.msk.f32.gmra.mrb[38].mxu1 %vm84_vm0, %v4351_v23 }
0x1158   :  { %v4469_v32 = vadd.f32 %v4624_v27, %v4522_v57  ;;  %v4463_v36 = vpop.f32.mrb[35].mxu1 }
0x1159   :  { %v4464_v40 = vadd.f32 %v4522_v57, %v4463_v36 }
0x115a   :  { %4496 = vst.msk [vmem:[%s8515_s11 + $0x18] sm:$0xff] %vm4492_vm1, %v4469_v32 }
0x115b   :  { %4495 = vst.msk [vmem:[%s8515_s11 + $0x10] sm:$0xff] %vm4492_vm1, %v4464_v40  ;;  %v4627_v45 = vpop.f32.mrb[36].mxu1 }
0x115c   :  { %v4479_v49 = vadd.f32 %v4627_v45, %v4522_v57  ;;  %v4473_v53 = vpop.f32.mrb[37].mxu1 }
0x115d   :  { %v4474_v58 = vadd.f32 %v4522_v57, %v4473_v53 }
0x115e   :  { %4498 = vst.msk [vmem:[%s8515_s11 + $0x28] sm:$0xff] %vm4492_vm1, %v4479_v49 }
0x115f   :  { %4497 = vst.msk [vmem:[%s8515_s11 + $0x20] sm:$0xff] %vm4492_vm1, %v4474_v58 }
0x122a   :  { %v4630_v63 = vpop.f32.mrb[38].mxu1 }
0x122b   :  { %v4489_v44 = vadd.f32 %v4630_v63, %v4522_v57  ;;  %v4483_v5 = vpop.f32.mrb[39].mxu1 }
0x122c   :  { %v4484_v9 = vadd.f32 %v4522_v57, %v4483_v5 }
0x122d   :  { %4500 = vst.msk [vmem:[%s8515_s11 + $0x38] sm:$0xff] %vm4492_vm1, %v4489_v44 }
0x122e   :  { %4499 = vst.msk [vmem:[%s8515_s11 + $0x30] sm:$0xff] %vm4492_vm1, %v4484_v9 }

</bundles_post_ra>
